<compile_context>
chip_gen: v6e
topology: v6e:2x2x1
jax: 0.10.0
libtpu: 0.0.40
codegen_flags: <defaults>
</compile_context>

<pallas_src>
import functools

import jax
import jax.numpy as jnp
import numpy as np
from jax import lax
from jax.experimental import pallas as pl
from jax.experimental.pallas import tpu as pltpu

LENS_X = 64  # hard-coded in the PyTorch forward


# ---------------------------------------------------------------------------
# Pallas kernel
# ---------------------------------------------------------------------------
def _mlp_fused_kernel(xf_ref, w1f_ref, b1f_ref, wconv_ref, bconv_ref,
                      w23f_ref, b23f_ref, w3f_ref, b3f_ref,
                      of_ref, xp_ref, *, H, W, C, OFF, TR, BB):
    # xf_ref   : (BB, TR+H, W*Cin)   token-folded input (W tokens per row), BB batch elems
    # w1f_ref  : (W*Cin, W*C)        kron(I_W, w1)              -- folded fc1
    # w3f_ref  : (W*Cin, W*Cout)     kron(I_W, w3)              -- folded linear (template)
    # w23f_ref : (W*C,   W*Cout)     kron(I_W, diag(bn) fc2.linear) -- folded search tail
    # wconv_ref: (49, W*C)           per-channel 7x7 taps, lane-tiled over W
    # of_ref   : (BB, TR+H, W*Cout)  token-folded output
    # xp_ref   : (8+H+8, 2*OFF+W*C)  VMEM scratch: zero halo + fc1 activations (1 elem)
    f32 = jnp.float32
    WC = W * C
    ROWS, LANES = xp_ref.shape
    ROW0 = 8                                   # interior rows start here (sublane aligned)

    # ---- folded linears over all BB elements at once (M = BB*TR / BB*H rows) ----------
    tmpl = xf_ref[:, :TR, :].astype(f32).reshape(BB * TR, -1)
    srch = xf_ref[:, TR:, :].astype(f32).reshape(BB * H, -1)
    t_out = jnp.dot(tmpl, w3f_ref[...], preferred_element_type=f32) + b3f_ref[...]
    s1 = jnp.dot(srch, w1f_ref[...], preferred_element_type=f32) + b1f_ref[...]   # (BB*H, WC)

    # ---- zero only the halo strips of the conv scratch (interior is overwritten) -------
    xp_ref[0:ROW0, :] = jnp.zeros((ROW0, LANES), f32)                      # top strip
    xp_ref[ROW0 + H:ROWS, :] = jnp.zeros((ROWS - ROW0 - H, LANES), f32)    # bottom strip
    xp_ref[ROW0:ROW0 + H, 0:OFF] = jnp.zeros((H, OFF), f32)                # left strip
    xp_ref[ROW0:ROW0 + H, OFF + WC:LANES] = jnp.zeros((H, LANES - OFF - WC), f32)  # right

    bconv = bconv_ref[...]
    g_rows = []
    for bi in range(BB):
        s_bi = s1[bi * H:(bi + 1) * H, :]                       # (H, WC)
        # sublane- and lane-aligned interior store -> plain unmasked vst
        xp_ref[ROW0:ROW0 + H, OFF:OFF + WC] = s_bi

        # fused multi-scale depthwise 7x7: one slab load per dy, dx shifts via lane rolls,
        # one partial accumulator per dy (tree-summed below).
        accs = []
        for dy in range(7):
            slab = xp_ref[ROW0 - 3 + dy:ROW0 - 3 + dy + H, :]   # (H, LANES)
            base = dy * 7
            acc = slab[:, OFF:OFF + WC] * wconv_ref[base + 3:base + 4, :]     # dx = 3
            left = slab
            right = slab
            for step in (1, 2, 3):
                left = pltpu.roll(left, C, axis=1)              # window now shows dx = 3-step
                right = pltpu.roll(right, LANES - C, axis=1)    # window now shows dx = 3+step
                acc = acc + left[:, OFF:OFF + WC] * wconv_ref[base + 3 - step:base + 4 - step, :]
                acc = acc + right[:, OFF:OFF + WC] * wconv_ref[base + 3 + step:base + 4 + step, :]
            accs.append(acc)
        while len(accs) > 1:                                    # tree-sum the 7 dy partials
            nxt = [accs[i] + accs[i + 1] for i in range(0, len(accs) - 1, 2)]
            if len(accs) % 2:
                nxt.append(accs[-1])
            accs = nxt

        y = accs[0] + bconv + s_bi                              # conv bias + residual
        # tanh-approx GELU (tanh -> EUP slot); |err| ~ 5e-4, well inside the 1e-2 tolerance
        g = 0.5 * y * (1.0 + jnp.tanh(0.7978845608028654 * (y + 0.044715 * (y * y * y))))
        g_rows.append(g)

    g_all = g_rows[0] if BB == 1 else jnp.concatenate(g_rows, axis=0)       # (BB*H, WC)
    # TODO(synk): BatchNorm2d is eval-mode only (running stats folded into w23f/b23f in the
    #             wrapper); training-mode batch statistics are not computed here.
    s_out = jnp.dot(g_all, w23f_ref[...], preferred_element_type=f32) + b23f_ref[...]

    of_ref[:, :TR, :] = t_out.reshape(BB, TR, -1).astype(of_ref.dtype)
    of_ref[:, TR:, :] = s_out.reshape(BB, H, -1).astype(of_ref.dtype)


def mlp_forward_pallas(x, p, h, w, batch_block=None):
    B, Np, Cin = x.shape
    hw = Np - LENS_X
    assert hw == h * w, "spatial dims must match the search-token count"
    assert LENS_X % w == 0, "token folding requires LENS_X % w == 0"
    hidden = p["w1"].shape[1]
    Cout = p["w3"].shape[1]
    rows = Np // w              # folded token-rows per batch element
    tr = LENS_X // w            # ... of which this many are template rows
    assert h % 8 == 0 and tr % 8 == 0, "sublane-aligned token folding assumed"
    assert (w * hidden) % 128 == 0, "lane-dense folded hidden width must be a multiple of 128"
    f32 = jnp.float32

    if batch_block is None:
        if B % 2 == 0 and B > 2:
            batch_block = B // 2   # grid = 2: both v7x TensorCores busy, M-rows maximised
        elif B == 2:
            batch_block = 1        # grid = 2 keeps both v7x TCs busy at tiny batch
        else:
            batch_block = B        # odd batch: one fat step
    assert B % batch_block == 0

    # ---- folded / fused parameters (tiny one-time XLA ops, outside the kernel) ---------
    eye = jnp.eye(w, dtype=f32)
    w2p = p["w2"] @ p["w3"]                          # fc2 . linear
    b2p = p["b2"] @ p["w3"] + p["b3"]
    # BatchNorm (eval) folded into the fc2.linear weights: (g*scale+shift) @ w2p + b2p
    w23 = p["bn_scale"][:, None] * w2p
    b23 = p["bn_shift"] @ w2p + b2p
    w1f = jnp.kron(eye, p["w1"])                     # (w*Cin,    w*hidden)
    w23f = jnp.kron(eye, w23)                        # (w*hidden, w*Cout)
    w3f = jnp.kron(eye, p["w3"])                     # (w*Cin,    w*Cout)
    b1f = jnp.tile(p["b1"], w)[None, :]
    b23f = jnp.tile(b23, w)[None, :]
    b3f = jnp.tile(p["b3"], w)[None, :]
    wconv = jnp.tile(p["conv_w49"], (1, w))          # (49, w*hidden) lane-tiled taps
    bconv = jnp.tile(p["conv_b"], w)[None, :]

    xf = x.reshape(B, rows, w * Cin)                 # free bitcast: fold w tokens per row

    # conv scratch geometry: interior at rows [8, 8+h), lanes [off, off+w*hidden)
    off = pl.cdiv(3 * hidden, 128) * 128             # 128-aligned halo, >= 3*hidden lanes
    lanes = off + w * hidden + off
    srows = 8 + h + 8

    kernel = functools.partial(_mlp_fused_kernel, H=h, W=w, C=hidden, OFF=off,
                               TR=tr, BB=batch_block)

    # TODO(synk): at much larger H/W/C, tile H into row strips (6-row halo) and store the
    #             kron-folded weights / MXU operands in bf16 (f32 accumulate) for v6e/v7x.
    blk_bytes = 4 * (
        batch_block * rows * w * (Cin + Cout)                    # x / out blocks
        + (w * Cin) * (w * hidden) + (w * hidden)                # w1f, b1f
        + 49 * (w * hidden) + (w * hidden)                       # wconv, bconv
        + (w * hidden) * (w * Cout) + (w * Cout)                 # w23f, b23f
        + (w * Cin) * (w * Cout) + (w * Cout))                   # w3f, b3f
    vmem_limit = int(min(32 * 1024 * 1024,
                         max(4 * 1024 * 1024,
                             2 * blk_bytes + 4 * srows * lanes + (1 << 20))))

    outf = pl.pallas_call(
        kernel,
        out_shape=jax.ShapeDtypeStruct((B, rows, w * Cout), x.dtype),
        grid=(B // batch_block,),
        in_specs=[
            pl.BlockSpec((batch_block, rows, w * Cin), lambda b: (b, 0, 0)),
            pl.BlockSpec((w * Cin, w * hidden), lambda b: (0, 0)),
            pl.BlockSpec((1, w * hidden), lambda b: (0, 0)),
            pl.BlockSpec((49, w * hidden), lambda b: (0, 0)),
            pl.BlockSpec((1, w * hidden), lambda b: (0, 0)),
            pl.BlockSpec((w * hidden, w * Cout), lambda b: (0, 0)),
            pl.BlockSpec((1, w * Cout), lambda b: (0, 0)),
            pl.BlockSpec((w * Cin, w * Cout), lambda b: (0, 0)),
            pl.BlockSpec((1, w * Cout), lambda b: (0, 0)),
        ],
        out_specs=pl.BlockSpec((batch_block, rows, w * Cout), lambda b: (b, 0, 0)),
        scratch_shapes=[pltpu.VMEM((srows, lanes), jnp.float32)],
        compiler_params=pltpu.CompilerParams(
            dimension_semantics=("parallel",),
            vmem_limit_bytes=vmem_limit),
    )(xf, w1f, b1f, wconv, bconv, w23f, b23f, w3f, b3f)

    return outf.reshape(B, Np, Cout)


# ---------------------------------------------------------------------------
# Parameters (deterministic synthetic init, shapes as in the PyTorch __init__)
# ---------------------------------------------------------------------------
def init_params(key, in_features, hidden_features, out_features, scales=(1, 3, 5, 7)):
    n = len(scales)
    channels = [hidden_features - hidden_features // n * (n - 1)] + [hidden_features // n] * (n - 1)
    keys = jax.random.split(key, 20)

    def nrm(k, shape, s=0.1):
        return jax.random.normal(k, shape, jnp.float32) * s

    p = {"channels": channels, "scales": scales}
    p["w1"] = nrm(keys[0], (in_features, hidden_features))
    p["b1"] = nrm(keys[1], (hidden_features,))

    conv_ws, conv_bs = [], []
    for i, (ch, k) in enumerate(zip(channels, scales)):
        conv_ws.append(nrm(keys[2 + i], (ch, k, k)))   # depthwise: (C_group, k, k)
        conv_bs.append(nrm(keys[6 + i], (ch,)))
    p["conv_ws"] = conv_ws
    p["conv_b"] = jnp.concatenate(conv_bs)

    # Zero-embed each k x k kernel at the center of a 7x7 kernel, concat over groups.
    full = []
    for wk, k in zip(conv_ws, scales):
        pad = (7 - k) // 2
        full.append(jnp.pad(wk, ((0, 0), (pad, pad), (pad, pad))))
    w7 = jnp.concatenate(full, axis=0)                         # (hidden, 7, 7)
    p["conv_w49"] = jnp.transpose(w7, (1, 2, 0)).reshape(49, hidden_features)

    # BatchNorm2d (eval mode): fold into per-channel scale/shift.
    eps = 1e-5
    p["bn_gamma"] = 1.0 + nrm(keys[10], (hidden_features,))
    p["bn_beta"] = nrm(keys[11], (hidden_features,))
    p["bn_mean"] = nrm(keys[12], (hidden_features,))
    p["bn_var"] = 1.0 + jax.random.uniform(keys[13], (hidden_features,), jnp.float32, 0.0, 0.5)
    p["bn_scale"] = p["bn_gamma"] / jnp.sqrt(p["bn_var"] + eps)
    p["bn_shift"] = p["bn_beta"] - p["bn_mean"] * p["bn_scale"]

    p["w2"] = nrm(keys[14], (hidden_features, out_features))
    p["b2"] = nrm(keys[15], (out_features,))
    p["w3"] = nrm(keys[16], (out_features, out_features))
    p["b3"] = nrm(keys[17], (out_features,))
    return p


# ---------------------------------------------------------------------------
# Pure-JAX reference (ground truth for the fused/folded Pallas path)
# ---------------------------------------------------------------------------
def mlp_forward_ref(x, p, h, w):
    B, Np, Cin = x.shape
    template = x[:, :LENS_X]
    search = x[:, LENS_X:]
    hw = Np - LENS_X
    hidden = p["w1"].shape[1]

    s = search.reshape(B * hw, Cin) @ p["w1"] + p["b1"]
    s = s.reshape(B, hw, hidden)
    s = jnp.transpose(s, (0, 2, 1)).reshape(B, hidden, h, w)               # NCHW
    outs, c0 = [], 0
    for wk, k, ch in zip(p["conv_ws"], p["scales"], p["channels"]):
        feat = s[:, c0:c0 + ch]
        o = lax.conv_general_dilated(
            feat, wk[:, None, :, :], window_strides=(1, 1),
            padding=[(k // 2, k // 2)] * 2, feature_group_count=ch,
            dimension_numbers=("NCHW", "OIHW", "NCHW"))
        outs.append(o)
        c0 += ch
    d = jnp.concatenate(outs, axis=1) + p["conv_b"].reshape(1, hidden, 1, 1) + s
    g = jax.nn.gelu(d, approximate=False)
    bn = ((g - p["bn_mean"].reshape(1, -1, 1, 1))
          / jnp.sqrt(p["bn_var"] + 1e-5).reshape(1, -1, 1, 1)
          * p["bn_gamma"].reshape(1, -1, 1, 1)
          + p["bn_beta"].reshape(1, -1, 1, 1))
    s = bn.reshape(B, hidden, hw).transpose(0, 2, 1).reshape(B * hw, hidden)
    s = s @ p["w2"] + p["b2"]
    s = s.reshape(B, hw, -1)
    xcat = jnp.concatenate([template, s], axis=1)
    out = xcat.reshape(B * Np, -1) @ p["w3"] + p["b3"]
    return out.reshape(B, Np, -1)


if __name__ == "__main__":
    B = 2
    in_features = 16
    hidden_features = 32
    out_features = in_features          # required so concat([template, search]) is valid
    h = w = 8
    Np = LENS_X + h * w                 # 64 template tokens + h*w search tokens

    key = jax.random.PRNGKey(0)
    kx, kp = jax.random.split(key)
    x = jax.random.normal(kx, (B, Np, in_features), jnp.float32)
    params = init_params(kp, in_features, hidden_features, out_features)

    ref = jax.block_until_ready(mlp_forward_ref(x, params, h, w))

    # Exercise both pipeline shapes: batch_block=1 (grid=2, megacore path) and
    # batch_block=2 (grid=1, batched-M matmul path).
    for bb in (1, 2):
        out = jax.block_until_ready(mlp_forward_pallas(x, params, h, w, batch_block=bb))
        assert out.shape == (B, Np, out_features)
        np.testing.assert_allclose(np.asarray(out), np.asarray(ref), atol=1e-2, rtol=1e-2)

    print("KERNEL_OK")
</pallas_src>

<mosaic_0001>
module attributes {stable_mosaic.version = 11 : i64} {
  func.func @_mlp_fused_kernel(%arg0: i32, %arg1: memref<1x16x128xf32, #tpu.memory_space<vmem>>, %arg2: memref<128x256xf32, #tpu.memory_space<vmem>>, %arg3: memref<1x256xf32, #tpu.memory_space<vmem>>, %arg4: memref<49x256xf32, #tpu.memory_space<vmem>>, %arg5: memref<1x256xf32, #tpu.memory_space<vmem>>, %arg6: memref<256x128xf32, #tpu.memory_space<vmem>>, %arg7: memref<1x128xf32, #tpu.memory_space<vmem>>, %arg8: memref<128x128xf32, #tpu.memory_space<vmem>>, %arg9: memref<1x128xf32, #tpu.memory_space<vmem>>, %arg10: memref<1x16x128xf32, #tpu.memory_space<vmem>>, %arg11: memref<24x512xf32, #tpu.memory_space<vmem>>) attributes {dimension_semantics = [#tpu.dimension_semantics<parallel>], iteration_bounds = array<i64: 2>, scalar_prefetch = 0 : i64, scratch_operands = 1 : i64, tpu.core_type = #tpu.core_type<tc>, window_params = [{transform_indices = @transform_0, window_bounds = array<i64: 1, 16, 128>}, {pipeline_mode = #tpu.pipeline_mode<synchronous>, transform_indices = @transform_1, window_bounds = array<i64: 128, 256>}, {pipeline_mode = #tpu.pipeline_mode<synchronous>, transform_indices = @transform_2, window_bounds = array<i64: 1, 256>}, {pipeline_mode = #tpu.pipeline_mode<synchronous>, transform_indices = @transform_3, window_bounds = array<i64: 49, 256>}, {pipeline_mode = #tpu.pipeline_mode<synchronous>, transform_indices = @transform_4, window_bounds = array<i64: 1, 256>}, {pipeline_mode = #tpu.pipeline_mode<synchronous>, transform_indices = @transform_5, window_bounds = array<i64: 256, 128>}, {pipeline_mode = #tpu.pipeline_mode<synchronous>, transform_indices = @transform_6, window_bounds = array<i64: 1, 128>}, {pipeline_mode = #tpu.pipeline_mode<synchronous>, transform_indices = @transform_7, window_bounds = array<i64: 128, 128>}, {pipeline_mode = #tpu.pipeline_mode<synchronous>, transform_indices = @transform_8, window_bounds = array<i64: 1, 128>}, {transform_indices = @transform_9, window_bounds = array<i64: 1, 16, 128>}]} {
    %c0 = arith.constant 0 : index
    %c0_0 = arith.constant 0 : index
    %c0_1 = arith.constant 0 : index
    %0 = vector.load %arg1[%c0, %c0_0, %c0_1] : memref<1x16x128xf32, #tpu.memory_space<vmem>>, vector<1x8x128xf32>
    %1 = vector.shape_cast %0 : vector<1x8x128xf32> to vector<8x128xf32>
    %c0_2 = arith.constant 0 : index
    %c8 = arith.constant 8 : index
    %c0_3 = arith.constant 0 : index
    %2 = vector.load %arg1[%c0_2, %c8, %c0_3] : memref<1x16x128xf32, #tpu.memory_space<vmem>>, vector<1x8x128xf32>
    %3 = vector.shape_cast %2 : vector<1x8x128xf32> to vector<8x128xf32>
    %c0_4 = arith.constant 0 : index
    %c0_5 = arith.constant 0 : index
    %4 = vector.load %arg8[%c0_4, %c0_5] : memref<128x128xf32, #tpu.memory_space<vmem>>, vector<128x128xf32>
    %cst = arith.constant dense<0.000000e+00> : vector<8x128xf32>
    %5 = tpu.matmul %1, %4, %cst {dimension_numbers = #tpu.dot_dimension_numbers<[1], [0], [0], [1], [0, 0, 1, 1], [], []>} : vector<8x128xf32>, vector<128x128xf32>, vector<8x128xf32> -> vector<8x128xf32>
    %c0_6 = arith.constant 0 : index
    %c0_7 = arith.constant 0 : index
    %6 = vector.load %arg9[%c0_6, %c0_7] : memref<1x128xf32, #tpu.memory_space<vmem>>, vector<1x128xf32>
    %7 = vector.broadcast %6 : vector<1x128xf32> to vector<8x128xf32>
    %8 = arith.addf %5, %7 : vector<8x128xf32>
    %c0_8 = arith.constant 0 : index
    %c0_9 = arith.constant 0 : index
    %9 = vector.load %arg2[%c0_8, %c0_9] : memref<128x256xf32, #tpu.memory_space<vmem>>, vector<128x256xf32>
    %cst_10 = arith.constant dense<0.000000e+00> : vector<8x256xf32>
    %10 = tpu.matmul %3, %9, %cst_10 {dimension_numbers = #tpu.dot_dimension_numbers<[1], [0], [0], [1], [0, 0, 1, 1], [], []>} : vector<8x128xf32>, vector<128x256xf32>, vector<8x256xf32> -> vector<8x256xf32>
    %c0_11 = arith.constant 0 : index
    %c0_12 = arith.constant 0 : index
    %11 = vector.load %arg3[%c0_11, %c0_12] : memref<1x256xf32, #tpu.memory_space<vmem>>, vector<1x256xf32>
    %12 = vector.broadcast %11 : vector<1x256xf32> to vector<8x256xf32>
    %13 = arith.addf %10, %12 : vector<8x256xf32>
    %cst_13 = arith.constant 0.000000e+00 : f32
    %14 = vector.broadcast %cst_13 : f32 to vector<8x512xf32>
    %c0_14 = arith.constant 0 : index
    %c0_15 = arith.constant 0 : index
    %15 = vector.load %arg11[%c0_14, %c0_15] : memref<24x512xf32, #tpu.memory_space<vmem>>, vector<8x512xf32>
    tpu.vector_store %arg11[%c0_14, %c0_15], %14 {strides = array<i32>} : memref<24x512xf32, #tpu.memory_space<vmem>>, vector<8x512xf32>,
    %cst_16 = arith.constant 0.000000e+00 : f32
    %16 = vector.broadcast %cst_16 : f32 to vector<8x512xf32>
    %c16 = arith.constant 16 : index
    %c0_17 = arith.constant 0 : index
    %17 = vector.load %arg11[%c16, %c0_17] : memref<24x512xf32, #tpu.memory_space<vmem>>, vector<8x512xf32>
    tpu.vector_store %arg11[%c16, %c0_17], %16 {strides = array<i32>} : memref<24x512xf32, #tpu.memory_space<vmem>>, vector<8x512xf32>,
    %cst_18 = arith.constant 0.000000e+00 : f32
    %18 = vector.broadcast %cst_18 : f32 to vector<8x128xf32>
    %c8_19 = arith.constant 8 : index
    %c0_20 = arith.constant 0 : index
    %19 = vector.load %arg11[%c8_19, %c0_20] : memref<24x512xf32, #tpu.memory_space<vmem>>, vector<8x128xf32>
    tpu.vector_store %arg11[%c8_19, %c0_20], %18 {strides = array<i32>} : memref<24x512xf32, #tpu.memory_space<vmem>>, vector<8x128xf32>,
    %cst_21 = arith.constant 0.000000e+00 : f32
    %20 = vector.broadcast %cst_21 : f32 to vector<8x128xf32>
    %c8_22 = arith.constant 8 : index
    %c384 = arith.constant 384 : index
    %21 = vector.load %arg11[%c8_22, %c384] : memref<24x512xf32, #tpu.memory_space<vmem>>, vector<8x128xf32>
    tpu.vector_store %arg11[%c8_22, %c384], %20 {strides = array<i32>} : memref<24x512xf32, #tpu.memory_space<vmem>>, vector<8x128xf32>,
    %c0_23 = arith.constant 0 : index
    %c0_24 = arith.constant 0 : index
    %22 = vector.load %arg5[%c0_23, %c0_24] : memref<1x256xf32, #tpu.memory_space<vmem>>, vector<1x256xf32>
    %c8_25 = arith.constant 8 : index
    %c128 = arith.constant 128 : index
    %23 = vector.load %arg11[%c8_25, %c128] : memref<24x512xf32, #tpu.memory_space<vmem>>, vector<8x256xf32>
    tpu.vector_store %arg11[%c8_25, %c128], %13 {strides = array<i32>} : memref<24x512xf32, #tpu.memory_space<vmem>>, vector<8x256xf32>,
    %c5 = arith.constant 5 : index
    %c0_26 = arith.constant 0 : index
    %24 = vector.load %arg11[%c5, %c0_26] : memref<24x512xf32, #tpu.memory_space<vmem>>, vector<8x512xf32>
    %25 = vector.extract_strided_slice %24 {offsets = [0, 128], sizes = [8, 256], strides = [1, 1]} : vector<8x512xf32> to vector<8x256xf32>
    %c3 = arith.constant 3 : index
    %c0_27 = arith.constant 0 : index
    %26 = vector.load %arg4[%c3, %c0_27] : memref<49x256xf32, #tpu.memory_space<vmem>>, vector<1x256xf32>
    %27 = vector.broadcast %26 : vector<1x256xf32> to vector<8x256xf32>
    %28 = arith.mulf %25, %27 : vector<8x256xf32>
    %c32_i32 = arith.constant 32 : i32
    %29 = tpu.dynamic_rotate %24 by %c32_i32 dim 1 : vector<8x512xf32>, i32 -> vector<8x512xf32>
    %c480_i32 = arith.constant 480 : i32
    %30 = tpu.dynamic_rotate %24 by %c480_i32 dim 1 : vector<8x512xf32>, i32 -> vector<8x512xf32>
    %31 = vector.extract_strided_slice %29 {offsets = [0, 128], sizes = [8, 256], strides = [1, 1]} : vector<8x512xf32> to vector<8x256xf32>
    %c2 = arith.constant 2 : index
    %c0_28 = arith.constant 0 : index
    %32 = vector.load %arg4[%c2, %c0_28] : memref<49x256xf32, #tpu.memory_space<vmem>>, vector<1x256xf32>
    %33 = vector.broadcast %32 : vector<1x256xf32> to vector<8x256xf32>
    %34 = arith.mulf %31, %33 : vector<8x256xf32>
    %35 = arith.addf %28, %34 : vector<8x256xf32>
    %36 = vector.extract_strided_slice %30 {offsets = [0, 128], sizes = [8, 256], strides = [1, 1]} : vector<8x512xf32> to vector<8x256xf32>
    %c4 = arith.constant 4 : index
    %c0_29 = arith.constant 0 : index
    %37 = vector.load %arg4[%c4, %c0_29] : memref<49x256xf32, #tpu.memory_space<vmem>>, vector<1x256xf32>
    %38 = vector.broadcast %37 : vector<1x256xf32> to vector<8x256xf32>
    %39 = arith.mulf %36, %38 : vector<8x256xf32>
    %40 = arith.addf %35, %39 : vector<8x256xf32>
    %c32_i32_30 = arith.constant 32 : i32
    %41 = tpu.dynamic_rotate %29 by %c32_i32_30 dim 1 : vector<8x512xf32>, i32 -> vector<8x512xf32>
    %c480_i32_31 = arith.constant 480 : i32
    %42 = tpu.dynamic_rotate %30 by %c480_i32_31 dim 1 : vector<8x512xf32>, i32 -> vector<8x512xf32>
    %43 = vector.extract_strided_slice %41 {offsets = [0, 128], sizes = [8, 256], strides = [1, 1]} : vector<8x512xf32> to vector<8x256xf32>
    %c1 = arith.constant 1 : index
    %c0_32 = arith.constant 0 : index
    %44 = vector.load %arg4[%c1, %c0_32] : memref<49x256xf32, #tpu.memory_space<vmem>>, vector<1x256xf32>
    %45 = vector.broadcast %44 : vector<1x256xf32> to vector<8x256xf32>
    %46 = arith.mulf %43, %45 : vector<8x256xf32>
    %47 = arith.addf %40, %46 : vector<8x256xf32>
    %48 = vector.extract_strided_slice %42 {offsets = [0, 128], sizes = [8, 256], strides = [1, 1]} : vector<8x512xf32> to vector<8x256xf32>
    %c5_33 = arith.constant 5 : index
    %c0_34 = arith.constant 0 : index
    %49 = vector.load %arg4[%c5_33, %c0_34] : memref<49x256xf32, #tpu.memory_space<vmem>>, vector<1x256xf32>
    %50 = vector.broadcast %49 : vector<1x256xf32> to vector<8x256xf32>
    %51 = arith.mulf %48, %50 : vector<8x256xf32>
    %52 = arith.addf %47, %51 : vector<8x256xf32>
    %c32_i32_35 = arith.constant 32 : i32
    %53 = tpu.dynamic_rotate %41 by %c32_i32_35 dim 1 : vector<8x512xf32>, i32 -> vector<8x512xf32>
    %c480_i32_36 = arith.constant 480 : i32
    %54 = tpu.dynamic_rotate %42 by %c480_i32_36 dim 1 : vector<8x512xf32>, i32 -> vector<8x512xf32>
    %55 = vector.extract_strided_slice %53 {offsets = [0, 128], sizes = [8, 256], strides = [1, 1]} : vector<8x512xf32> to vector<8x256xf32>
    %c0_37 = arith.constant 0 : index
    %c0_38 = arith.constant 0 : index
    %56 = vector.load %arg4[%c0_37, %c0_38] : memref<49x256xf32, #tpu.memory_space<vmem>>, vector<1x256xf32>
    %57 = vector.broadcast %56 : vector<1x256xf32> to vector<8x256xf32>
    %58 = arith.mulf %55, %57 : vector<8x256xf32>
    %59 = arith.addf %52, %58 : vector<8x256xf32>
    %60 = vector.extract_strided_slice %54 {offsets = [0, 128], sizes = [8, 256], strides = [1, 1]} : vector<8x512xf32> to vector<8x256xf32>
    %c6 = arith.constant 6 : index
    %c0_39 = arith.constant 0 : index
    %61 = vector.load %arg4[%c6, %c0_39] : memref<49x256xf32, #tpu.memory_space<vmem>>, vector<1x256xf32>
    %62 = vector.broadcast %61 : vector<1x256xf32> to vector<8x256xf32>
    %63 = arith.mulf %60, %62 : vector<8x256xf32>
    %64 = arith.addf %59, %63 : vector<8x256xf32>
    %c6_40 = arith.constant 6 : index
    %c0_41 = arith.constant 0 : index
    %65 = vector.load %arg11[%c6_40, %c0_41] : memref<24x512xf32, #tpu.memory_space<vmem>>, vector<8x512xf32>
    %66 = vector.extract_strided_slice %65 {offsets = [0, 128], sizes = [8, 256], strides = [1, 1]} : vector<8x512xf32> to vector<8x256xf32>
    %c10 = arith.constant 10 : index
    %c0_42 = arith.constant 0 : index
    %67 = vector.load %arg4[%c10, %c0_42] : memref<49x256xf32, #tpu.memory_space<vmem>>, vector<1x256xf32>
    %68 = vector.broadcast %67 : vector<1x256xf32> to vector<8x256xf32>
    %69 = arith.mulf %66, %68 : vector<8x256xf32>
    %c32_i32_43 = arith.constant 32 : i32
    %70 = tpu.dynamic_rotate %65 by %c32_i32_43 dim 1 : vector<8x512xf32>, i32 -> vector<8x512xf32>
    %c480_i32_44 = arith.constant 480 : i32
    %71 = tpu.dynamic_rotate %65 by %c480_i32_44 dim 1 : vector<8x512xf32>, i32 -> vector<8x512xf32>
    %72 = vector.extract_strided_slice %70 {offsets = [0, 128], sizes = [8, 256], strides = [1, 1]} : vector<8x512xf32> to vector<8x256xf32>
    %c9 = arith.constant 9 : index
    %c0_45 = arith.constant 0 : index
    %73 = vector.load %arg4[%c9, %c0_45] : memref<49x256xf32, #tpu.memory_space<vmem>>, vector<1x256xf32>
    %74 = vector.broadcast %73 : vector<1x256xf32> to vector<8x256xf32>
    %75 = arith.mulf %72, %74 : vector<8x256xf32>
    %76 = arith.addf %69, %75 : vector<8x256xf32>
    %77 = vector.extract_strided_slice %71 {offsets = [0, 128], sizes = [8, 256], strides = [1, 1]} : vector<8x512xf32> to vector<8x256xf32>
    %c11 = arith.constant 11 : index
    %c0_46 = arith.constant 0 : index
    %78 = vector.load %arg4[%c11, %c0_46] : memref<49x256xf32, #tpu.memory_space<vmem>>, vector<1x256xf32>
    %79 = vector.broadcast %78 : vector<1x256xf32> to vector<8x256xf32>
    %80 = arith.mulf %77, %79 : vector<8x256xf32>
    %81 = arith.addf %76, %80 : vector<8x256xf32>
    %c32_i32_47 = arith.constant 32 : i32
    %82 = tpu.dynamic_rotate %70 by %c32_i32_47 dim 1 : vector<8x512xf32>, i32 -> vector<8x512xf32>
    %c480_i32_48 = arith.constant 480 : i32
    %83 = tpu.dynamic_rotate %71 by %c480_i32_48 dim 1 : vector<8x512xf32>, i32 -> vector<8x512xf32>
    %84 = vector.extract_strided_slice %82 {offsets = [0, 128], sizes = [8, 256], strides = [1, 1]} : vector<8x512xf32> to vector<8x256xf32>
    %c8_49 = arith.constant 8 : index
    %c0_50 = arith.constant 0 : index
    %85 = vector.load %arg4[%c8_49, %c0_50] : memref<49x256xf32, #tpu.memory_space<vmem>>, vector<1x256xf32>
    %86 = vector.broadcast %85 : vector<1x256xf32> to vector<8x256xf32>
    %87 = arith.mulf %84, %86 : vector<8x256xf32>
    %88 = arith.addf %81, %87 : vector<8x256xf32>
    %89 = vector.extract_strided_slice %83 {offsets = [0, 128], sizes = [8, 256], strides = [1, 1]} : vector<8x512xf32> to vector<8x256xf32>
    %c12 = arith.constant 12 : index
    %c0_51 = arith.constant 0 : index
    %90 = vector.load %arg4[%c12, %c0_51] : memref<49x256xf32, #tpu.memory_space<vmem>>, vector<1x256xf32>
    %91 = vector.broadcast %90 : vector<1x256xf32> to vector<8x256xf32>
    %92 = arith.mulf %89, %91 : vector<8x256xf32>
    %93 = arith.addf %88, %92 : vector<8x256xf32>
    %c32_i32_52 = arith.constant 32 : i32
    %94 = tpu.dynamic_rotate %82 by %c32_i32_52 dim 1 : vector<8x512xf32>, i32 -> vector<8x512xf32>
    %c480_i32_53 = arith.constant 480 : i32
    %95 = tpu.dynamic_rotate %83 by %c480_i32_53 dim 1 : vector<8x512xf32>, i32 -> vector<8x512xf32>
    %96 = vector.extract_strided_slice %94 {offsets = [0, 128], sizes = [8, 256], strides = [1, 1]} : vector<8x512xf32> to vector<8x256xf32>
    %c7 = arith.constant 7 : index
    %c0_54 = arith.constant 0 : index
    %97 = vector.load %arg4[%c7, %c0_54] : memref<49x256xf32, #tpu.memory_space<vmem>>, vector<1x256xf32>
    %98 = vector.broadcast %97 : vector<1x256xf32> to vector<8x256xf32>
    %99 = arith.mulf %96, %98 : vector<8x256xf32>
    %100 = arith.addf %93, %99 : vector<8x256xf32>
    %101 = vector.extract_strided_slice %95 {offsets = [0, 128], sizes = [8, 256], strides = [1, 1]} : vector<8x512xf32> to vector<8x256xf32>
    %c13 = arith.constant 13 : index
    %c0_55 = arith.constant 0 : index
    %102 = vector.load %arg4[%c13, %c0_55] : memref<49x256xf32, #tpu.memory_space<vmem>>, vector<1x256xf32>
    %103 = vector.broadcast %102 : vector<1x256xf32> to vector<8x256xf32>
    %104 = arith.mulf %101, %103 : vector<8x256xf32>
    %105 = arith.addf %100, %104 : vector<8x256xf32>
    %c7_56 = arith.constant 7 : index
    %c0_57 = arith.constant 0 : index
    %106 = vector.load %arg11[%c7_56, %c0_57] : memref<24x512xf32, #tpu.memory_space<vmem>>, vector<8x512xf32>
    %107 = vector.extract_strided_slice %106 {offsets = [0, 128], sizes = [8, 256], strides = [1, 1]} : vector<8x512xf32> to vector<8x256xf32>
    %c17 = arith.constant 17 : index
    %c0_58 = arith.constant 0 : index
    %108 = vector.load %arg4[%c17, %c0_58] : memref<49x256xf32, #tpu.memory_space<vmem>>, vector<1x256xf32>
    %109 = vector.broadcast %108 : vector<1x256xf32> to vector<8x256xf32>
    %110 = arith.mulf %107, %109 : vector<8x256xf32>
    %c32_i32_59 = arith.constant 32 : i32
    %111 = tpu.dynamic_rotate %106 by %c32_i32_59 dim 1 : vector<8x512xf32>, i32 -> vector<8x512xf32>
    %c480_i32_60 = arith.constant 480 : i32
    %112 = tpu.dynamic_rotate %106 by %c480_i32_60 dim 1 : vector<8x512xf32>, i32 -> vector<8x512xf32>
    %113 = vector.extract_strided_slice %111 {offsets = [0, 128], sizes = [8, 256], strides = [1, 1]} : vector<8x512xf32> to vector<8x256xf32>
    %c16_61 = arith.constant 16 : index
    %c0_62 = arith.constant 0 : index
    %114 = vector.load %arg4[%c16_61, %c0_62] : memref<49x256xf32, #tpu.memory_space<vmem>>, vector<1x256xf32>
    %115 = vector.broadcast %114 : vector<1x256xf32> to vector<8x256xf32>
    %116 = arith.mulf %113, %115 : vector<8x256xf32>
    %117 = arith.addf %110, %116 : vector<8x256xf32>
    %118 = vector.extract_strided_slice %112 {offsets = [0, 128], sizes = [8, 256], strides = [1, 1]} : vector<8x512xf32> to vector<8x256xf32>
    %c18 = arith.constant 18 : index
    %c0_63 = arith.constant 0 : index
    %119 = vector.load %arg4[%c18, %c0_63] : memref<49x256xf32, #tpu.memory_space<vmem>>, vector<1x256xf32>
    %120 = vector.broadcast %119 : vector<1x256xf32> to vector<8x256xf32>
    %121 = arith.mulf %118, %120 : vector<8x256xf32>
    %122 = arith.addf %117, %121 : vector<8x256xf32>
    %c32_i32_64 = arith.constant 32 : i32
    %123 = tpu.dynamic_rotate %111 by %c32_i32_64 dim 1 : vector<8x512xf32>, i32 -> vector<8x512xf32>
    %c480_i32_65 = arith.constant 480 : i32
    %124 = tpu.dynamic_rotate %112 by %c480_i32_65 dim 1 : vector<8x512xf32>, i32 -> vector<8x512xf32>
    %125 = vector.extract_strided_slice %123 {offsets = [0, 128], sizes = [8, 256], strides = [1, 1]} : vector<8x512xf32> to vector<8x256xf32>
    %c15 = arith.constant 15 : index
    %c0_66 = arith.constant 0 : index
    %126 = vector.load %arg4[%c15, %c0_66] : memref<49x256xf32, #tpu.memory_space<vmem>>, vector<1x256xf32>
    %127 = vector.broadcast %126 : vector<1x256xf32> to vector<8x256xf32>
    %128 = arith.mulf %125, %127 : vector<8x256xf32>
    %129 = arith.addf %122, %128 : vector<8x256xf32>
    %130 = vector.extract_strided_slice %124 {offsets = [0, 128], sizes = [8, 256], strides = [1, 1]} : vector<8x512xf32> to vector<8x256xf32>
    %c19 = arith.constant 19 : index
    %c0_67 = arith.constant 0 : index
    %131 = vector.load %arg4[%c19, %c0_67] : memref<49x256xf32, #tpu.memory_space<vmem>>, vector<1x256xf32>
    %132 = vector.broadcast %131 : vector<1x256xf32> to vector<8x256xf32>
    %133 = arith.mulf %130, %132 : vector<8x256xf32>
    %134 = arith.addf %129, %133 : vector<8x256xf32>
    %c32_i32_68 = arith.constant 32 : i32
    %135 = tpu.dynamic_rotate %123 by %c32_i32_68 dim 1 : vector<8x512xf32>, i32 -> vector<8x512xf32>
    %c480_i32_69 = arith.constant 480 : i32
    %136 = tpu.dynamic_rotate %124 by %c480_i32_69 dim 1 : vector<8x512xf32>, i32 -> vector<8x512xf32>
    %137 = vector.extract_strided_slice %135 {offsets = [0, 128], sizes = [8, 256], strides = [1, 1]} : vector<8x512xf32> to vector<8x256xf32>
    %c14 = arith.constant 14 : index
    %c0_70 = arith.constant 0 : index
    %138 = vector.load %arg4[%c14, %c0_70] : memref<49x256xf32, #tpu.memory_space<vmem>>, vector<1x256xf32>
    %139 = vector.broadcast %138 : vector<1x256xf32> to vector<8x256xf32>
    %140 = arith.mulf %137, %139 : vector<8x256xf32>
    %141 = arith.addf %134, %140 : vector<8x256xf32>
    %142 = vector.extract_strided_slice %136 {offsets = [0, 128], sizes = [8, 256], strides = [1, 1]} : vector<8x512xf32> to vector<8x256xf32>
    %c20 = arith.constant 20 : index
    %c0_71 = arith.constant 0 : index
    %143 = vector.load %arg4[%c20, %c0_71] : memref<49x256xf32, #tpu.memory_space<vmem>>, vector<1x256xf32>
    %144 = vector.broadcast %143 : vector<1x256xf32> to vector<8x256xf32>
    %145 = arith.mulf %142, %144 : vector<8x256xf32>
    %146 = arith.addf %141, %145 : vector<8x256xf32>
    %c8_72 = arith.constant 8 : index
    %c0_73 = arith.constant 0 : index
    %147 = vector.load %arg11[%c8_72, %c0_73] : memref<24x512xf32, #tpu.memory_space<vmem>>, vector<8x512xf32>
    %148 = vector.extract_strided_slice %147 {offsets = [0, 128], sizes = [8, 256], strides = [1, 1]} : vector<8x512xf32> to vector<8x256xf32>
    %c24 = arith.constant 24 : index
    %c0_74 = arith.constant 0 : index
    %149 = vector.load %arg4[%c24, %c0_74] : memref<49x256xf32, #tpu.memory_space<vmem>>, vector<1x256xf32>
    %150 = vector.broadcast %149 : vector<1x256xf32> to vector<8x256xf32>
    %151 = arith.mulf %148, %150 : vector<8x256xf32>
    %c32_i32_75 = arith.constant 32 : i32
    %152 = tpu.dynamic_rotate %147 by %c32_i32_75 dim 1 : vector<8x512xf32>, i32 -> vector<8x512xf32>
    %c480_i32_76 = arith.constant 480 : i32
    %153 = tpu.dynamic_rotate %147 by %c480_i32_76 dim 1 : vector<8x512xf32>, i32 -> vector<8x512xf32>
    %154 = vector.extract_strided_slice %152 {offsets = [0, 128], sizes = [8, 256], strides = [1, 1]} : vector<8x512xf32> to vector<8x256xf32>
    %c23 = arith.constant 23 : index
    %c0_77 = arith.constant 0 : index
    %155 = vector.load %arg4[%c23, %c0_77] : memref<49x256xf32, #tpu.memory_space<vmem>>, vector<1x256xf32>
    %156 = vector.broadcast %155 : vector<1x256xf32> to vector<8x256xf32>
    %157 = arith.mulf %154, %156 : vector<8x256xf32>
    %158 = arith.addf %151, %157 : vector<8x256xf32>
    %159 = vector.extract_strided_slice %153 {offsets = [0, 128], sizes = [8, 256], strides = [1, 1]} : vector<8x512xf32> to vector<8x256xf32>
    %c25 = arith.constant 25 : index
    %c0_78 = arith.constant 0 : index
    %160 = vector.load %arg4[%c25, %c0_78] : memref<49x256xf32, #tpu.memory_space<vmem>>, vector<1x256xf32>
    %161 = vector.broadcast %160 : vector<1x256xf32> to vector<8x256xf32>
    %162 = arith.mulf %159, %161 : vector<8x256xf32>
    %163 = arith.addf %158, %162 : vector<8x256xf32>
    %c32_i32_79 = arith.constant 32 : i32
    %164 = tpu.dynamic_rotate %152 by %c32_i32_79 dim 1 : vector<8x512xf32>, i32 -> vector<8x512xf32>
    %c480_i32_80 = arith.constant 480 : i32
    %165 = tpu.dynamic_rotate %153 by %c480_i32_80 dim 1 : vector<8x512xf32>, i32 -> vector<8x512xf32>
    %166 = vector.extract_strided_slice %164 {offsets = [0, 128], sizes = [8, 256], strides = [1, 1]} : vector<8x512xf32> to vector<8x256xf32>
    %c22 = arith.constant 22 : index
    %c0_81 = arith.constant 0 : index
    %167 = vector.load %arg4[%c22, %c0_81] : memref<49x256xf32, #tpu.memory_space<vmem>>, vector<1x256xf32>
    %168 = vector.broadcast %167 : vector<1x256xf32> to vector<8x256xf32>
    %169 = arith.mulf %166, %168 : vector<8x256xf32>
    %170 = arith.addf %163, %169 : vector<8x256xf32>
    %171 = vector.extract_strided_slice %165 {offsets = [0, 128], sizes = [8, 256], strides = [1, 1]} : vector<8x512xf32> to vector<8x256xf32>
    %c26 = arith.constant 26 : index
    %c0_82 = arith.constant 0 : index
    %172 = vector.load %arg4[%c26, %c0_82] : memref<49x256xf32, #tpu.memory_space<vmem>>, vector<1x256xf32>
    %173 = vector.broadcast %172 : vector<1x256xf32> to vector<8x256xf32>
    %174 = arith.mulf %171, %173 : vector<8x256xf32>
    %175 = arith.addf %170, %174 : vector<8x256xf32>
    %c32_i32_83 = arith.constant 32 : i32
    %176 = tpu.dynamic_rotate %164 by %c32_i32_83 dim 1 : vector<8x512xf32>, i32 -> vector<8x512xf32>
    %c480_i32_84 = arith.constant 480 : i32
    %177 = tpu.dynamic_rotate %165 by %c480_i32_84 dim 1 : vector<8x512xf32>, i32 -> vector<8x512xf32>
    %178 = vector.extract_strided_slice %176 {offsets = [0, 128], sizes = [8, 256], strides = [1, 1]} : vector<8x512xf32> to vector<8x256xf32>
    %c21 = arith.constant 21 : index
    %c0_85 = arith.constant 0 : index
    %179 = vector.load %arg4[%c21, %c0_85] : memref<49x256xf32, #tpu.memory_space<vmem>>, vector<1x256xf32>
    %180 = vector.broadcast %179 : vector<1x256xf32> to vector<8x256xf32>
    %181 = arith.mulf %178, %180 : vector<8x256xf32>
    %182 = arith.addf %175, %181 : vector<8x256xf32>
    %183 = vector.extract_strided_slice %177 {offsets = [0, 128], sizes = [8, 256], strides = [1, 1]} : vector<8x512xf32> to vector<8x256xf32>
    %c27 = arith.constant 27 : index
    %c0_86 = arith.constant 0 : index
    %184 = vector.load %arg4[%c27, %c0_86] : memref<49x256xf32, #tpu.memory_space<vmem>>, vector<1x256xf32>
    %185 = vector.broadcast %184 : vector<1x256xf32> to vector<8x256xf32>
    %186 = arith.mulf %183, %185 : vector<8x256xf32>
    %187 = arith.addf %182, %186 : vector<8x256xf32>
    %c9_87 = arith.constant 9 : index
    %c0_88 = arith.constant 0 : index
    %188 = vector.load %arg11[%c9_87, %c0_88] : memref<24x512xf32, #tpu.memory_space<vmem>>, vector<8x512xf32>
    %189 = vector.extract_strided_slice %188 {offsets = [0, 128], sizes = [8, 256], strides = [1, 1]} : vector<8x512xf32> to vector<8x256xf32>
    %c31 = arith.constant 31 : index
    %c0_89 = arith.constant 0 : index
    %190 = vector.load %arg4[%c31, %c0_89] : memref<49x256xf32, #tpu.memory_space<vmem>>, vector<1x256xf32>
    %191 = vector.broadcast %190 : vector<1x256xf32> to vector<8x256xf32>
    %192 = arith.mulf %189, %191 : vector<8x256xf32>
    %c32_i32_90 = arith.constant 32 : i32
    %193 = tpu.dynamic_rotate %188 by %c32_i32_90 dim 1 : vector<8x512xf32>, i32 -> vector<8x512xf32>
    %c480_i32_91 = arith.constant 480 : i32
    %194 = tpu.dynamic_rotate %188 by %c480_i32_91 dim 1 : vector<8x512xf32>, i32 -> vector<8x512xf32>
    %195 = vector.extract_strided_slice %193 {offsets = [0, 128], sizes = [8, 256], strides = [1, 1]} : vector<8x512xf32> to vector<8x256xf32>
    %c30 = arith.constant 30 : index
    %c0_92 = arith.constant 0 : index
    %196 = vector.load %arg4[%c30, %c0_92] : memref<49x256xf32, #tpu.memory_space<vmem>>, vector<1x256xf32>
    %197 = vector.broadcast %196 : vector<1x256xf32> to vector<8x256xf32>
    %198 = arith.mulf %195, %197 : vector<8x256xf32>
    %199 = arith.addf %192, %198 : vector<8x256xf32>
    %200 = vector.extract_strided_slice %194 {offsets = [0, 128], sizes = [8, 256], strides = [1, 1]} : vector<8x512xf32> to vector<8x256xf32>
    %c32 = arith.constant 32 : index
    %c0_93 = arith.constant 0 : index
    %201 = vector.load %arg4[%c32, %c0_93] : memref<49x256xf32, #tpu.memory_space<vmem>>, vector<1x256xf32>
    %202 = vector.broadcast %201 : vector<1x256xf32> to vector<8x256xf32>
    %203 = arith.mulf %200, %202 : vector<8x256xf32>
    %204 = arith.addf %199, %203 : vector<8x256xf32>
    %c32_i32_94 = arith.constant 32 : i32
    %205 = tpu.dynamic_rotate %193 by %c32_i32_94 dim 1 : vector<8x512xf32>, i32 -> vector<8x512xf32>
    %c480_i32_95 = arith.constant 480 : i32
    %206 = tpu.dynamic_rotate %194 by %c480_i32_95 dim 1 : vector<8x512xf32>, i32 -> vector<8x512xf32>
    %207 = vector.extract_strided_slice %205 {offsets = [0, 128], sizes = [8, 256], strides = [1, 1]} : vector<8x512xf32> to vector<8x256xf32>
    %c29 = arith.constant 29 : index
    %c0_96 = arith.constant 0 : index
    %208 = vector.load %arg4[%c29, %c0_96] : memref<49x256xf32, #tpu.memory_space<vmem>>, vector<1x256xf32>
    %209 = vector.broadcast %208 : vector<1x256xf32> to vector<8x256xf32>
    %210 = arith.mulf %207, %209 : vector<8x256xf32>
    %211 = arith.addf %204, %210 : vector<8x256xf32>
    %212 = vector.extract_strided_slice %206 {offsets = [0, 128], sizes = [8, 256], strides = [1, 1]} : vector<8x512xf32> to vector<8x256xf32>
    %c33 = arith.constant 33 : index
    %c0_97 = arith.constant 0 : index
    %213 = vector.load %arg4[%c33, %c0_97] : memref<49x256xf32, #tpu.memory_space<vmem>>, vector<1x256xf32>
    %214 = vector.broadcast %213 : vector<1x256xf32> to vector<8x256xf32>
    %215 = arith.mulf %212, %214 : vector<8x256xf32>
    %216 = arith.addf %211, %215 : vector<8x256xf32>
    %c32_i32_98 = arith.constant 32 : i32
    %217 = tpu.dynamic_rotate %205 by %c32_i32_98 dim 1 : vector<8x512xf32>, i32 -> vector<8x512xf32>
    %c480_i32_99 = arith.constant 480 : i32
    %218 = tpu.dynamic_rotate %206 by %c480_i32_99 dim 1 : vector<8x512xf32>, i32 -> vector<8x512xf32>
    %219 = vector.extract_strided_slice %217 {offsets = [0, 128], sizes = [8, 256], strides = [1, 1]} : vector<8x512xf32> to vector<8x256xf32>
    %c28 = arith.constant 28 : index
    %c0_100 = arith.constant 0 : index
    %220 = vector.load %arg4[%c28, %c0_100] : memref<49x256xf32, #tpu.memory_space<vmem>>, vector<1x256xf32>
    %221 = vector.broadcast %220 : vector<1x256xf32> to vector<8x256xf32>
    %222 = arith.mulf %219, %221 : vector<8x256xf32>
    %223 = arith.addf %216, %222 : vector<8x256xf32>
    %224 = vector.extract_strided_slice %218 {offsets = [0, 128], sizes = [8, 256], strides = [1, 1]} : vector<8x512xf32> to vector<8x256xf32>
    %c34 = arith.constant 34 : index
    %c0_101 = arith.constant 0 : index
    %225 = vector.load %arg4[%c34, %c0_101] : memref<49x256xf32, #tpu.memory_space<vmem>>, vector<1x256xf32>
    %226 = vector.broadcast %225 : vector<1x256xf32> to vector<8x256xf32>
    %227 = arith.mulf %224, %226 : vector<8x256xf32>
    %228 = arith.addf %223, %227 : vector<8x256xf32>
    %c10_102 = arith.constant 10 : index
    %c0_103 = arith.constant 0 : index
    %229 = vector.load %arg11[%c10_102, %c0_103] : memref<24x512xf32, #tpu.memory_space<vmem>>, vector<8x512xf32>
    %230 = vector.extract_strided_slice %229 {offsets = [0, 128], sizes = [8, 256], strides = [1, 1]} : vector<8x512xf32> to vector<8x256xf32>
    %c38 = arith.constant 38 : index
    %c0_104 = arith.constant 0 : index
    %231 = vector.load %arg4[%c38, %c0_104] : memref<49x256xf32, #tpu.memory_space<vmem>>, vector<1x256xf32>
    %232 = vector.broadcast %231 : vector<1x256xf32> to vector<8x256xf32>
    %233 = arith.mulf %230, %232 : vector<8x256xf32>
    %c32_i32_105 = arith.constant 32 : i32
    %234 = tpu.dynamic_rotate %229 by %c32_i32_105 dim 1 : vector<8x512xf32>, i32 -> vector<8x512xf32>
    %c480_i32_106 = arith.constant 480 : i32
    %235 = tpu.dynamic_rotate %229 by %c480_i32_106 dim 1 : vector<8x512xf32>, i32 -> vector<8x512xf32>
    %236 = vector.extract_strided_slice %234 {offsets = [0, 128], sizes = [8, 256], strides = [1, 1]} : vector<8x512xf32> to vector<8x256xf32>
    %c37 = arith.constant 37 : index
    %c0_107 = arith.constant 0 : index
    %237 = vector.load %arg4[%c37, %c0_107] : memref<49x256xf32, #tpu.memory_space<vmem>>, vector<1x256xf32>
    %238 = vector.broadcast %237 : vector<1x256xf32> to vector<8x256xf32>
    %239 = arith.mulf %236, %238 : vector<8x256xf32>
    %240 = arith.addf %233, %239 : vector<8x256xf32>
    %241 = vector.extract_strided_slice %235 {offsets = [0, 128], sizes = [8, 256], strides = [1, 1]} : vector<8x512xf32> to vector<8x256xf32>
    %c39 = arith.constant 39 : index
    %c0_108 = arith.constant 0 : index
    %242 = vector.load %arg4[%c39, %c0_108] : memref<49x256xf32, #tpu.memory_space<vmem>>, vector<1x256xf32>
    %243 = vector.broadcast %242 : vector<1x256xf32> to vector<8x256xf32>
    %244 = arith.mulf %241, %243 : vector<8x256xf32>
    %245 = arith.addf %240, %244 : vector<8x256xf32>
    %c32_i32_109 = arith.constant 32 : i32
    %246 = tpu.dynamic_rotate %234 by %c32_i32_109 dim 1 : vector<8x512xf32>, i32 -> vector<8x512xf32>
    %c480_i32_110 = arith.constant 480 : i32
    %247 = tpu.dynamic_rotate %235 by %c480_i32_110 dim 1 : vector<8x512xf32>, i32 -> vector<8x512xf32>
    %248 = vector.extract_strided_slice %246 {offsets = [0, 128], sizes = [8, 256], strides = [1, 1]} : vector<8x512xf32> to vector<8x256xf32>
    %c36 = arith.constant 36 : index
    %c0_111 = arith.constant 0 : index
    %249 = vector.load %arg4[%c36, %c0_111] : memref<49x256xf32, #tpu.memory_space<vmem>>, vector<1x256xf32>
    %250 = vector.broadcast %249 : vector<1x256xf32> to vector<8x256xf32>
    %251 = arith.mulf %248, %250 : vector<8x256xf32>
    %252 = arith.addf %245, %251 : vector<8x256xf32>
    %253 = vector.extract_strided_slice %247 {offsets = [0, 128], sizes = [8, 256], strides = [1, 1]} : vector<8x512xf32> to vector<8x256xf32>
    %c40 = arith.constant 40 : index
    %c0_112 = arith.constant 0 : index
    %254 = vector.load %arg4[%c40, %c0_112] : memref<49x256xf32, #tpu.memory_space<vmem>>, vector<1x256xf32>
    %255 = vector.broadcast %254 : vector<1x256xf32> to vector<8x256xf32>
    %256 = arith.mulf %253, %255 : vector<8x256xf32>
    %257 = arith.addf %252, %256 : vector<8x256xf32>
    %c32_i32_113 = arith.constant 32 : i32
    %258 = tpu.dynamic_rotate %246 by %c32_i32_113 dim 1 : vector<8x512xf32>, i32 -> vector<8x512xf32>
    %c480_i32_114 = arith.constant 480 : i32
    %259 = tpu.dynamic_rotate %247 by %c480_i32_114 dim 1 : vector<8x512xf32>, i32 -> vector<8x512xf32>
    %260 = vector.extract_strided_slice %258 {offsets = [0, 128], sizes = [8, 256], strides = [1, 1]} : vector<8x512xf32> to vector<8x256xf32>
    %c35 = arith.constant 35 : index
    %c0_115 = arith.constant 0 : index
    %261 = vector.load %arg4[%c35, %c0_115] : memref<49x256xf32, #tpu.memory_space<vmem>>, vector<1x256xf32>
    %262 = vector.broadcast %261 : vector<1x256xf32> to vector<8x256xf32>
    %263 = arith.mulf %260, %262 : vector<8x256xf32>
    %264 = arith.addf %257, %263 : vector<8x256xf32>
    %265 = vector.extract_strided_slice %259 {offsets = [0, 128], sizes = [8, 256], strides = [1, 1]} : vector<8x512xf32> to vector<8x256xf32>
    %c41 = arith.constant 41 : index
    %c0_116 = arith.constant 0 : index
    %266 = vector.load %arg4[%c41, %c0_116] : memref<49x256xf32, #tpu.memory_space<vmem>>, vector<1x256xf32>
    %267 = vector.broadcast %266 : vector<1x256xf32> to vector<8x256xf32>
    %268 = arith.mulf %265, %267 : vector<8x256xf32>
    %269 = arith.addf %264, %268 : vector<8x256xf32>
    %c11_117 = arith.constant 11 : index
    %c0_118 = arith.constant 0 : index
    %270 = vector.load %arg11[%c11_117, %c0_118] : memref<24x512xf32, #tpu.memory_space<vmem>>, vector<8x512xf32>
    %271 = vector.extract_strided_slice %270 {offsets = [0, 128], sizes = [8, 256], strides = [1, 1]} : vector<8x512xf32> to vector<8x256xf32>
    %c45 = arith.constant 45 : index
    %c0_119 = arith.constant 0 : index
    %272 = vector.load %arg4[%c45, %c0_119] : memref<49x256xf32, #tpu.memory_space<vmem>>, vector<1x256xf32>
    %273 = vector.broadcast %272 : vector<1x256xf32> to vector<8x256xf32>
    %274 = arith.mulf %271, %273 : vector<8x256xf32>
    %c32_i32_120 = arith.constant 32 : i32
    %275 = tpu.dynamic_rotate %270 by %c32_i32_120 dim 1 : vector<8x512xf32>, i32 -> vector<8x512xf32>
    %c480_i32_121 = arith.constant 480 : i32
    %276 = tpu.dynamic_rotate %270 by %c480_i32_121 dim 1 : vector<8x512xf32>, i32 -> vector<8x512xf32>
    %277 = vector.extract_strided_slice %275 {offsets = [0, 128], sizes = [8, 256], strides = [1, 1]} : vector<8x512xf32> to vector<8x256xf32>
    %c44 = arith.constant 44 : index
    %c0_122 = arith.constant 0 : index
    %278 = vector.load %arg4[%c44, %c0_122] : memref<49x256xf32, #tpu.memory_space<vmem>>, vector<1x256xf32>
    %279 = vector.broadcast %278 : vector<1x256xf32> to vector<8x256xf32>
    %280 = arith.mulf %277, %279 : vector<8x256xf32>
    %281 = arith.addf %274, %280 : vector<8x256xf32>
    %282 = vector.extract_strided_slice %276 {offsets = [0, 128], sizes = [8, 256], strides = [1, 1]} : vector<8x512xf32> to vector<8x256xf32>
    %c46 = arith.constant 46 : index
    %c0_123 = arith.constant 0 : index
    %283 = vector.load %arg4[%c46, %c0_123] : memref<49x256xf32, #tpu.memory_space<vmem>>, vector<1x256xf32>
    %284 = vector.broadcast %283 : vector<1x256xf32> to vector<8x256xf32>
    %285 = arith.mulf %282, %284 : vector<8x256xf32>
    %286 = arith.addf %281, %285 : vector<8x256xf32>
    %c32_i32_124 = arith.constant 32 : i32
    %287 = tpu.dynamic_rotate %275 by %c32_i32_124 dim 1 : vector<8x512xf32>, i32 -> vector<8x512xf32>
    %c480_i32_125 = arith.constant 480 : i32
    %288 = tpu.dynamic_rotate %276 by %c480_i32_125 dim 1 : vector<8x512xf32>, i32 -> vector<8x512xf32>
    %289 = vector.extract_strided_slice %287 {offsets = [0, 128], sizes = [8, 256], strides = [1, 1]} : vector<8x512xf32> to vector<8x256xf32>
    %c43 = arith.constant 43 : index
    %c0_126 = arith.constant 0 : index
    %290 = vector.load %arg4[%c43, %c0_126] : memref<49x256xf32, #tpu.memory_space<vmem>>, vector<1x256xf32>
    %291 = vector.broadcast %290 : vector<1x256xf32> to vector<8x256xf32>
    %292 = arith.mulf %289, %291 : vector<8x256xf32>
    %293 = arith.addf %286, %292 : vector<8x256xf32>
    %294 = vector.extract_strided_slice %288 {offsets = [0, 128], sizes = [8, 256], strides = [1, 1]} : vector<8x512xf32> to vector<8x256xf32>
    %c47 = arith.constant 47 : index
    %c0_127 = arith.constant 0 : index
    %295 = vector.load %arg4[%c47, %c0_127] : memref<49x256xf32, #tpu.memory_space<vmem>>, vector<1x256xf32>
    %296 = vector.broadcast %295 : vector<1x256xf32> to vector<8x256xf32>
    %297 = arith.mulf %294, %296 : vector<8x256xf32>
    %298 = arith.addf %293, %297 : vector<8x256xf32>
    %c32_i32_128 = arith.constant 32 : i32
    %299 = tpu.dynamic_rotate %287 by %c32_i32_128 dim 1 : vector<8x512xf32>, i32 -> vector<8x512xf32>
    %c480_i32_129 = arith.constant 480 : i32
    %300 = tpu.dynamic_rotate %288 by %c480_i32_129 dim 1 : vector<8x512xf32>, i32 -> vector<8x512xf32>
    %301 = vector.extract_strided_slice %299 {offsets = [0, 128], sizes = [8, 256], strides = [1, 1]} : vector<8x512xf32> to vector<8x256xf32>
    %c42 = arith.constant 42 : index
    %c0_130 = arith.constant 0 : index
    %302 = vector.load %arg4[%c42, %c0_130] : memref<49x256xf32, #tpu.memory_space<vmem>>, vector<1x256xf32>
    %303 = vector.broadcast %302 : vector<1x256xf32> to vector<8x256xf32>
    %304 = arith.mulf %301, %303 : vector<8x256xf32>
    %305 = arith.addf %298, %304 : vector<8x256xf32>
    %306 = vector.extract_strided_slice %300 {offsets = [0, 128], sizes = [8, 256], strides = [1, 1]} : vector<8x512xf32> to vector<8x256xf32>
    %c48 = arith.constant 48 : index
    %c0_131 = arith.constant 0 : index
    %307 = vector.load %arg4[%c48, %c0_131] : memref<49x256xf32, #tpu.memory_space<vmem>>, vector<1x256xf32>
    %308 = vector.broadcast %307 : vector<1x256xf32> to vector<8x256xf32>
    %309 = arith.mulf %306, %308 : vector<8x256xf32>
    %310 = arith.addf %305, %309 : vector<8x256xf32>
    %311 = arith.addf %64, %105 : vector<8x256xf32>
    %312 = arith.addf %146, %187 : vector<8x256xf32>
    %313 = arith.addf %228, %269 : vector<8x256xf32>
    %314 = arith.addf %311, %312 : vector<8x256xf32>
    %315 = arith.addf %313, %310 : vector<8x256xf32>
    %316 = arith.addf %314, %315 : vector<8x256xf32>
    %317 = vector.broadcast %22 : vector<1x256xf32> to vector<8x256xf32>
    %318 = arith.addf %316, %317 : vector<8x256xf32>
    %319 = arith.addf %318, %13 : vector<8x256xf32>
    %cst_132 = arith.constant 5.000000e-01 : f32
    %320 = vector.broadcast %cst_132 : f32 to vector<8x256xf32>
    %321 = arith.mulf %320, %319 : vector<8x256xf32>
    %322 = arith.mulf %319, %319 : vector<8x256xf32>
    %323 = arith.mulf %322, %319 : vector<8x256xf32>
    %cst_133 = arith.constant 4.471500e-02 : f32
    %324 = vector.broadcast %cst_133 : f32 to vector<8x256xf32>
    %325 = arith.mulf %324, %323 : vector<8x256xf32>
    %326 = arith.addf %319, %325 : vector<8x256xf32>
    %cst_134 = arith.constant 0.797884583 : f32
    %327 = vector.broadcast %cst_134 : f32 to vector<8x256xf32>
    %328 = arith.mulf %327, %326 : vector<8x256xf32>
    %329 = math.tanh %328 : vector<8x256xf32>
    %cst_135 = arith.constant 1.000000e+00 : f32
    %330 = vector.broadcast %cst_135 : f32 to vector<8x256xf32>
    %331 = arith.addf %330, %329 : vector<8x256xf32>
    %332 = arith.mulf %321, %331 : vector<8x256xf32>
    %c0_136 = arith.constant 0 : index
    %c0_137 = arith.constant 0 : index
    %333 = vector.load %arg6[%c0_136, %c0_137] : memref<256x128xf32, #tpu.memory_space<vmem>>, vector<256x128xf32>
    %cst_138 = arith.constant dense<0.000000e+00> : vector<8x128xf32>
    %334 = tpu.matmul %332, %333, %cst_138 {dimension_numbers = #tpu.dot_dimension_numbers<[1], [0], [0], [1], [0, 0, 1, 1], [], []>} : vector<8x256xf32>, vector<256x128xf32>, vector<8x128xf32> -> vector<8x128xf32>
    %c0_139 = arith.constant 0 : index
    %c0_140 = arith.constant 0 : index
    %335 = vector.load %arg7[%c0_139, %c0_140] : memref<1x128xf32, #tpu.memory_space<vmem>>, vector<1x128xf32>
    %336 = vector.broadcast %335 : vector<1x128xf32> to vector<8x128xf32>
    %337 = arith.addf %334, %336 : vector<8x128xf32>
    %338 = vector.shape_cast %8 : vector<8x128xf32> to vector<1x8x128xf32>
    %c0_141 = arith.constant 0 : index
    %c0_142 = arith.constant 0 : index
    %c0_143 = arith.constant 0 : index
    %339 = vector.load %arg10[%c0_141, %c0_142, %c0_143] : memref<1x16x128xf32, #tpu.memory_space<vmem>>, vector<1x8x128xf32>
    tpu.vector_store %arg10[%c0_141, %c0_142, %c0_143], %338 {strides = array<i32>} : memref<1x16x128xf32, #tpu.memory_space<vmem>>, vector<1x8x128xf32>,
    %340 = vector.shape_cast %337 : vector<8x128xf32> to vector<1x8x128xf32>
    %c0_144 = arith.constant 0 : index
    %c8_145 = arith.constant 8 : index
    %c0_146 = arith.constant 0 : index
    %341 = vector.load %arg10[%c0_144, %c8_145, %c0_146] : memref<1x16x128xf32, #tpu.memory_space<vmem>>, vector<1x8x128xf32>
    tpu.vector_store %arg10[%c0_144, %c8_145, %c0_146], %340 {strides = array<i32>} : memref<1x16x128xf32, #tpu.memory_space<vmem>>, vector<1x8x128xf32>,
    return
  }
  func.func @transform_0(%arg0: i32) -> (i32, i32, i32) {
    %c0_i32 = arith.constant 0 : i32
    %c0_i32_0 = arith.constant 0 : i32
    %c0_i32_1 = arith.constant 0 : i32
    return %arg0, %c0_i32, %c0_i32_0 : i32, i32, i32
  }
  func.func @transform_1(%arg0: i32) -> (i32, i32) {
    %c0_i32 = arith.constant 0 : i32
    %c0_i32_0 = arith.constant 0 : i32
    %c0_i32_1 = arith.constant 0 : i32
    return %c0_i32, %c0_i32_0 : i32, i32
  }
  func.func @transform_2(%arg0: i32) -> (i32, i32) {
    %c0_i32 = arith.constant 0 : i32
    %c0_i32_0 = arith.constant 0 : i32
    %c0_i32_1 = arith.constant 0 : i32
    return %c0_i32, %c0_i32_0 : i32, i32
  }
  func.func @transform_3(%arg0: i32) -> (i32, i32) {
    %c0_i32 = arith.constant 0 : i32
    %c0_i32_0 = arith.constant 0 : i32
    %c0_i32_1 = arith.constant 0 : i32
    return %c0_i32, %c0_i32_0 : i32, i32
  }
  func.func @transform_4(%arg0: i32) -> (i32, i32) {
    %c0_i32 = arith.constant 0 : i32
    %c0_i32_0 = arith.constant 0 : i32
    %c0_i32_1 = arith.constant 0 : i32
    return %c0_i32, %c0_i32_0 : i32, i32
  }
  func.func @transform_5(%arg0: i32) -> (i32, i32) {
    %c0_i32 = arith.constant 0 : i32
    %c0_i32_0 = arith.constant 0 : i32
    %c0_i32_1 = arith.constant 0 : i32
    return %c0_i32, %c0_i32_0 : i32, i32
  }
  func.func @transform_6(%arg0: i32) -> (i32, i32) {
    %c0_i32 = arith.constant 0 : i32
    %c0_i32_0 = arith.constant 0 : i32
    %c0_i32_1 = arith.constant 0 : i32
    return %c0_i32, %c0_i32_0 : i32, i32
  }
  func.func @transform_7(%arg0: i32) -> (i32, i32) {
    %c0_i32 = arith.constant 0 : i32
    %c0_i32_0 = arith.constant 0 : i32
    %c0_i32_1 = arith.constant 0 : i32
    return %c0_i32, %c0_i32_0 : i32, i32
  }
  func.func @transform_8(%arg0: i32) -> (i32, i32) {
    %c0_i32 = arith.constant 0 : i32
    %c0_i32_0 = arith.constant 0 : i32
    %c0_i32_1 = arith.constant 0 : i32
    return %c0_i32, %c0_i32_0 : i32, i32
  }
  func.func @transform_9(%arg0: i32) -> (i32, i32, i32) {
    %c0_i32 = arith.constant 0 : i32
    %c0_i32_0 = arith.constant 0 : i32
    %c0_i32_1 = arith.constant 0 : i32
    return %arg0, %c0_i32, %c0_i32_0 : i32, i32, i32
  }
}

</mosaic_0001>

<bundles_post_ra>
// kernel: tpu_custom_call.1
= control target key start
LH: loop header
LB: loop body
LE: loop exit
PB: predicated region body
PF: predicated region fallthrough
CT: control target
= control target key end

     0   :  { %s5049_s0 = inlined_call_operand.hbm [shape: f32[2,16,128], index: 0, kind: input, shape index: {}]   ;;  %s5050_s1 = inlined_call_operand.hbm [shape: f32[128,256], index: 1, kind: input, shape index: {}]   ;;  %s5051_s2 = inlined_call_operand.vmem [shape: f32[1,256], index: 2, kind: input, shape index: {}]   ;;  %s5052_s3 = inlined_call_operand.hbm [shape: f32[49,256], index: 3, kind: input, shape index: {}]   ;;  %s5053_s4 = inlined_call_operand.vmem [shape: f32[1,256], index: 4, kind: input, shape index: {}]   ;;  %s5054_s5 = inlined_call_operand.hbm [shape: f32[256,128], index: 5, kind: input, shape index: {}]   ;;  %s5055_s6 = inlined_call_operand.vmem [shape: f32[1,128], index: 6, kind: input, shape index: {}]   ;;  %s5056_s7 = inlined_call_operand.hbm [shape: f32[128,128], index: 7, kind: input, shape index: {}]   ;;  %s5057_s8 = inlined_call_operand.vmem [shape: f32[1,128], index: 8, kind: input, shape index: {}]   ;;  %s5058_s9 = inlined_call_operand.hbm [shape: f32[2,16,128], index: 9, kind: output, shape index: {}]  }
   0x1   :  { %5110 = sst [smem:[#allocation62_spill]] %s5050_s1 }
   0x2   :  { %5111 = sst [smem:[#allocation63_spill]] %s5052_s3 }
   0x3   :  { %5112 = sst [smem:[#allocation64_spill]] %s5054_s5 }
   0x4   :  { %14 = vsyncpa [#allocation4], 0 }
   0x5   :  { %16 = vsyncpa [#allocation4 + $0x1], 0 }
   0x6   :  { %17 = vsyncpa [#allocation7], 0 }
   0x7   :  { %18 = vsyncpa [#allocation10], 0 }
   0x8   :  { %19 = vsyncpa [#allocation5], 0 }
   0x9   :  { %21 = vsyncpa [#allocation5 + $0x1], 0  ;;  %s3293_s30 = smov 0   ;;  %s3295_s10 = smov 0  }
   0xa   :  { %s3297_s11 = smov 0   ;;  %s3299_s12 = smov 0  }
   0xb LB: > { %s3314_s13 = sadd.s32 4294967295, %s3225_s12   ;;  %s2800_s14 = sadd.s32 4294967294, %s3225_s12   ;;  %s3225_s12 = sphi %s3299_s12, %s5245_s12   ;;  %s3221_s11 = sphi %s3297_s11, %s5244_s11   ;;  %s3217_s10 = sphi %s3295_s10, %s5243_s10   ;;  %s3213_s30 = sphi %s3293_s30, %s5242_s30  }
   0xc   : > { %p47_p0 = scmp.ne.s32.totalorder %s3217_s10, %s3213_s30  ;;  %p5059_p1 = scmp.eq.s32.totalorder %s3314_s13, 0 }
   0xd   : > { %p245_p3 = scmp.eq.s32.totalorder %s2800_s14, 1  ;;  %p2801_p5 = scmp.ge.s32.totalorder %s3225_s12, 1 }
   0xe   : > { %p3323_p4 = por %p5059_p1, %p47_p0  ;;  %p252_p7 = scmp.lt.s32.totalorder %s3225_s12, 3 }
   0xf   : > { %p3328_p6 = por %p245_p3, %p47_p0  ;;  %s3227_s18 = smov [#allocation6]  }
  0x10   : > { %s5113_s15 = scalar_select %p3323_p4, 1, 0 }
  0x11   : > { %s5114_s16 = scalar_select %p3328_p6, 1, 0 }
  0x12   : > { %p3333_p8 = pnand %p2801_p5, %p252_p7  ;;  %s264_s19 = sshll.u32 %s3227_s18, 4  ;;  %s265_s19 = int_to_ptr.vmem [resolvable:$true] %s264_s19 }
  0x13   : > { %s3228_s21 = smov [#allocation9]   ;;  %s3032_s23 = scalar_lea.vmem %s265_s19, 4096 }
  0x14   : > { %s5115_s17 = scalar_select %p3333_p8, 1, 0 }
  0x15   : > { %p2933_p9 = pneg %p3333_p8  ;;  %s296_s22 = sshll.u32 %s3228_s21, 4  ;;  %s297_s22 = int_to_ptr.vmem [resolvable:$true] %s296_s22 }
  0x16   : > { %p3033_p13 = scmp.ne.s32.totalorder %s265_s19, %s3032_s23  ;;  %p3040_p5 = scmp.lt.s32.totalorder %s265_s19, %s265_s19 }
  0x17   : > { %p3342_p11 = pnand %p2933_p9, %p5059_p1  ;;  %p3041_p7 = scmp.lt.s32.totalorder %s3032_s23, %s3032_s23 }
  0x19   : > { %p3023_p12 = pneg %p3342_p11  ;;  %p3042_p10 = por %p3041_p7, %p3040_p5 }
  0x1b   : > { %p3035_p0 = pnand %p3033_p13, %p3023_p12 }
  0x1d   : > { %p3036_p3 = pneg %p3035_p0 }
  0x1f   : > { %p3043_p9 = pnand %p3042_p10, %p3036_p3 }
  0x21   : > { %3046 = shalt.err (!%p3043_p9)
}
  0x22   : > { %s3229_s24 = smov 256   ;;  %s3230_s25 = smov 16  }
  0x23   : > { %s5117_s1 = sld [smem:[#allocation62_spill]]  ;;  %s3058_s28 = scalar_lea.vmem %s297_s22, 4096 }
  0x24   : > { %p3059_p13 = scmp.ne.s32.totalorder %s297_s22, %s3058_s28  ;;  %p3066_p10 = scmp.lt.s32.totalorder %s297_s22, %s297_s22 }
  0x25   : > { %p3067_p3 = scmp.lt.s32.totalorder %s3058_s28, %s3058_s28 }
  0x26   : > { %p3061_p0 = pnand %p3059_p13, %p3023_p12 }
  0x27   : > { %p3068_p7 = por %p3067_p3, %p3066_p10 }
  0x28   : > { %p3062_p5 = pneg %p3061_p0 }
  0x29   : > { %2936 = dma.hbm_to_vmem [thread:$0]  (!%p3342_p11), %s5117_s1, 4096, %s265_s19, [#allocation7], %s3229_s24, %s3229_s24, %s3230_s25  }
  0x2a   : > { %p3069_p9 = pnand %p3068_p7, %p3062_p5 }
  0x2c   : > { %3072 = shalt.err (!%p3069_p9)
}
  0x2d   : > { %s5060_s29 = smov 128   ;;  %s5061_s14 = smov 8  }
  0x2e   : > { %s5118_s5 = sld [smem:[#allocation64_spill]]  ;;  %s3233_s21 = smov [#allocation8]  }
  0x2f   : > { %s280_s23 = sshll.u32 %s3233_s21, 4  ;;  %s3234_s26 = smov [#allocation11]   ;;  %s281_s23 = int_to_ptr.vmem [resolvable:$true] %s280_s23 }
  0x30   : > { %s312_s27 = sshll.u32 %s3234_s26, 4  ;;  %s3084_s28 = scalar_lea.vmem %s281_s23, 1792  ;;  %s313_s27 = int_to_ptr.vmem [resolvable:$true] %s312_s27 }
  0x31   : > { %p3085_p13 = scmp.ne.s32.totalorder %s281_s23, %s3084_s28  ;;  %p3092_p10 = scmp.lt.s32.totalorder %s281_s23, %s281_s23 }
  0x32   : > { %p3093_p3 = scmp.lt.s32.totalorder %s3084_s28, %s3084_s28 }
  0x33   : > { %p3087_p0 = pnand %p3085_p13, %p3023_p12 }
  0x34   : > { %2942 = dma.hbm_to_vmem [thread:$0]  (!%p3342_p11), %s5118_s5, 4096, %s297_s22, [#allocation10], %s5060_s29, %s5060_s29, %s5061_s14  }
  0x35   : > { %p3088_p5 = pneg %p3087_p0  ;;  %p3094_p7 = por %p3093_p3, %p3092_p10 }
  0x37   : > { %p3095_p9 = pnand %p3094_p7, %p3088_p5 }
  0x39   : > { %3098 = shalt.err (!%p3095_p9)
}
  0x3a   : > { %s5119_s3 = sld [smem:[#allocation63_spill]]  ;;  %s3110_s19 = scalar_lea.vmem %s313_s27, 2048 }
  0x3b   : > { %p3111_p1 = scmp.ne.s32.totalorder %s313_s27, %s3110_s19  ;;  %p3118_p2 = scmp.lt.s32.totalorder %s313_s27, %s313_s27 }
  0x3c   : > { %p3119_p10 = scmp.lt.s32.totalorder %s3110_s19, %s3110_s19 }
  0x3d   : > { %p3113_p13 = pnand %p3111_p1, %p3023_p12 }
  0x3e   : > { %p3120_p5 = por %p3119_p10, %p3118_p2 }
  0x3f   : > { %p3114_p0 = pneg %p3113_p13 }
  0x40   : > { %2939 = dma.hbm_to_vmem [thread:$0]  (!%p3342_p11), %s5119_s3, 1792, %s281_s23, [#allocation7], %s3229_s24, %s3229_s24, %s3230_s25  }
  0x41   : > { %p3121_p3 = pnand %p3120_p5, %p3114_p0 }
  0x43   : > { %3124 = shalt.err (!%p3121_p3)
}
  0x44   : > { %2945 = dma.hbm_to_vmem [thread:$0]  (!%p3342_p11), %s5056_s7, 2048, %s313_s27, [#allocation10], %s5060_s29, %s5060_s29, %s5061_s14  }
  0x45   : > { %s3393_s24 = sadd.s32 1, %s3225_s12   ;;  %s34_s25 = sadd.s32 1, %s3221_s11 }
  0x46   : > { %s31_s20 = ssub.s32 %s3225_s12, %s3393_s24  ;;  %p41_p2 = scmp.ne.s32.totalorder %s3221_s11, %s3217_s10 }
  0x47   : > { %p32_p1 = scmp.eq.s32.totalorder %s31_s20, 0  ;;  %p42_p12 = scmp.eq.s32.totalorder %s3225_s12, 0 }
  0x48   : > { %p5120_p9 = scmp.eq.s32.totalorder %s3314_s13, 1  ;;  %p2958_p0 = scmp.lt.s32.totalorder %s3225_s12, 2 }
  0x49   : > { %s3402_s23 = scalar_select %p32_p1, %s3221_s11, %s34_s25  }
  0x4a   : > { %p43_p7 = por %p42_p12, %p41_p2  ;;  %p3406_p13 = por %p5120_p9, %p41_p2 }
  0x4b   : > { %s329_s22 = sand.u32 1, %s3221_s11   ;;  %s2824_s27 = sshll.u32 %s3225_s12, 8 }
  0x4c   : > { %s5121_s28 = scalar_select %p3406_p13, 1, 0 }
  0x4d   : > { %s2807_s18 = sshll.u32 %s329_s22, 4  ;;  %s3416_s26 = scalar_lea.hbm %s5049_s0, %s2824_s27 }
  0x4e   : > { %s333_s20 = scalar_lea.vmem [#allocation3], %s2807_s18  ;;  %p3420_p11 = pnand %p2958_p0, %p43_p7 }
  0x4f   : > { %s340_s25 = sshll.u32 %s333_s20, 4  ;;  %s3424_s14 = scalar_lea.sflag [#allocation4], %s329_s22  ;;  %s3418_s25 = int_to_ptr.vmem [resolvable:$true] %s340_s25 }
  0x50   : > { %s3125_s1 = scalar_lea.hbm %s3416_s26, 256  ;;  %p3127_p5 = pneg %p3420_p11 }
  0x51   : > { %p3126_p10 = scmp.ne.s32.totalorder %s3416_s26, %s3125_s1  ;;  %s3130_s18 = scalar_lea.hbm %s5049_s0, 512 }
  0x52   : > { %p3131_p2 = scmp.lt.s32.totalorder %s3416_s26, %s5049_s0  ;;  %p3132_p12 = scmp.lt.s32.totalorder %s3130_s18, %s3125_s1 }
  0x53   : > { %p3128_p3 = pnand %p3127_p5, %p3126_p10 }
  0x54   : > { %p3133_p7 = por %p3132_p12, %p3131_p2 }
  0x55   : > { %p3129_p1 = pneg %p3128_p3 }
  0x57   : > { %p3134_p9 = pnand %p3133_p7, %p3129_p1 }
  0x59   : > { %3137 = shalt.err (!%p3134_p9)
}
  0x5a   : > { %s3138_s22 = scalar_lea.vmem %s3418_s25, 256  ;;  %s3235_s3 = smov [#allocation3]  }
  0x5b   : > { %p3139_p0 = scmp.ne.s32.totalorder %s3418_s25, %s3138_s22  ;;  %s3143_s5 = sshll.u32 %s3235_s3, 4  ;;  %s3144_s5 = int_to_ptr.vmem [resolvable:$false] %s3143_s5 }
  0x5c   : > { %s3145_s27 = scalar_lea.vmem %s3144_s5, 512  ;;  %p3146_p3 = scmp.lt.s32.totalorder %s3418_s25, %s3144_s5 }
  0x5d   : > { %p3141_p6 = pnand %p3139_p0, %p3127_p5  ;;  %p3147_p13 = scmp.lt.s32.totalorder %s3145_s27, %s3138_s22 }
  0x5f   : > { %p3142_p10 = pneg %p3141_p6  ;;  %p3148_p4 = por %p3147_p13, %p3146_p3 }
  0x61   : > { %p3149_p8 = pnand %p3148_p4, %p3142_p10 }
  0x63   : > { %3152 = shalt.err (!%p3149_p8)
}
  0x64   : > { %s5123_s1 = smov 8   ;;  %s5124_s19 = smov 128  }
  0x65   : > { %2949 = dma.hbm_to_vmem [thread:$0]  (!%p3420_p11), %s3416_s26, 256, %s3418_s25, %s3424_s14, %s5124_s19, %s5124_s19, %s5123_s1  }
  0x66   : > { %p5125_p6 = scmp.ne.s32.totalorder %s5115_s17, 0 }
  0x68   : > { %352 = sbr.rel (%p5125_p6) target bundleno = 1081 (0x439), region = 56 }
  0x6d   : > { %s3451_s3 = sand.u32 1, %s3217_s10   ;;  %p5126_p4 = scmp.ne.s32.totalorder %s5113_s15, 0 }
  0x6e   : > { %s2811_s5 = sshll.u32 %s3451_s3, 4  ;;  %s355_s18 = scalar_lea.sflag [#allocation4], %s3451_s3 }
  0x6f   : > { %s3457_s29 = scalar_lea.vmem [#allocation3], %s2811_s5 }
  0x70   : > { %3196 = dma.done.wait (%p5126_p4), %s355_s18, 256  }
  0x71   : > { %3198 = vsyncadd (%p5126_p4), %s355_s18, 4294967040  ;;  %p5127_p8 = scmp.eq.s32.totalorder %s3314_s13, 0 }
  0x73   : > { %3200 = dma.done.wait (%p5127_p8), [#allocation7], 5888   ;;  %p5128_p13 = pmov %p5127_p8 }
  0x74   : > { %p5129_p11 = pmov %p5127_p8 }
  0x75   : > { %3202 = vsyncadd (%p5128_p13), [#allocation7], 4294961408 }
  0x76   : > { %3204 = dma.done.wait (%p5129_p11), [#allocation10], 6144   ;;  %p5130_p5 = pmov %p5127_p8 }
  0x77   : > { %v3236_v0 = vmov 0.0   ;;  %v535_v1 = vld [vmem:[#allocation6 + $0xf8] sm:$0xff]  ;;  %v534_v2 = vld [vmem:[#allocation6 + $0xf0] sm:$0xff]  ;;  %v533_v3 = vld [vmem:[#allocation6 + $0xe8] sm:$0xff]  ;;  %vm1899_vm0 = vcmask 1045504   ;;  %s3237_s15 = smov 32  }
  0x78   : > { %3206 = vsyncadd (%p5130_p5), [#allocation10], 4294961152  ;;  %626 = vst [vmem:[#allocation2 + $0x58] sm:$0xff] %v3236_v0  ;;  %612 = vmatprep.mubr.f32.mxu1 %v3236_v0  ;;  %2878 = vmatprep.subr.mxu0 %v3236_v0  ;;  %v532_v4 = vld [vmem:[#allocation6 + $0xe0] sm:$0xff]  ;;  %v531_v5 = vld [vmem:[#allocation6 + $0xd8] sm:$0xff]  ;;  %vm2161_vm1 = vcmask 1044480  }
  0x79   : > { %628 = vst [vmem:[#allocation2 + $0x38] sm:$0xff] %v3236_v0  ;;  %619 = vst [vmem:[#allocation2 + $0x50] sm:$0xff] %v3236_v0  ;;  %548 = vmatprep.subr.mxu1 %v535_v1  ;;  %v530_v6 = vld [vmem:[#allocation6 + $0xd0] sm:$0xff]  ;;  %v529_v7 = vld [vmem:[#allocation6 + $0xc8] sm:$0xff]  ;;  %s3238_s17 = smov 96   ;;  %vm930_vm2 = vcmask 1041408  }
  0x7a   : > { %620 = vst [vmem:[#allocation2] sm:$0xff] %v3236_v0  ;;  %621 = vst [vmem:[#allocation2 + $0x30] sm:$0xff] %v3236_v0  ;;  %549 = vmatpush1.msra.mxu1 %v534_v2  ;;  %v528_v8 = vld [vmem:[#allocation6 + $0xc0] sm:$0xff]  ;;  %v527_v9 = vld [vmem:[#allocation6 + $0xb8] sm:$0xff]  ;;  %vm1192_vm3 = vcmask 1040384   ;;  %vm1637_vm4 = vcmask 1046528  }
  0x7b   : > { %622 = vst [vmem:[#allocation2 + $0x18] sm:$0xff] %v3236_v0  ;;  %623 = vst [vmem:[#allocation2 + $0x28] sm:$0xff] %v3236_v0  ;;  %550 = vmatprep.subr.mxu1 %v533_v3  ;;  %v526_v10 = vld [vmem:[#allocation6 + $0xb0] sm:$0xff]  ;;  %v525_v12 = vld [vmem:[#allocation6 + $0xa8] sm:$0xff]  ;;  %vm665_vm5 = vcmask 1042432   ;;  %vm3239_vm8 = vmmov 0  }
  0x7c   : > { %624 = vst [vmem:[#allocation2 + $0x40] sm:$0xff] %v3236_v0  ;;  %625 = vst [vmem:[#allocation2 + $0x8] sm:$0xff] %v3236_v0  ;;  %551 = vmatpush1.msra.mxu1 %v532_v4  ;;  %v524_v16 = vld [vmem:[#allocation6 + $0xa0] sm:$0xff]  ;;  %v523_v20 = vld [vmem:[#allocation6 + $0x98] sm:$0xff]  ;;  %vm2476_vm9 = vcmask 1043456   ;;  %s408_s27 = scalar_lea.vmem [#allocation12], %s2811_s5 }
  0x7d   : > { %627 = vst [vmem:[#allocation2 + $0x48] sm:$0xff] %v3236_v0  ;;  %552 = vmatprep.subr.mxu1 %v531_v5  ;;  %v522_v22 = vld [vmem:[#allocation6 + $0x90] sm:$0xff]  ;;  %v521_v25 = vld [vmem:[#allocation6 + $0x88] sm:$0xff]  ;;  %v520_v29 = vld [vmem:[#allocation6 + $0x80] sm:$0xff]  ;;  %s2689_s1 = sshll.u32 %s408_s27, 4  ;;  %s2825_s19 = sshll.u32 %s3314_s13, 8  ;;  %s5001_s1 = int_to_ptr.vmem [resolvable:$true] %s2689_s1 }
  0x7e   : > { %553 = vmatpush1.msra.mxu1 %v530_v6  ;;  %v519_v30 = vld [vmem:[#allocation6 + $0x78] sm:$0xff]  ;;  %v518_v38 = vld [vmem:[#allocation6 + $0x70] sm:$0xff]  ;;  %v517_v41 = vld [vmem:[#allocation6 + $0x68] sm:$0xff]  ;;  %s5006_s14 = scalar_lea.hbm %s5058_s9, %s2825_s19  ;;  %s2676_s5 = scalar_lea.sflag [#allocation5], %s3451_s3 }
  0x7f   : > { %554 = vmatprep.subr.mxu1 %v529_v7  ;;  %v1873_v13 = vld [vmem:[#allocation2 + $0x58] sm:$0x3]  ;;  %v516_v42 = vld [vmem:[#allocation6 + $0x60] sm:$0xff]  ;;  %v514_v52 = vld [vmem:[#allocation6 + $0x50] sm:$0xff]  ;;  %s3153_s13 = scalar_lea.vmem %s5001_s1, 256  ;;  %p5239_p2 = scmp.ne.s32.totalorder %s5121_s28, 0 }
  0x80   : > { %v1869_v11 = vld [vmem:[#allocation2 + $0x38] sm:$0xfc]  ;;  %555 = vmatpush1.msra.mxu1 %v528_v8  ;;  %v1910_v17 = vrot.slane %v1873_v13, 2  ;;  %v897_v39 = vld [vmem:[#allocation2 + $0x50] sm:$0xc0]  ;;  %v513_v55 = vld [vmem:[#allocation6 + $0x48] sm:$0xff]  ;;  %p3154_p1 = scmp.ne.s32.totalorder %s5001_s1, %s3153_s13 }
  0x81   : > { %v1909_v14 = vrot.slane %v1869_v11, 2  ;;  %556 = vmatprep.subr.mxu1 %v527_v9  ;;  %v2131_v24 = vld [vmem:[#allocation2 + $0x38] sm:$0xf8]  ;;  %v2135_v27 = vld [vmem:[#allocation2 + $0x58] sm:$0x7]  ;;  %v931_v48 = vrot.slane %v897_v39, 6 }
  0x82   : > { %v1870_v18 = vld [vmem:[#allocation2 + $0x28] sm:$0x3]  ;;  %557 = vmatpush1.msra.mxu1 %v526_v10  ;;  %v2171_v31 = vrot.slane %v2131_v24, 3  ;;  %v2172_v32 = vrot.slane %v2135_v27, 3  ;;  %v900_v36 = vld [vmem:[#allocation2 + $0x18] sm:$0xc0]  ;;  %p3155_p12 = pnand %p3154_p1, %p5239_p2 }
  0x83   : > { %v1901_v21 = vrot.slane %v1870_v18, 2  ;;  %558 = vmatprep.subr.mxu1 %v525_v12  ;;  %v1911_v23 = vsel %vm1899_vm0, %v1909_v14, %v1910_v17  ;;  %v2132_v33 = vld [vmem:[#allocation2 + $0x28] sm:$0x7]  ;;  %v904_v37 = vld [vmem:[#allocation2 + $0x38] sm:$0x3f]  ;;  %v940_v45 = vrot.slane %v900_v36, 6  ;;  %v538_v36 = vlaneseq }
  0x84   : > { %v1866_v15 = vld [vmem:[#allocation2 + $0x48] sm:$0xfc]  ;;  %559 = vmatpush1.msra.mxu1 %v524_v16  ;;  %1922 = vrot.lane.b32.xlu1 %v1911_v23, %s3237_s15  ;;  %v2163_v35 = vrot.slane %v2132_v33, 3  ;;  %v515_v43 = vld [vmem:[#allocation6 + $0x58] sm:$0xff]  ;;  %v3490_v44 = vsel %vm2161_vm1, %v2171_v31, %v2172_v32  ;;  %v941_v46 = vrot.slane %v904_v37, 6  ;;  %v512_v56 = vld [vmem:[#allocation6 + $0x40] sm:$0xff]  ;;  %p3156_p7 = pneg %p3155_p12 }
  0x85   : > { %v1900_v19 = vrot.slane %v1866_v15, 2  ;;  %v2128_v28 = vld [vmem:[#allocation2 + $0x48] sm:$0xf8]  ;;  %560 = vmatprep.subr.mxu1 %v523_v20  ;;  %v1162_v50 = vld [vmem:[#allocation2 + $0x18] sm:$0x80]  ;;  %v510_v1 = vld [vmem:[#allocation6 + $0x30] sm:$0xff] }
  0x86   : > { %561 = vmatpush1.msra.mxu1 %v522_v22  ;;  %v2162_v34 = vrot.slane %v2128_v28, 3  ;;  %v901_v40 = vld [vmem:[#allocation2 + $0x48] sm:$0x3f]  ;;  %v1166_v51 = vld [vmem:[#allocation2 + $0x38] sm:$0x7f]  ;;  %v942_v57 = vsel %vm930_vm2, %v940_v45, %v941_v46  ;;  %v1202_v58 = vrot.slane %v1162_v50, 7 }
  0x87   : > { %v1902_v26 = vsel %vm1899_vm0, %v1900_v19, %v1901_v21  ;;  %562 = vmatprep.subr.mxu1 %v521_v25  ;;  %v932_v49 = vrot.slane %v901_v40, 6  ;;  %v1159_v53 = vld [vmem:[#allocation2 + $0x50] sm:$0x80]  ;;  %v1163_v54 = vld [vmem:[#allocation2 + $0x48] sm:$0x7f]  ;;  %v1203_v59 = vrot.slane %v1166_v51, 7 }
  0x88   : > { %1916 = vrot.lane.b32.xlu0 %v1902_v26, %s3237_s15  ;;  %563 = vmatpush1.msra.mxu1 %v520_v29  ;;  %v3493_v47 = vsel %vm2161_vm1, %v2162_v34, %v2163_v35  ;;  %v511_v60 = vld [vmem:[#allocation6 + $0x38] sm:$0xff]  ;;  %v1193_v62 = vrot.slane %v1159_v53, 7  ;;  %v1194_v63 = vrot.slane %v1163_v54, 7  ;;  %v509_v2 = vld [vmem:[#allocation6 + $0x28] sm:$0xff]  ;;  %v508_v3 = vld [vmem:[#allocation6 + $0x20] sm:$0xff]  ;;  %v3552_v39 = vand.u32 127, %v538_v36 }
  0x89   : > { %1934 = vrot.lane.b32.xlu1 %v1911_v23, %s3238_s17  ;;  %564 = vmatprep.subr.mxu1 %v519_v30  ;;  %v933_v61 = vsel %vm930_vm2, %v931_v48, %v932_v49  ;;  %v1204_v4 = vsel %vm1192_vm3, %v1202_v58, %v1203_v59  ;;  %v507_v5 = vld [vmem:[#allocation6 + $0x18] sm:$0xff]  ;;  %v506_v9 = vld [vmem:[#allocation6 + $0x10] sm:$0xff]  ;;  %v1604_v10 = vld [vmem:[#allocation2 + $0x48] sm:$0xfe]  ;;  %s3240_s26 = smov [#allocation12]  }
  0x8a   : > { %565 = vmatpush1.msra.mxu1 %v518_v38  ;;  %v1195_v6 = vsel %vm1192_vm3, %v1193_v62, %v1194_v63  ;;  %v1607_v7 = vld [vmem:[#allocation2 + $0x38] sm:$0xfe]  ;;  %v1611_v8 = vld [vmem:[#allocation2 + $0x58] sm:$0x1]  ;;  %v1608_v11 = vld [vmem:[#allocation2 + $0x28] sm:$0x1] }
  0x8b   : > { %566 = vmatprep.subr.mxu1 %v517_v41  ;;  %v505_v12 = vld [vmem:[#allocation6 + $0x8] sm:$0xff]  ;;  %v504_v13 = vld [vmem:[#allocation6] sm:$0xff]  ;;  %v1647_v14 = vrot.slane %v1607_v7, 1  ;;  %v1648_v15 = vrot.slane %v1611_v8, 1  ;;  %v1638_v17 = vrot.slane %v1604_v10, 1  ;;  %v1639_v18 = vrot.slane %v1608_v11, 1 }
  0x8c   : > { %1928 = vrot.lane.b32.xlu0 %v1902_v26, %s3238_s17  ;;  %567 = vmatpush1.msra.mxu1 %v516_v42  ;;  %v410_v16 = vld [vmem:[%s3457_s29 + $0x8] sm:$0xff]  ;;  %v632_v23 = vld [vmem:[#allocation2 + $0x50] sm:$0xe0]  ;;  %vm692_vm6 = vcmp.lt.s32.totalorder %v3552_v39, 32  ;;  %vm705_vm7 = vcmp.lt.s32.totalorder %v3552_v39, 96  ;;  %v539_v11 = vshrl.u32 %v538_v36, 7 }
  0x8d   : > { %2184 = vrot.lane.b32.xlu1 %v3490_v44, %s3237_s15  ;;  %568 = vmatprep.subr.mxu1 %v515_v43  ;;  %v1649_v19 = vsel %vm1637_vm4, %v1647_v14, %v1648_v15  ;;  %v1640_v20 = vsel %vm1637_vm4, %v1638_v17, %v1639_v18  ;;  %v635_v21 = vld [vmem:[#allocation2 + $0x18] sm:$0xe0]  ;;  %v639_v22 = vld [vmem:[#allocation2 + $0x38] sm:$0x1f]  ;;  %v636_v24 = vld [vmem:[#allocation2 + $0x48] sm:$0x1f] }
  0x8e   : > { %569 = vmatpush1.msra.mxu1 %v514_v52  ;;  %v675_v25 = vrot.slane %v635_v21, 5  ;;  %v676_v26 = vrot.slane %v639_v22, 5  ;;  %v666_v27 = vrot.slane %v632_v23, 5  ;;  %v667_v28 = vrot.slane %v636_v24, 5  ;;  %v3685_v21 = vld [vmem:[#allocation2 + $0x40] sm:$0x3] }
  0x8f   : > { %570 = vmatprep.subr.mxu1 %v513_v55  ;;  %v3671_v14 = vsub.s32 1, %v539_v11  ;;  %v1904_v22 = vrot.slane %v3685_v21, 2  ;;  %v3692_v23 = vld [vmem:[#allocation2 + $0x40] sm:$0x7]  ;;  %s3157_s25 = sshll.u32 %s3240_s26, 4  ;;  %s3158_s25 = int_to_ptr.vmem [resolvable:$false] %s3157_s25 }
  0x90   : > { %2178 = vrot.lane.b32.xlu0 %v3493_v47, %s3237_s15  ;;  %571 = vmatpush1.msra.mxu1 %v512_v56  ;;  %v677_v29 = vsel %vm665_vm5, %v675_v25, %v676_v26  ;;  %v668_v30 = vsel %vm665_vm5, %v666_v27, %v667_v28  ;;  %5138 = vst [vmem:[#allocation24_spill] sm:$0xff] %v3692_v23  ;;  %v3698_v26 = vld [vmem:[#allocation2 + $0x8] sm:$0x3]  ;;  %v2166_v28 = vrot.slane %v3692_v23, 3  ;;  %s3159_s21 = scalar_lea.vmem %s3158_s25, 512  ;;  %p3160_p9 = scmp.lt.s32.totalorder %s5001_s1, %s3158_s25 }
  0x91   : > { %953 = vrot.lane.b32.xlu1 %v942_v57, %s3237_s15  ;;  %572 = vmatprep.subr.mxu1 %v511_v60  ;;  %5139 = vst [vmem:[#allocation25_spill] sm:$0xff] %v3698_v26  ;;  %p3161_p0 = scmp.lt.s32.totalorder %s3159_s21, %s3153_s13 }
  0x92   : > { %573 = vmatpush1.msra.mxu1 %v510_v1 }
  0x93   : > { %574 = vmatprep.subr.mxu1 %v509_v2  ;;  %p3162_p10 = por %p3161_p0, %p3160_p9 }
  0x94   : > { %947 = vrot.lane.b32.xlu0 %v933_v61, %s3237_s15  ;;  %575 = vmatpush1.msra.mxu1 %v508_v3 }
  0x95   : > { %1215 = vrot.lane.b32.xlu1 %v1204_v4, %s3237_s15  ;;  %576 = vmatprep.subr.mxu1 %v507_v5  ;;  %p3163_p3 = pnand %p3162_p10, %p3156_p7 }
  0x96   : > { %577 = vmatpush1.msra.mxu1 %v506_v9 }
  0x97   : > { %578 = vmatprep.subr.mxu1 %v505_v12  ;;  %v3666_v12 = vsub.s32 0, %v539_v11 }
  0x98   : > { %1209 = vrot.lane.b32.xlu0 %v1195_v6, %s3237_s15  ;;  %579 = vmatpush1.msra.mxu1 %v504_v13  ;;  %v536_v13 = vld [vmem:[%s5051_s2] sm:$0x3] }
  0x99   : > { %1446 = vrot.lane.b32.xlu1 %v3236_v0, %s3237_s15  ;;  %613 = vmatmul.mubr.f32.vlgmr.msra.gmra.mxu1 %v410_v16  ;;  %v541_v15 = vrot.slane %v536_v13, %v3666_v12  ;;  %v545_v16 = vrot.slane %v536_v13, %v3671_v14 }
  0x9c   : > { %1440 = vrot.lane.b32.xlu0 %v3236_v0, %s3237_s15 }
  0x9d   : > { %1660 = vrot.lane.b32.xlu1 %v1649_v19, %s3237_s15 }
  0xa0   : > { %1654 = vrot.lane.b32.xlu0 %v1640_v20, %s3237_s15 }
  0xa1   : > { %2196 = vrot.lane.b32.xlu1 %v3490_v44, %s3238_s17 }
  0xa4   : > { %2190 = vrot.lane.b32.xlu0 %v3493_v47, %s3238_s17 }
  0xa5   : > { %965 = vrot.lane.b32.xlu1 %v942_v57, %s3238_s17 }
  0xa8   : > { %959 = vrot.lane.b32.xlu0 %v933_v61, %s3238_s17 }
  0xa9   : > { %1227 = vrot.lane.b32.xlu1 %v1204_v4, %s3238_s17 }
  0xac   : > { %1221 = vrot.lane.b32.xlu0 %v1195_v6, %s3238_s17 }
  0xad   : > { %1458 = vrot.lane.b32.xlu1 %v3236_v0, %s3238_s17 }
  0xb0   : > { %1452 = vrot.lane.b32.xlu0 %v3236_v0, %s3238_s17 }
  0xb1   : > { %1672 = vrot.lane.b32.xlu1 %v1649_v19, %s3238_s17 }
  0xb4   : > { %1666 = vrot.lane.b32.xlu0 %v1640_v20, %s3238_s17 }
  0xb5   : > { %688 = vrot.lane.b32.xlu1 %v677_v29, %s3237_s15 }
  0xb8   : > { %682 = vrot.lane.b32.xlu0 %v668_v30, %s3237_s15 }
  0xb9   : > { %703 = vrot.lane.b32.xlu1 %v677_v29, %s3238_s17 }
  0xbc   : > { %697 = vrot.lane.b32.xlu0 %v668_v30, %s3238_s17  ;;  %v3704_v30 = vld [vmem:[#allocation2] sm:$0xc0] }
  0xbd   : > { %5141 = vst [vmem:[#allocation27_spill] sm:$0xff] %v3704_v30 }
  0xf6   : > { %v3536_v0 = vpop.permute.xlu1 %1922 }
  0xf7   : > { %5131 = vst [vmem:[#allocation17_spill] sm:$0xff] %v3536_v0 }
  0xfa   : > { %v3538_v31 = vpop.permute.xlu0 %1916 }
  0xfb   : > { %v3540_v32 = vpop.permute.xlu1 %1934  ;;  %v1927_v46 = vsel %vm692_vm6, %v3536_v0, %v3538_v31 }
  0xfe   : > { %v3542_v33 = vpop.permute.xlu0 %1928 }
  0xff   : > { %v3544_v34 = vpop.permute.xlu1 %2184  ;;  %v1939_v49 = vsel %vm705_vm7, %v3540_v32, %v3542_v33 }
 0x100   : > { %5132 = vst [vmem:[#allocation18_spill] sm:$0xff] %v3544_v34 }
 0x102   : > { %v3546_v35 = vpop.permute.xlu0 %2178 }
 0x103   : > { %v3548_v37 = vpop.permute.xlu1 %953  ;;  %v2189_v61 = vsel %vm692_vm6, %v3544_v34, %v3546_v35 }
 0x104   : > { %5133 = vst [vmem:[#allocation19_spill] sm:$0xff] %v3548_v37 }
 0x106   : > { %v3550_v38 = vpop.permute.xlu0 %947 }
 0x107   : > { %v3554_v40 = vpop.permute.xlu1 %1215  ;;  %v958_v52 = vsel %vm692_vm6, %v3548_v37, %v3550_v38 }
 0x108   : > { %5134 = vst [vmem:[#allocation20_spill] sm:$0xff] %v3554_v40 }
 0x10a   : > { %v3556_v41 = vpop.permute.xlu0 %1209 }
 0x10b   : > { %v3559_v42 = vpop.permute.xlu1 %1446  ;;  %v1220_v2 = vsel %vm692_vm6, %v3554_v40, %v3556_v41 }
 0x10e   : > { %v3561_v43 = vpop.permute.xlu0 %1440 }
 0x10f   : > { %v1451_v44 = vsel %vm692_vm6, %v3559_v42, %v3561_v43  ;;  %v3568_v45 = vpop.permute.xlu1 %1660 }
 0x110   : > { %1498 = vrot.lane.b32.xlu0 %v1451_v44, %s3237_s15  ;;  %5135 = vst [vmem:[#allocation21_spill] sm:$0xff] %v3568_v45 }
 0x112   : > { %v3574_v47 = vpop.permute.xlu0 %1654 }
 0x113   : > { %v3578_v48 = vpop.permute.xlu1 %2196  ;;  %v1665_v6 = vsel %vm692_vm6, %v3568_v45, %v3574_v47 }
 0x114   : > { %1990 = vrot.lane.b32.xlu0 %v1927_v46, %s3237_s15 }
 0x116   : > { %v3584_v50 = vpop.permute.xlu0 %2190 }
 0x117   : > { %v3587_v51 = vpop.permute.xlu1 %965  ;;  %v2201_v55 = vsel %vm705_vm7, %v3578_v48, %v3584_v50 }
 0x118   : > { %2007 = vrot.lane.b32.xlu0 %v1939_v49, %s3238_s17  ;;  %v1907_v49 = vrot.slane %v3698_v26, 2 }
 0x11a   : > { %v3593_v53 = vpop.permute.xlu0 %959 }
 0x11b   : > { %v3596_v54 = vpop.permute.xlu1 %1227  ;;  %v970_v10 = vsel %vm705_vm7, %v3587_v51, %v3593_v53 }
 0x11c   : > { %1021 = vrot.lane.b32.xlu0 %v958_v52, %s3237_s15  ;;  %v3710_v52 = vld [vmem:[#allocation2 + $0x8] sm:$0x7] }
 0x11e   : > { %v3602_v56 = vpop.permute.xlu0 %1221 }
 0x11f   : > { %v3605_v57 = vpop.permute.xlu1 %1458  ;;  %v1232_v58 = vsel %vm705_vm7, %v3596_v54, %v3602_v56 }
 0x120   : > { %2269 = vrot.lane.b32.xlu0 %v2201_v55, %s3238_s17 }
 0x122   : > { %v3611_v59 = vpop.permute.xlu0 %1452 }
 0x123   : > { %v1463_v60 = vsel %vm705_vm7, %v3605_v57, %v3611_v59  ;;  %v3623_v62 = vpop.permute.xlu1 %1672 }
 0x124   : > { %1515 = vrot.lane.b32.xlu1 %v1463_v60, %s3238_s17  ;;  %1300 = vrot.lane.b32.xlu0 %v1232_v58, %s3238_s17  ;;  %v934_v60 = vrot.slane %v3704_v30, 6 }
 0x126   : > { %v3625_v63 = vpop.permute.xlu0 %1666 }
 0x127   : > { %v1677_v1 = vsel %vm705_vm7, %v3623_v62, %v3625_v63  ;;  %v3637_v3 = vpop.permute.xlu1 %688 }
 0x128   : > { %2252 = vrot.lane.b32.xlu1 %v2189_v61, %s3237_s15  ;;  %1745 = vrot.lane.b32.xlu0 %v1677_v1, %s3238_s17  ;;  %5136 = vst [vmem:[#allocation22_spill] sm:$0xff] %v3637_v3  ;;  %v2169_v61 = vrot.slane %v3710_v52, 3 }
 0x12a   : > { %v3639_v4 = vpop.permute.xlu0 %682 }
 0x12b   : > { %v696_v5 = vsel %vm692_vm6, %v3637_v3, %v3639_v4  ;;  %v3651_v7 = vpop.permute.xlu1 %703  ;;  %v3760_v3 = vld [vmem:[#allocation2 + $0x8] sm:$0x1] }
 0x12c   : > { %1283 = vrot.lane.b32.xlu1 %v1220_v2, %s3237_s15  ;;  %760 = vrot.lane.b32.xlu0 %v696_v5, %s3237_s15  ;;  %5137 = vst [vmem:[#allocation23_spill] sm:$0xff] %v3651_v7 }
 0x12e   : > { %v3653_v8 = vpop.permute.xlu0 %697 }
 0x12f   : > { %v709_v9 = vsel %vm705_vm7, %v3651_v7, %v3653_v8 }
 0x130   : > { %1728 = vrot.lane.b32.xlu1 %v1665_v6, %s3237_s15  ;;  %777 = vrot.lane.b32.xlu0 %v709_v9, %s3238_s17  ;;  %v3724_v9 = vld [vmem:[#allocation2] sm:$0x80] }
 0x134   : > { %1038 = vrot.lane.b32.xlu1 %v970_v10, %s3238_s17  ;;  %v3726_v10 = vld [vmem:[#allocation2 + $0x30] sm:$0xc0] }
 0x159   : > { %v614_v17 = vpop.f32.mrf.mxu1 }
 0x15a   : > { %v3675_v18 = vadd.f32 %v614_v17, %v541_v15  ;;  %v1196_v15 = vrot.slane %v3724_v9, 7 }
 0x15b   : > { %v616_v19 = vpop.f32.mrf.mxu1 }
 0x15c   : > { %630 = vst [vmem:[#allocation2 + $0x10] sm:$0xff] %v3675_v18  ;;  %v3678_v20 = vadd.f32 %v616_v19, %v545_v16  ;;  %1442 = vrot.lane.b32.xlu1 %v3675_v18, %s3237_s15  ;;  %v937_v16 = vrot.slane %v3726_v10, 6 }
 0x15e   : > { %631 = vst [vmem:[#allocation2 + $0x20] sm:$0xff] %v3678_v20  ;;  %1444 = vrot.lane.b32.xlu0 %v3678_v20, %s3237_s15 }
 0x160   : > { %1454 = vrot.lane.b32.xlu1 %v3675_v18, %s3238_s17 }
 0x162   : > { %1456 = vrot.lane.b32.xlu0 %v3678_v20, %s3238_s17 }
 0x163   : > { %v3694_v24 = vld [vmem:[#allocation2 + $0x10] sm:$0xfc] }
 0x164   : > { %v3696_v25 = vld [vmem:[#allocation2 + $0x10] sm:$0xf8]  ;;  %v1903_v27 = vrot.slane %v3694_v24, 2 }
 0x165   : > { %v3702_v29 = vld [vmem:[#allocation2 + $0x20] sm:$0xfc]  ;;  %v2165_v44 = vrot.slane %v3696_v25, 3  ;;  %v3714_v55 = vld [vmem:[#allocation2 + $0x10] sm:$0x3f] }
 0x166   : > { %5140 = vst [vmem:[#allocation26_spill] sm:$0xff] %v3702_v29  ;;  %v1905_v36 = vsel %vm1899_vm0, %v1903_v27, %v1904_v22  ;;  %v1906_v46 = vrot.slane %v3702_v29, 2  ;;  %v3716_v58 = vld [vmem:[#allocation2 + $0x20] sm:$0xf8]  ;;  %v935_v5 = vrot.slane %v3714_v55, 6 }
 0x167   : > { %1930 = vrot.lane.b32.xlu1 %v1905_v36, %s3238_s17  ;;  %1918 = vrot.lane.b32.xlu0 %v1905_v36, %s3237_s15  ;;  %v2167_v1 = vsel %vm2161_vm1, %v2165_v44, %v2166_v28  ;;  %v2168_v6 = vrot.slane %v3716_v58, 3  ;;  %v3730_v11 = vld [vmem:[#allocation2 + $0x10] sm:$0x7f]  ;;  %v3732_v13 = vld [vmem:[#allocation2 + $0x20] sm:$0x3f] }
 0x168   : > { %v1908_v2 = vsel %vm1899_vm0, %v1906_v46, %v1907_v49  ;;  %v936_v17 = vsel %vm930_vm2, %v934_v60, %v935_v5  ;;  %v1197_v22 = vrot.slane %v3730_v11, 7  ;;  %v938_v27 = vrot.slane %v3732_v13, 6  ;;  %v3740_v28 = vld [vmem:[#allocation2 + $0x40] sm:$0x1]  ;;  %v3742_v36 = vld [vmem:[#allocation2 + $0x30] sm:$0x80] }
 0x169   : > { %v2170_v19 = vsel %vm2161_vm1, %v2168_v6, %v2169_v61  ;;  %v3746_v44 = vld [vmem:[#allocation2 + $0x10] sm:$0xfe]  ;;  %v3748_v46 = vld [vmem:[#allocation2 + $0x20] sm:$0x7f]  ;;  %v1642_v49 = vrot.slane %v3740_v28, 1  ;;  %v1199_v60 = vrot.slane %v3742_v36, 7 }
 0x16a   : > { %v1198_v61 = vsel %vm1192_vm3, %v1196_v15, %v1197_v22  ;;  %v939_v5 = vsel %vm930_vm2, %v937_v16, %v938_v27  ;;  %v1641_v6 = vrot.slane %v3746_v44, 1  ;;  %v1200_v30 = vrot.slane %v3748_v46, 7  ;;  %v3758_v23 = vld [vmem:[#allocation2 + $0x20] sm:$0xfe]  ;;  %v3777_v27 = vld [vmem:[#allocation2 + $0x10] sm:$0x1f] }
 0x16b   : > { %2180 = vrot.lane.b32.xlu1 %v2167_v1, %s3237_s15  ;;  %1932 = vrot.lane.b32.xlu0 %v1908_v2, %s3238_s17  ;;  %v1644_v15 = vrot.slane %v3758_v23, 1  ;;  %v1645_v16 = vrot.slane %v3760_v3, 1 }
 0x16c   : > { %v1643_v45 = vsel %vm1637_vm4, %v1641_v6, %v1642_v49  ;;  %v1201_v40 = vsel %vm1192_vm3, %v1199_v60, %v1200_v30  ;;  %v3775_v30 = vld [vmem:[#allocation2] sm:$0xe0]  ;;  %v670_v60 = vrot.slane %v3777_v27, 5 }
 0x16d   : > { %v1646_v22 = vsel %vm1637_vm4, %v1644_v15, %v1645_v16  ;;  %v669_v49 = vrot.slane %v3775_v30, 5 }
 0x16f   : > { %949 = vrot.lane.b32.xlu1 %v936_v17, %s3237_s15  ;;  %2182 = vrot.lane.b32.xlu0 %v2170_v19, %s3237_s15 }
 0x173   : > { %1211 = vrot.lane.b32.xlu1 %v1198_v61, %s3237_s15  ;;  %951 = vrot.lane.b32.xlu0 %v939_v5, %s3237_s15 }
 0x177   : > { %1656 = vrot.lane.b32.xlu1 %v1643_v45, %s3237_s15  ;;  %1213 = vrot.lane.b32.xlu0 %v1201_v40, %s3237_s15 }
 0x17b   : > { %2192 = vrot.lane.b32.xlu1 %v2167_v1, %s3238_s17  ;;  %1658 = vrot.lane.b32.xlu0 %v1646_v22, %s3237_s15  ;;  %v3783_v1 = vld [vmem:[#allocation2 + $0x30] sm:$0xe0] }
 0x17f   : > { %961 = vrot.lane.b32.xlu1 %v936_v17, %s3238_s17  ;;  %2194 = vrot.lane.b32.xlu0 %v2170_v19, %s3238_s17  ;;  %v3785_v17 = vld [vmem:[#allocation2 + $0x20] sm:$0x1f]  ;;  %v671_v19 = vsel %vm665_vm5, %v669_v49, %v670_v60 }
 0x183   : > { %1223 = vrot.lane.b32.xlu1 %v1198_v61, %s3238_s17  ;;  %963 = vrot.lane.b32.xlu0 %v939_v5, %s3238_s17  ;;  %v672_v61 = vrot.slane %v3783_v1, 5  ;;  %v673_v5 = vrot.slane %v3785_v17, 5 }
 0x185   : > { %v674_v6 = vsel %vm665_vm5, %v672_v61, %v673_v5 }
 0x187   : > { %1668 = vrot.lane.b32.xlu1 %v1643_v45, %s3238_s17  ;;  %1225 = vrot.lane.b32.xlu0 %v1201_v40, %s3238_s17  ;;  %v3797_v40 = vpop.permute.xlu0 %1498 }
 0x188   : > { %5142 = vst [vmem:[#allocation28_spill] sm:$0xff] %v3797_v40 }
 0x18b   : > { %684 = vrot.lane.b32.xlu1 %v671_v19, %s3237_s15  ;;  %1670 = vrot.lane.b32.xlu0 %v1646_v22, %s3238_s17  ;;  %v3799_v45 = vpop.permute.xlu0 %1990 }
 0x18c   : > { %5143 = vst [vmem:[#allocation29_spill] sm:$0xff] %v3799_v45  ;;  %v1426_v45 = vld [vmem:[#allocation8 + $0x30] ss:$8 sm:$0x3] }
 0x18f   : > { %699 = vrot.lane.b32.xlu1 %v671_v19, %s3238_s17  ;;  %686 = vrot.lane.b32.xlu0 %v674_v6, %s3237_s15  ;;  %v3801_v15 = vpop.permute.xlu0 %2007 }
 0x190   : > { %5144 = vst [vmem:[#allocation30_spill] sm:$0xff] %v3801_v15  ;;  %v1465_v15 = vld [vmem:[#allocation8 + $0x27] ss:$8 sm:$0x3] }
 0x193   : > { %1920 = vrot.lane.b32.xlu1 %v1908_v2, %s3237_s15  ;;  %701 = vrot.lane.b32.xlu0 %v674_v6, %s3238_s17  ;;  %v3803_v16 = vpop.permute.xlu0 %1021 }
 0x194   : > { %5145 = vst [vmem:[#allocation31_spill] sm:$0xff] %v3803_v16 }
 0x196   : > { %v3807_v22 = vpop.permute.xlu1 %1515 }
 0x197   : > { %v3805_v49 = vpop.permute.xlu0 %2269  ;;  %5147 = vst [vmem:[#allocation33_spill] sm:$0xff] %v3807_v22 }
 0x198   : > { %5146 = vst [vmem:[#allocation32_spill] sm:$0xff] %v3805_v49  ;;  %v1431_v49 = vrot.slane %v1426_v45, %v3666_v12 }
 0x19a   : > { %v3811_v19 = vpop.permute.xlu1 %2252 }
 0x19b   : > { %v3809_v60 = vpop.permute.xlu0 %1300  ;;  %5149 = vst [vmem:[#allocation35_spill] sm:$0xff] %v3811_v19  ;;  %v1435_v19 = vrot.slane %v1426_v45, %v3671_v14 }
 0x19c   : > { %5148 = vst [vmem:[#allocation34_spill] sm:$0xff] %v3809_v60  ;;  %v1470_v60 = vrot.slane %v1465_v15, %v3666_v12 }
 0x19d   : > { %v1439_v45 = vmul.f32 %v1435_v19, %v3678_v20 }
 0x19e   : > { %v3815_v2 = vpop.permute.xlu1 %1283 }
 0x19f   : > { %v3813_v61 = vpop.permute.xlu0 %1745  ;;  %5151 = vst [vmem:[#allocation37_spill] sm:$0xff] %v3815_v2  ;;  %v1482_v2 = vld [vmem:[#allocation8 + $0x31] ss:$8 sm:$0x3] }
 0x1a0   : > { %5150 = vst [vmem:[#allocation36_spill] sm:$0xff] %v3813_v61  ;;  %v1474_v61 = vrot.slane %v1465_v15, %v3671_v14  ;;  %v1487_v37 = vrot.slane %v1482_v2, %v3666_v12 }
 0x1a2   : > { %v3819_v6 = vpop.permute.xlu1 %1728 }
 0x1a3   : > { %v3817_v5 = vpop.permute.xlu0 %760  ;;  %5153 = vst [vmem:[#allocation39_spill] sm:$0xff] %v3819_v6  ;;  %v1438_v6 = vmul.f32 %v1431_v49, %v3675_v18 }
 0x1a4   : > { %5152 = vst [vmem:[#allocation38_spill] sm:$0xff] %v3817_v5 }
 0x1a6   : > { %v3821_v40 = vpop.permute.xlu1 %1038 }
 0x1a7   : > { %5154 = vst [vmem:[#allocation40_spill] sm:$0xff] %v3821_v40  ;;  %v3823_v16 = vpop.permute.xlu0 %777 }
 0x1a8   : > { %5155 = vst [vmem:[#allocation41_spill] sm:$0xff] %v3823_v16 }
 0x1ce   : > { %v1443_v22 = vpop.permute.xlu1 %1442 }
 0x1cf   : > { %v1450_v5 = vsel %vm692_vm6, %v3561_v43, %v1443_v22  ;;  %v1491_v43 = vrot.slane %v1482_v2, %v3671_v14 }
 0x1d0   : > { %v1445_v34 = vpop.permute.xlu0 %1444  ;;  %v1477_v40 = vmul.f32 %v1470_v60, %v1450_v5  ;;  %1500 = vrot.lane.b32.xlu1 %v1450_v5, %s3237_s15 }
 0x1d1   : > { %v1449_v16 = vsel %vm692_vm6, %v1443_v22, %v1445_v34  ;;  %v3844_v22 = vld [vmem:[#allocation8 + $0x45] ss:$8 sm:$0x3]  ;;  %v1448_v20 = vsel %vm692_vm6, %v1445_v34, %v3559_v42  ;;  %v2203_v42 = vld [vmem:[#allocation8 + $0x54] ss:$8 sm:$0x3] }
 0x1d2   : > { %v1479_v29 = vadd.f32 %v1477_v40, %v1438_v6  ;;  %1502 = vrot.lane.b32.xlu0 %v1449_v16, %s3237_s15  ;;  %v1478_v15 = vmul.f32 %v1474_v61, %v1449_v16  ;;  %v1455_v26 = vpop.permute.xlu1 %1454  ;;  %v3855_v61 = vld [vmem:[#allocation8 + $0x46] ss:$8 sm:$0x3]  ;;  %v1946_v2 = vrot.slane %v3844_v22, %v3666_v12 }
 0x1d3   : > { %v1462_v18 = vsel %vm705_vm7, %v3611_v59, %v1455_v26 }
 0x1d4   : > { %v1480_v49 = vadd.f32 %v1478_v15, %v1439_v45  ;;  %v1457_v60 = vpop.permute.xlu0 %1456  ;;  %1509 = vrot.lane.b32.xlu1 %v1462_v18, %s3238_s17  ;;  %v2137_v45 = vld [vmem:[#allocation8 + $0x55] ss:$8 sm:$0x3]  ;;  %v972_v18 = vld [vmem:[#allocation8 + $0x11] ss:$8 sm:$0x3] }
 0x1d5   : > { %v1461_v40 = vsel %vm705_vm7, %v1455_v26, %v1457_v60  ;;  %v1460_v16 = vsel %vm705_vm7, %v1457_v60, %v3605_v57  ;;  %v1880_v57 = vrot.slane %v3855_v61, %v3666_v12 }
 0x1d6   : > { %1504 = vrot.lane.b32.xlu0 %v1448_v20, %s3237_s15  ;;  %v1494_v59 = vmul.f32 %v1487_v37, %v1461_v40  ;;  %v1495_v19 = vmul.f32 %v1491_v43, %v1460_v16  ;;  %v3868_v37 = vld [vmem:[#allocation8 + $0x47] ss:$8 sm:$0x3]  ;;  %v2208_v43 = vrot.slane %v2203_v42, %v3666_v12 }
 0x1d8   : > { %v3859_v5 = vadd.f32 %v1494_v59, %v1479_v29  ;;  %1511 = vrot.lane.b32.xlu1 %v1461_v40, %s3238_s17  ;;  %v3862_v34 = vadd.f32 %v1495_v19, %v1480_v49  ;;  %v1971_v49 = vrot.slane %v3868_v37, %v3666_v12  ;;  %v1887_v40 = vmul.f32 %v1880_v57, %v3694_v24  ;;  %v906_v59 = vld [vmem:[#allocation8 + $0x12] ss:$8 sm:$0x3] }
 0x1d9   : > { %v1931_v26 = vpop.permute.xlu1 %1930  ;;  %v3864_v6 = vpop.permute.xlu0 %1918  ;;  %v3886_v19 = vrot.slane %v2137_v45, %v3666_v12 }
 0x1da   : > { %5156 = vst [vmem:[#allocation42_spill] sm:$0xff] %v3859_v5  ;;  %5157 = vst [vmem:[#allocation43_spill] sm:$0xff] %v3862_v34  ;;  %1513 = vrot.lane.b32.xlu0 %v1460_v16, %s3238_s17  ;;  %v1926_v29 = vsel %vm692_vm6, %v3538_v31, %v3864_v6  ;;  %v1938_v31 = vsel %vm705_vm7, %v3542_v33, %v1931_v26  ;;  %v977_v33 = vrot.slane %v972_v18, %v3666_v12 }
 0x1db   : > { %5158 = vst [vmem:[#allocation44_spill] sm:$0xff] %v3864_v6  ;;  %v1953_v15 = vmul.f32 %v1946_v2, %v1926_v29  ;;  %5159 = vst [vmem:[#allocation45_spill] sm:$0xff] %v3886_v19  ;;  %v1889_v2 = vmul.f32 %v1880_v57, %v3685_v21  ;;  %v2212_v5 = vrot.slane %v2203_v42, %v3671_v14  ;;  %v1234_v57 = vld [vmem:[#allocation8 + $0x20] ss:$8 sm:$0x3] }
 0x1dc   : > { %1992 = vrot.lane.b32.xlu1 %v1926_v29, %s3237_s15  ;;  %v3903_v21 = vrot.slane %v906_v59, %v3666_v12  ;;  %v981_v6 = vrot.slane %v972_v18, %v3671_v14 }
 0x1dd   : > { %v2181_v60 = vpop.permute.xlu1 %2180  ;;  %v3879_v20 = vpop.permute.xlu0 %1932  ;;  %v1957_v16 = vrot.slane %v1953_v15, 6 }
 0x1de   : > { %2001 = vrot.lane.b32.xlu0 %v1938_v31, %s3238_s17  ;;  %v2188_v29 = vsel %vm692_vm6, %v3546_v35, %v2181_v60  ;;  %v3896_v24 = vsel %vm705_vm7, %v1931_v26, %v3879_v20  ;;  %5162 = vst [vmem:[#allocation48_spill] sm:$0xff] %v3903_v21  ;;  %v2149_v26 = vmul.f32 %v3886_v19, %v3696_v25 }
 0x1df   : > { %5160 = vst [vmem:[#allocation46_spill] sm:$0xff] %v3896_v24  ;;  %v1961_v15 = vadd.f32 %v1957_v16, %v1887_v40  ;;  %v3899_v34 = vmul.f32 %v2208_v43, %v2188_v29  ;;  %v1978_v31 = vmul.f32 %v1971_v49, %v3896_v24  ;;  %v3913_v43 = vrot.slane %v2137_v45, %v3671_v14  ;;  %v1168_v49 = vld [vmem:[#allocation8 + $0x21] ss:$8 sm:$0x3] }
 0x1e0   : > { %v1963_v42 = vadd.f32 %v1957_v16, %v1889_v2  ;;  %v1239_v16 = vrot.slane %v1234_v57, %v3666_v12  ;;  %v3936_v2 = vrot.slane %v906_v59, %v3671_v14 }
 0x1e1   : > { %5161 = vst [vmem:[#allocation47_spill] sm:$0xff] %v3899_v34  ;;  %v950_v0 = vpop.permute.xlu1 %949  ;;  %v3906_v35 = vpop.permute.xlu0 %2182  ;;  %v1982_v24 = vrot.slane %v1978_v31, 6  ;;  %v5164_v45 = vrot.slane %v3899_v34, 5 }
 0x1e2   : > { %v957_v7 = vsel %vm692_vm6, %v3550_v38, %v950_v0  ;;  %2254 = vrot.lane.b32.xlu0 %v2188_v29, %s3237_s15  ;;  %v3922_v25 = vsel %vm692_vm6, %v2181_v60, %v3906_v35  ;;  %v1613_v29 = vld [vmem:[#allocation8 + $0x37] ss:$8 sm:$0x3] }
 0x1e3   : > { %v3924_v40 = vmul.f32 %v977_v33, %v957_v7  ;;  %1023 = vrot.lane.b32.xlu1 %v957_v7, %s3237_s15  ;;  %v3929_v18 = vadd.f32 %v5164_v45, %v2149_v26  ;;  %v3933_v38 = vmul.f32 %v2212_v5, %v3922_v25  ;;  %v3938_v31 = vadd.f32 %v1982_v24, %v1961_v15  ;;  %v1679_v5 = vld [vmem:[#allocation8 + $0x36] ss:$8 sm:$0x3] }
 0x1e4   : > { %v3940_v60 = vadd.f32 %v1982_v24, %v1963_v42  ;;  %v920_v7 = vmul.f32 %v3903_v21, %v3714_v55  ;;  %v2150_v24 = vmul.f32 %v3913_v43, %v3716_v58  ;;  %v3978_v58 = vrot.slane %v1168_v49, %v3671_v14 }
 0x1e5   : > { %5163 = vst [vmem:[#allocation49_spill] sm:$0xff] %v3924_v40  ;;  %5165 = vst [vmem:[#allocation50_spill] sm:$0xff] %v3929_v18  ;;  %v5093_v33 = vrot.slane %v3924_v40, 2  ;;  %v1212_v26 = vpop.permute.xlu1 %1211  ;;  %v3945_v45 = vpop.permute.xlu0 %951  ;;  %v3948_v18 = vrot.slane %v1168_v49, %v3666_v12 }
 0x1e6   : > { %5166 = vst [vmem:[#allocation51_spill] sm:$0xff] %v3938_v31  ;;  %5167 = vst [vmem:[#allocation52_spill] sm:$0xff] %v3940_v60  ;;  %v3954_v15 = vsel %vm692_vm6, %v950_v0, %v3945_v45  ;;  %v1219_v55 = vsel %vm692_vm6, %v3556_v41, %v1212_v26  ;;  %v1618_v0 = vrot.slane %v1613_v29, %v3666_v12  ;;  %v5169_v41 = vrot.slane %v3933_v38, 5 }
 0x1e7   : > { %v3963_v42 = vadd.f32 %v5093_v33, %v920_v7  ;;  %v3966_v34 = vmul.f32 %v981_v6, %v3954_v15  ;;  %1285 = vrot.lane.b32.xlu0 %v1219_v55, %s3237_s15  ;;  %v3969_v59 = vmul.f32 %v1239_v16, %v1219_v55  ;;  %v1684_v60 = vrot.slane %v1679_v5, %v3666_v12 }
 0x1e8   : > { %v3975_v31 = vadd.f32 %v5169_v41, %v2150_v24  ;;  %v1243_v7 = vrot.slane %v1234_v57, %v3671_v14  ;;  %v921_v6 = vmul.f32 %v3936_v2, %v3732_v13  ;;  %v1182_v16 = vmul.f32 %v3948_v18, %v3730_v11  ;;  %v4007_v41 = vld [vmem:[#allocation8 + $0x56] ss:$8 sm:$0x3] }
 0x1e9   : > { %5168 = vst [vmem:[#allocation53_spill] sm:$0xff] %v3963_v42  ;;  %v989_v33 = vrot.slane %v3966_v34, 2  ;;  %v5096_v55 = vrot.slane %v3969_v59, 1  ;;  %v1657_v42 = vpop.permute.xlu1 %1656  ;;  %v3987_v40 = vpop.permute.xlu0 %1213  ;;  %v1688_v11 = vrot.slane %v1679_v5, %v3671_v14  ;;  %5170 = vst [vmem:[#allocation54_spill] sm:$0xff] %v4007_v41 }
 0x1ea   : > { %v1664_v49 = vsel %vm692_vm6, %v3574_v47, %v1657_v42  ;;  %v3995_v57 = vsel %vm692_vm6, %v1212_v26, %v3987_v40  ;;  %v1625_v26 = vmul.f32 %v1618_v0, %v3746_v44 }
 0x1eb   : > { %v3997_v13 = vadd.f32 %v989_v33, %v921_v6  ;;  %v4001_v34 = vadd.f32 %v5096_v55, %v1182_v16  ;;  %1730 = vrot.lane.b32.xlu0 %v1664_v49, %s3237_s15  ;;  %v4005_v24 = vmul.f32 %v1684_v60, %v1664_v49  ;;  %v4010_v47 = vmul.f32 %v1243_v7, %v3995_v57 }
 0x1ec   : > { %v1183_v16 = vmul.f32 %v3978_v58, %v3748_v46  ;;  %v4020_v55 = vrot.slane %v1613_v29, %v3671_v14  ;;  %v2237_v29 = vrot.slane %v4007_v41, %v3671_v14  ;;  %v2152_v41 = vmul.f32 %v3913_v43, %v3710_v52 }
 0x1ed   : > { %v4013_v21 = vpop.permute.xlu1 %2192  ;;  %v4015_v6 = vpop.permute.xlu0 %1658  ;;  %v5099_v60 = vrot.slane %v4005_v24, 7  ;;  %v5101_v7 = vrot.slane %v4010_v47, 1  ;;  %v919_v52 = vmul.f32 %v3936_v2, %v3726_v10  ;;  %v5177_v2 = vrot.slane %v3933_v38, 5 }
 0x1ee   : > { %5171 = vst [vmem:[#allocation55_spill] sm:$0xff] %v4013_v21  ;;  %5172 = vst [vmem:[#allocation56_spill] sm:$0xff] %v4015_v6  ;;  %v2200_v5 = vsel %vm705_vm7, %v3584_v50, %v4013_v21  ;;  %v4031_v44 = vsel %vm692_vm6, %v1657_v42, %v4015_v6  ;;  %v4043_v50 = vld [vmem:[#allocation8 + $0x13] ss:$8 sm:$0x3] }
 0x1ef   : > { %2263 = vrot.lane.b32.xlu0 %v2200_v5, %s3238_s17  ;;  %v4035_v46 = vmul.f32 %v1688_v11, %v4031_v44  ;;  %v4041_v49 = vadd.f32 %v5099_v60, %v1625_v26  ;;  %5173 = vst [vmem:[#allocation57_spill] sm:$0xff] %v4043_v50  ;;  %v4047_v19 = vadd.f32 %v5101_v7, %v1183_v16  ;;  %v641_v60 = vld [vmem:[#allocation8 + $0x3] ss:$8 sm:$0x3] }
 0x1f0   : > { %v1626_v11 = vmul.f32 %v4020_v55, %v3758_v23  ;;  %v1006_v23 = vrot.slane %v4043_v50, %v3671_v14  ;;  %v1259_v6 = vld [vmem:[#allocation8 + $0x22] ss:$8 sm:$0x3]  ;;  %v4093_v10 = vrot.slane %v641_v60, %v3671_v14 }
 0x1f1   : > { %v4049_v42 = vpop.permute.xlu1 %961  ;;  %v4051_v21 = vpop.permute.xlu0 %2194  ;;  %v5105_v5 = vrot.slane %v4035_v46, 7 }
 0x1f2   : > { %5174 = vst [vmem:[#allocation58_spill] sm:$0xff] %v4049_v42  ;;  %5175 = vst [vmem:[#allocation59_spill] sm:$0xff] %v4051_v21  ;;  %v969_v26 = vsel %vm705_vm7, %v3593_v53, %v4049_v42  ;;  %v4066_v16 = vsel %vm705_vm7, %v4051_v21, %v3578_v48  ;;  %v4081_v48 = vrot.slane %v641_v60, %v3666_v12 }
 0x1f3   : > { %1032 = vrot.lane.b32.xlu1 %v969_v26, %s3238_s17  ;;  %v4073_v7 = vadd.f32 %v5105_v5, %v1626_v11  ;;  %v2241_v53 = vmul.f32 %v2237_v29, %v4066_v16  ;;  %v2226_v11 = vadd.f32 %v5177_v2, %v2152_v41  ;;  %v1180_v5 = vmul.f32 %v3948_v18, %v3724_v9 }
 0x1f4   : > { %v1268_v60 = vrot.slane %v1259_v6, %v3671_v14  ;;  %v993_v9 = vadd.f32 %v989_v33, %v919_v52  ;;  %v656_v33 = vmul.f32 %v4093_v10, %v3785_v17  ;;  %v1628_v17 = vmul.f32 %v4020_v55, %v3760_v3 }
 0x1f5   : > { %v1224_v43 = vpop.permute.xlu1 %1223  ;;  %v4078_v42 = vpop.permute.xlu0 %963  ;;  %v2245_v26 = vrot.slane %v2241_v53, 5  ;;  %v1627_v53 = vmul.f32 %v1618_v0, %v3740_v28  ;;  %v5179_v2 = vrot.slane %v3969_v59, 1 }
 0x1f6   : > { %5176 = vst [vmem:[#allocation60_spill] sm:$0xff] %v4078_v42  ;;  %v4087_v50 = vsel %vm705_vm7, %v4078_v42, %v3587_v51  ;;  %v1231_v29 = vsel %vm705_vm7, %v3602_v56, %v1224_v43  ;;  %v4104_v51 = vrot.slane %v3855_v61, %v3671_v14  ;;  %v1264_v56 = vrot.slane %v1259_v6, %v3666_v12  ;;  %v1704_v42 = vld [vmem:[#allocation8 + $0x40] ss:$8 sm:$0x3] }
 0x1f7   : > { %v1010_v21 = vmul.f32 %v1006_v23, %v4087_v50  ;;  %1294 = vrot.lane.b32.xlu0 %v1231_v29, %s3238_s17  ;;  %v4109_v38 = vadd.f32 %v2245_v26, %v3975_v31  ;;  %v4111_v41 = vadd.f32 %v2245_v26, %v2226_v11  ;;  %v711_v23 = vld [vmem:[#allocation8 + $0x2] ss:$8 sm:$0x3]  ;;  %v655_v29 = vmul.f32 %v4081_v48, %v3777_v27  ;;  %v736_v27 = vld [vmem:[#allocation8 + $0x4] ss:$8 sm:$0x3] }
 0x1f8   : > { %v1181_v61 = vmul.f32 %v3978_v58, %v3742_v36  ;;  %v1713_v58 = vrot.slane %v1704_v42, %v3671_v14  ;;  %v1254_v11 = vadd.f32 %v5179_v2, %v1180_v5  ;;  %v745_v5 = vrot.slane %v736_v27, %v3671_v14 }
 0x1f9   : > { %5178 = vst [vmem:[#allocation61_spill] sm:$0xff] %v4111_v41  ;;  %v1014_v28 = vrot.slane %v1010_v21, 2  ;;  %v1669_v18 = vpop.permute.xlu1 %1668  ;;  %v1226_v0 = vpop.permute.xlu0 %1225 }
 0x1fa   : > { %v4120_v6 = vsel %vm705_vm7, %v1226_v0, %v3596_v54  ;;  %v4124_v31 = vsel %vm705_vm7, %v1224_v43, %v1226_v0  ;;  %v1676_v21 = vsel %vm705_vm7, %v3625_v63, %v1669_v18  ;;  %v1709_v54 = vrot.slane %v1704_v42, %v3666_v12 }
 0x1fb   : > { %v4131_v52 = vadd.f32 %v1014_v28, %v993_v9  ;;  %v4134_v36 = vadd.f32 %v1014_v28, %v3997_v13  ;;  %1739 = vrot.lane.b32.xlu0 %v1676_v21, %s3238_s17  ;;  %v1271_v43 = vmul.f32 %v1264_v56, %v4124_v31  ;;  %v1272_v26 = vmul.f32 %v1268_v60, %v4120_v6 }
 0x1fc   : > { %v716_v63 = vrot.slane %v711_v23, %v3666_v12  ;;  %v720_v28 = vrot.slane %v711_v23, %v3671_v14  ;;  %v741_v0 = vrot.slane %v736_v27, %v3666_v12  ;;  %v5180_v42 = vrot.slane %v4010_v47, 1 }
 0x1fd   : > { %v685_v13 = vpop.permute.xlu1 %684  ;;  %v1671_v9 = vpop.permute.xlu0 %1670  ;;  %v1275_v56 = vrot.slane %v1271_v43, 1  ;;  %v1276_v41 = vrot.slane %v1272_v26, 1 }
 0x1fe   : > { %v1255_v21 = vadd.f32 %v5180_v42, %v1181_v61  ;;  %v4153_v60 = vsel %vm705_vm7, %v1671_v9, %v3623_v62  ;;  %v4157_v3 = vsel %vm705_vm7, %v1669_v18, %v1671_v9  ;;  %v695_v47 = vsel %vm692_vm6, %v3639_v4, %v685_v13 }
 0x1ff   : > { %v1716_v59 = vmul.f32 %v1709_v54, %v4157_v3  ;;  %v1717_v55 = vmul.f32 %v1713_v58, %v4153_v60  ;;  %v4165_v23 = vadd.f32 %v1275_v56, %v1254_v11  ;;  %v4168_v61 = vadd.f32 %v1275_v56, %v4001_v34  ;;  %762 = vrot.lane.b32.xlu1 %v695_v47, %s3237_s15 }
 0x200   : > { %v723_v62 = vmul.f32 %v716_v63, %v695_v47  ;;  %v4171_v18 = vadd.f32 %v1276_v41, %v1255_v21  ;;  %v5181_v54 = vrot.slane %v4005_v24, 7  ;;  %v4178_v4 = vadd.f32 %v1276_v41, %v4047_v19 }
 0x201   : > { %v1720_v58 = vrot.slane %v1716_v59, 7  ;;  %v1721_v26 = vrot.slane %v1717_v55, 7  ;;  %v700_v2 = vpop.permute.xlu1 %699  ;;  %v4175_v9 = vpop.permute.xlu0 %686  ;;  %v5182_v24 = vrot.slane %v4035_v46, 7  ;;  %v653_v41 = vmul.f32 %v4081_v48, %v3775_v30  ;;  %v5183_v30 = vld [vmem:[#allocation23_spill] sm:$0xff]  ;;  %v5184_v48 = vld [vmem:[#allocation44_spill] sm:$0xff] }
 0x202   : > { %v1701_v43 = vadd.f32 %v5181_v54, %v1627_v53  ;;  %v727_v27 = vrot.slane %v723_v62, 3  ;;  %v694_v34 = vsel %vm692_vm6, %v685_v13, %v4175_v9  ;;  %v708_v63 = vsel %vm705_vm7, %v3653_v8, %v700_v2 }
 0x203   : > { %v1702_v53 = vadd.f32 %v5182_v24, %v1628_v17  ;;  %v4189_v11 = vadd.f32 %v1720_v58, %v4041_v49  ;;  %v724_v21 = vmul.f32 %v720_v28, %v694_v34  ;;  %771 = vrot.lane.b32.xlu0 %v708_v63, %s3238_s17  ;;  %v4195_v19 = vadd.f32 %v1721_v26, %v4073_v7  ;;  %v5187_v24 = vld [vmem:[#allocation26_spill] sm:$0xff] }
 0x204   : > { %v4191_v42 = vadd.f32 %v1720_v58, %v1701_v43  ;;  %v733_v13 = vadd.f32 %v727_v27, %v655_v29  ;;  %v1950_v8 = vrot.slane %v3844_v22, %v3671_v14  ;;  %v1975_v46 = vrot.slane %v3868_v37, %v3671_v14 }
 0x205   : > { %v654_v49 = vmul.f32 %v4093_v10, %v3783_v1  ;;  %v728_v17 = vrot.slane %v724_v21, 3  ;;  %v1921_v28 = vpop.permute.xlu1 %1920  ;;  %v702_v56 = vpop.permute.xlu0 %701  ;;  %v1936_v7 = vsel %vm705_vm7, %v3879_v20, %v3540_v32  ;;  %v4209_v59 = vadd.f32 %v1721_v26, %v1702_v53  ;;  %v5185_v10 = vld [vmem:[#allocation17_spill] sm:$0xff] }
 0x206   : > { %v706_v22 = vsel %vm705_vm7, %v702_v56, %v5183_v30  ;;  %v707_v37 = vsel %vm705_vm7, %v700_v2, %v702_v56  ;;  %v1925_v1 = vsel %vm692_vm6, %v5184_v48, %v1921_v28  ;;  %v1924_v29 = vsel %vm692_vm6, %v1921_v28, %v5185_v10  ;;  %v5186_v20 = vld [vmem:[#allocation25_spill] sm:$0xff]  ;;  %v5197_v56 = vld [vmem:[#allocation58_spill] sm:$0xff]  ;;  %v5199_v10 = vld [vmem:[#allocation28_spill] sm:$0xff] }
 0x207   : > { %v734_v55 = vadd.f32 %v728_v17, %v656_v33  ;;  %v748_v47 = vmul.f32 %v741_v0, %v707_v37  ;;  %v749_v32 = vmul.f32 %v745_v5, %v706_v22  ;;  %1994 = vrot.lane.b32.xlu0 %v1925_v1, %s3237_s15  ;;  %v1890_v62 = vmul.f32 %v4104_v51, %v5186_v20 }
 0x208   : > { %v1954_v54 = vmul.f32 %v1950_v8, %v1925_v1  ;;  %1996 = vrot.lane.b32.xlu1 %v1924_v29, %s3237_s15  ;;  %v1979_v43 = vmul.f32 %v1975_v46, %v1936_v7  ;;  %v731_v58 = vadd.f32 %v727_v27, %v653_v41  ;;  %v732_v26 = vadd.f32 %v728_v17, %v654_v49  ;;  %v5188_v49 = vld [vmem:[#allocation46_spill] sm:$0xff] }
 0x209   : > { %v752_v2 = vrot.slane %v748_v47, 3  ;;  %v753_v63 = vrot.slane %v749_v32, 3  ;;  %v1888_v53 = vmul.f32 %v4104_v51, %v5187_v24  ;;  %v5190_v17 = vld [vmem:[#allocation18_spill] sm:$0xff]  ;;  %v4318_v24 = vld [vmem:[#allocation8 + $0x44] ss:$8 sm:$0x3] }
 0x20a   : > { %v1958_v21 = vrot.slane %v1954_v54, 6  ;;  %v1983_v41 = vrot.slane %v1979_v43, 6  ;;  %v5200_v32 = vld [vmem:[#allocation42_spill] sm:$0xff]  ;;  %v5201_v54 = vld [vmem:[#allocation33_spill] sm:$0xff] }
 0x20b   : > { %v4228_v33 = vadd.f32 %v752_v2, %v731_v58  ;;  %v4230_v0 = vadd.f32 %v753_v63, %v732_v26  ;;  %v4232_v5 = vadd.f32 %v752_v2, %v733_v13  ;;  %v4234_v28 = vadd.f32 %v753_v63, %v734_v55  ;;  %1025 = vrot.lane.b32.xlu0 %v3954_v15, %s3237_s15  ;;  %v5189_v13 = vld [vmem:[#allocation19_spill] sm:$0xff]  ;;  %v1538_v58 = vld [vmem:[#allocation8 + $0x32] ss:$8 sm:$0x3] }
 0x20c   : > { %v1962_v8 = vadd.f32 %v1958_v21, %v1888_v53  ;;  %v1964_v27 = vadd.f32 %v1958_v21, %v1890_v62  ;;  %2005 = vrot.lane.b32.xlu1 %v1936_v7, %s3238_s17  ;;  %v955_v15 = vsel %vm692_vm6, %v3945_v45, %v5189_v13  ;;  %v5191_v45 = vld [vmem:[#allocation20_spill] sm:$0xff]  ;;  %v5202_v26 = vld [vmem:[#allocation43_spill] sm:$0xff]  ;;  %v1543_v21 = vrot.slane %v1538_v58, %v3666_v12 }
 0x20d   : > { %v2018_v13 = vrot.slane %v4318_v24, %v3666_v12 }
 0x20e   : > { %v4239_v46 = vadd.f32 %v1983_v41, %v1962_v8  ;;  %v4241_v51 = vadd.f32 %v1983_v41, %v1964_v27  ;;  %v1547_v8 = vrot.slane %v1538_v58, %v3671_v14  ;;  %v5203_v27 = vld [vmem:[#allocation54_spill] sm:$0xff] }
 0x20f   : > { %2003 = vrot.lane.b32.xlu0 %v5188_v49, %s3238_s17  ;;  %v2233_v41 = vrot.slane %v5203_v27, %v3666_v12 }
 0x210   : > { %2256 = vrot.lane.b32.xlu1 %v3922_v25, %s3237_s15  ;;  %v2186_v25 = vsel %vm692_vm6, %v3906_v35, %v5190_v17 }
 0x213   : > { %1027 = vrot.lane.b32.xlu0 %v955_v15, %s3237_s15  ;;  %v5204_v15 = vld [vmem:[#allocation57_spill] sm:$0xff] }
 0x214   : > { %1287 = vrot.lane.b32.xlu1 %v3995_v57, %s3237_s15  ;;  %v1217_v57 = vsel %vm692_vm6, %v3987_v40, %v5191_v45  ;;  %v5194_v40 = vld [vmem:[#allocation59_spill] sm:$0xff]  ;;  %v1002_v17 = vrot.slane %v5204_v15, %v3666_v12  ;;  %v5216_v15 = vld [vmem:[#allocation49_spill] sm:$0xff] }
 0x217   : > { %1036 = vrot.lane.b32.xlu0 %v4087_v50, %s3238_s17  ;;  %v5193_v50 = vld [vmem:[#allocation56_spill] sm:$0xff] }
 0x218   : > { %1732 = vrot.lane.b32.xlu1 %v4031_v44, %s3237_s15  ;;  %v5192_v44 = vld [vmem:[#allocation21_spill] sm:$0xff] }
 0x219   : > { %v1662_v35 = vsel %vm692_vm6, %v5193_v50, %v5192_v44 }
 0x21b   : > { %764 = vrot.lane.b32.xlu0 %v694_v34, %s3237_s15  ;;  %v5196_v34 = vld [vmem:[#allocation60_spill] sm:$0xff] }
 0x21c   : > { %2258 = vrot.lane.b32.xlu1 %v2186_v25, %s3237_s15  ;;  %v968_v7 = vsel %vm705_vm7, %v5197_v56, %v5196_v34  ;;  %v4341_v34 = vld [vmem:[#allocation8 + $0x53] ss:$8 sm:$0x3] }
 0x21f   : > { %1296 = vrot.lane.b32.xlu0 %v4124_v31, %s3238_s17  ;;  %v5195_v31 = vld [vmem:[#allocation55_spill] sm:$0xff] }
 0x220   : > { %1289 = vrot.lane.b32.xlu1 %v1217_v57, %s3237_s15 }
 0x223   : > { %1741 = vrot.lane.b32.xlu0 %v4157_v3, %s3238_s17  ;;  %v2199_v3 = vsel %vm705_vm7, %v5195_v31, %v5194_v40  ;;  %v5205_v40 = vld [vmem:[#allocation29_spill] sm:$0xff] }
 0x224   : > { %1734 = vrot.lane.b32.xlu1 %v1662_v35, %s3237_s15  ;;  %v2240_v35 = vmul.f32 %v2233_v41, %v2199_v3  ;;  %v5215_v41 = vld [vmem:[#allocation31_spill] sm:$0xff] }
 0x228   : > { %2267 = vrot.lane.b32.xlu1 %v4066_v16, %s3238_s17  ;;  %v5198_v16 = vld [vmem:[#allocation22_spill] sm:$0xff] }
 0x22c   : > { %1298 = vrot.lane.b32.xlu1 %v4120_v6, %s3238_s17  ;;  %v693_v6 = vsel %vm692_vm6, %v4175_v9, %v5198_v16 }
 0x230   : > { %1743 = vrot.lane.b32.xlu1 %v4153_v60, %s3238_s17  ;;  %v1521_v60 = vld [vmem:[#allocation8 + $0x26] ss:$8 sm:$0x3] }
 0x231   : > { %v1526_v30 = vrot.slane %v1521_v60, %v3666_v12  ;;  %v1530_v1 = vrot.slane %v1521_v60, %v3671_v14 }
 0x234   : > { %2265 = vrot.lane.b32.xlu1 %v2199_v3, %s3238_s17  ;;  %v1009_v3 = vmul.f32 %v1002_v17, %v968_v7  ;;  %v5217_v17 = vrot.slane %v5216_v15, 2 }
 0x238   : > { %1034 = vrot.lane.b32.xlu1 %v968_v7, %s3238_s17 }
 0x23c   : > { %766 = vrot.lane.b32.xlu1 %v693_v6, %s3237_s15 }
 0x240   : > { %775 = vrot.lane.b32.xlu1 %v706_v22, %s3238_s17 }
 0x242   : > { %v1501_v48 = vpop.permute.xlu1 %1500 }
 0x243   : > { %v1507_v29 = vsel %vm692_vm6, %v5199_v10, %v1501_v48 }
 0x244   : > { %773 = vrot.lane.b32.xlu1 %v707_v37, %s3238_s17  ;;  %v1533_v55 = vmul.f32 %v1526_v30, %v1507_v29  ;;  %v1503_v47 = vpop.permute.xlu0 %1502  ;;  %v4349_v30 = vld [vmem:[#allocation8 + $0x10] ss:$8 sm:$0x3] }
 0x245   : > { %v1506_v9 = vsel %vm692_vm6, %v1501_v48, %v1503_v47  ;;  %v5206_v48 = vld [vmem:[#allocation24_spill] sm:$0xff]  ;;  %v5208_v47 = vld [vmem:[#allocation27_spill] sm:$0xff] }
 0x246   : > { %v1535_v20 = vadd.f32 %v1533_v55, %v5200_v32  ;;  %v1534_v62 = vmul.f32 %v1530_v1, %v1506_v9  ;;  %v1510_v22 = vpop.permute.xlu1 %1509  ;;  %v5207_v1 = vld [vmem:[#allocation45_spill] sm:$0xff]  ;;  %v2280_v55 = vrot.slane %v4341_v34, %v3666_v12 }
 0x247   : > { %v1519_v43 = vsel %vm705_vm7, %v5201_v54, %v1510_v22  ;;  %v5210_v22 = vld [vmem:[#allocation51_spill] sm:$0xff] }
 0x248   : > { %v1536_v2 = vadd.f32 %v1534_v62, %v5202_v26  ;;  %1556 = vrot.lane.b32.xlu1 %v1507_v29, %s3237_s15  ;;  %v1505_v63 = vpop.permute.xlu0 %1504  ;;  %1566 = vrot.lane.b32.xlu0 %v1519_v43, %s3238_s17  ;;  %v2244_v62 = vrot.slane %v2240_v35, 5  ;;  %v5211_v43 = vld [vmem:[#allocation52_spill] sm:$0xff]  ;;  %v4368_v26 = vld [vmem:[#allocation8 + $0x17] ss:$8 sm:$0x3] }
 0x249   : > { %v1508_v37 = vsel %vm692_vm6, %v1505_v63, %v5199_v10  ;;  %v2151_v10 = vmul.f32 %v5207_v1, %v5206_v48  ;;  %v1311_v35 = vrot.slane %v4368_v26, %v3666_v12  ;;  %v4392_v1 = vld [vmem:[#allocation8 + $0x35] ss:$8 sm:$0x3] }
 0x24a   : > { %v1512_v53 = vpop.permute.xlu1 %1511 }
 0x24c   : > { %1554 = vrot.lane.b32.xlu1 %v1508_v37, %s3237_s15  ;;  %v1514_v49 = vpop.permute.xlu0 %1513  ;;  %1558 = vrot.lane.b32.xlu0 %v1506_v9, %s3237_s15  ;;  %v5209_v9 = vld [vmem:[#allocation48_spill] sm:$0xff]  ;;  %v5212_v37 = vld [vmem:[#allocation35_spill] sm:$0xff] }
 0x24d   : > { %v1517_v25 = vsel %vm705_vm7, %v1514_v49, %v5201_v54  ;;  %v1518_v45 = vsel %vm705_vm7, %v1512_v53, %v1514_v49  ;;  %v918_v32 = vmul.f32 %v5209_v9, %v5208_v47 }
 0x24e   : > { %v1550_v57 = vmul.f32 %v1543_v21, %v1518_v45  ;;  %v1551_v44 = vmul.f32 %v1547_v8, %v1517_v25  ;;  %v4335_v50 = vpop.permute.xlu1 %1992  ;;  %v5213_v21 = vld [vmem:[#allocation47_spill] sm:$0xff] }
 0x24f   : > { %v1999_v31 = vsel %vm692_vm6, %v5205_v40, %v4335_v50  ;;  %v5214_v8 = vrot.slane %v5213_v21, 5 }
 0x250   : > { %v4343_v56 = vadd.f32 %v1550_v57, %v1535_v20  ;;  %v4345_v16 = vadd.f32 %v1551_v44, %v1536_v2  ;;  %1564 = vrot.lane.b32.xlu1 %v1517_v25, %s3238_s17  ;;  %v2025_v6 = vmul.f32 %v2018_v13, %v1999_v31  ;;  %v2002_v60 = vpop.permute.xlu0 %2001  ;;  %1562 = vrot.lane.b32.xlu0 %v1518_v45, %s3238_s17  ;;  %v1013_v2 = vrot.slane %v1009_v3, 2  ;;  %v5218_v45 = vld [vmem:[#allocation30_spill] sm:$0xff] }
 0x251   : > { %v1049_v20 = vrot.slane %v4349_v30, %v3666_v12  ;;  %v2225_v27 = vadd.f32 %v5214_v8, %v2151_v10  ;;  %v992_v25 = vadd.f32 %v5217_v17, %v918_v32  ;;  %v2011_v57 = vsel %vm705_vm7, %v5218_v45, %v2002_v60 }
 0x252   : > { %v2029_v29 = vrot.slane %v2025_v6, 6 }
 0x253   : > { %v2250_v3 = vadd.f32 %v2244_v62, %v2225_v27  ;;  %v1017_v10 = vadd.f32 %v1013_v2, %v992_v25  ;;  %v5222_v27 = vld [vmem:[#allocation39_spill] sm:$0xff] }
 0x254   : > { %v4360_v54 = vadd.f32 %v2029_v29, %v5210_v22  ;;  %v4363_v58 = vadd.f32 %v2029_v29, %v5211_v43  ;;  %v4365_v7 = vpop.permute.xlu0 %2254  ;;  %2064 = vrot.lane.b32.xlu0 %v1999_v31, %s3237_s15  ;;  %v5219_v31 = vld [vmem:[#allocation50_spill] sm:$0xff]  ;;  %v5220_v29 = vld [vmem:[#allocation53_spill] sm:$0xff] }
 0x255   : > { %v4370_v63 = vpop.permute.xlu1 %1023  ;;  %v2261_v53 = vsel %vm692_vm6, %v5212_v37, %v4365_v7  ;;  %v2248_v6 = vadd.f32 %v2244_v62, %v5219_v31 }
 0x256   : > { %v1030_v49 = vsel %vm692_vm6, %v5215_v41, %v4370_v63  ;;  %v2287_v13 = vmul.f32 %v2280_v55, %v2261_v53  ;;  %2326 = vrot.lane.b32.xlu1 %v2261_v53, %s3237_s15  ;;  %v1019_v55 = vadd.f32 %v1013_v2, %v5220_v29  ;;  %v1756_v2 = vrot.slane %v4392_v1, %v3666_v12 }
 0x257   : > { %v1056_v44 = vmul.f32 %v1049_v20, %v1030_v49  ;;  %v5221_v20 = vld [vmem:[#allocation37_spill] sm:$0xff] }
 0x258   : > { %v2291_v48 = vrot.slane %v2287_v13, 5  ;;  %2074 = vrot.lane.b32.xlu0 %v2011_v57, %s3238_s17 }
 0x259   : > { %v1060_v47 = vrot.slane %v1056_v44, 2  ;;  %v4395_v9 = vpop.permute.xlu0 %1285  ;;  %v5223_v44 = vld [vmem:[#allocation32_spill] sm:$0xff] }
 0x25a   : > { %v4397_v32 = vadd.f32 %v2291_v48, %v2248_v6  ;;  %v4399_v60 = vadd.f32 %v2291_v48, %v2250_v3  ;;  %v1292_v62 = vsel %vm692_vm6, %v5221_v20, %v4395_v9  ;;  %1095 = vrot.lane.b32.xlu1 %v1030_v49, %s3237_s15 }
 0x25b   : > { %v4406_v22 = vadd.f32 %v1060_v47, %v1017_v10  ;;  %v4408_v43 = vadd.f32 %v1060_v47, %v1019_v55  ;;  %v1318_v53 = vmul.f32 %v1311_v35, %v1292_v62  ;;  %v5225_v10 = vld [vmem:[#allocation34_spill] sm:$0xff]  ;;  %v4444_v55 = vld [vmem:[#allocation8 + $0x1] ss:$8 sm:$0x3] }
 0x25d   : > { %v1322_v21 = vrot.slane %v1318_v53, 1  ;;  %v4412_v8 = vpop.permute.xlu0 %1730 }
 0x25e   : > { %v1737_v13 = vsel %vm692_vm6, %v5222_v27, %v4412_v8  ;;  %1357 = vrot.lane.b32.xlu1 %v1292_v62, %s3237_s15  ;;  %v788_v62 = vrot.slane %v4444_v55, %v3666_v12 }
 0x25f   : > { %v4420_v49 = vadd.f32 %v1322_v21, %v4165_v23  ;;  %v4423_v15 = vadd.f32 %v1322_v21, %v4168_v61  ;;  %v1763_v17 = vmul.f32 %v1756_v2, %v1737_v13  ;;  %v5224_v61 = vld [vmem:[#allocation40_spill] sm:$0xff]  ;;  %v5227_v2 = vld [vmem:[#allocation38_spill] sm:$0xff] }
 0x261   : > { %v1767_v25 = vrot.slane %v1763_v17, 7  ;;  %v2264_v57 = vpop.permute.xlu0 %2263 }
 0x262   : > { %v2273_v35 = vsel %vm705_vm7, %v5223_v44, %v2264_v57  ;;  %1802 = vrot.lane.b32.xlu1 %v1737_v13, %s3237_s15  ;;  %v2022_v57 = vrot.slane %v4318_v24, %v3671_v14 }
 0x263   : > { %v4430_v31 = vadd.f32 %v1767_v25, %v4189_v11  ;;  %v4433_v6 = vadd.f32 %v1767_v25, %v4191_v42  ;;  %2336 = vrot.lane.b32.xlu0 %v2273_v35, %s3238_s17  ;;  %v5226_v42 = vld [vmem:[#allocation36_spill] sm:$0xff] }
 0x265   : > { %v1033_v23 = vpop.permute.xlu1 %1032 }
 0x266   : > { %v1042_v3 = vsel %vm705_vm7, %v5224_v61, %v1033_v23 }
 0x267   : > { %1105 = vrot.lane.b32.xlu0 %v1042_v3, %s3238_s17 }
 0x269   : > { %v1295_v48 = vpop.permute.xlu0 %1294 }
 0x26a   : > { %v1304_v29 = vsel %vm705_vm7, %v5225_v10, %v1295_v48  ;;  %v2038_v48 = vld [vmem:[#allocation8 + $0x50] ss:$8 sm:$0x3] }
 0x26b   : > { %1367 = vrot.lane.b32.xlu0 %v1304_v29, %s3238_s17 }
 0x26d   : > { %v1740_v11 = vpop.permute.xlu0 %1739 }
 0x26e   : > { %v1749_v47 = vsel %vm705_vm7, %v5226_v42, %v1740_v11 }
 0x26f   : > { %1812 = vrot.lane.b32.xlu0 %v1749_v47, %s3238_s17 }
 0x271   : > { %v4452_v53 = vpop.permute.xlu1 %762 }
 0x272   : > { %v769_v21 = vsel %vm692_vm6, %v5227_v2, %v4452_v53 }
 0x273   : > { %v795_v13 = vmul.f32 %v788_v62, %v769_v21  ;;  %834 = vrot.lane.b32.xlu0 %v769_v21, %s3237_s15 }
 0x275   : > { %v4459_v17 = vpop.permute.xlu0 %771  ;;  %v799_v25 = vrot.slane %v795_v13, 3 }
 0x277   : > { %v4464_v35 = vadd.f32 %v799_v25, %v4228_v33  ;;  %v4467_v23 = vadd.f32 %v799_v25, %v4232_v5  ;;  %v1053_v33 = vrot.slane %v4349_v30, %v3671_v14  ;;  %v2047_v5 = vrot.slane %v2038_v48, %v3671_v14 }
 0x278   : > { %v2043_v25 = vrot.slane %v2038_v48, %v3666_v12 }
 0x279   : > { %v1995_v3 = vpop.permute.xlu0 %1994 }
 0x27a   : > { %v1998_v29 = vsel %vm692_vm6, %v4335_v50, %v1995_v3  ;;  %v1997_v11 = vpop.permute.xlu1 %1996 }
 0x27b   : > { %v2026_v47 = vmul.f32 %v2022_v57, %v1998_v29  ;;  %v2000_v62 = vsel %vm692_vm6, %v1997_v11, %v5205_v40  ;;  %2066 = vrot.lane.b32.xlu1 %v1998_v29, %s3237_s15  ;;  %v2284_v11 = vrot.slane %v4341_v34, %v3671_v14  ;;  %v4501_v34 = vld [vmem:[#allocation8 + $0x14] ss:$8 sm:$0x3] }
 0x27c   : > { %2062 = vrot.lane.b32.xlu0 %v2000_v62, %s3237_s15 }
 0x27d   : > { %v2030_v24 = vrot.slane %v2026_v47, 6  ;;  %v1026_v21 = vpop.permute.xlu0 %1025 }
 0x27e   : > { %v1029_v50 = vsel %vm692_vm6, %v4370_v63, %v1026_v21  ;;  %v2006_v13 = vpop.permute.xlu1 %2005 }
 0x27f   : > { %v2034_v40 = vadd.f32 %v2030_v24, %v4239_v46  ;;  %v2036_v57 = vadd.f32 %v2030_v24, %v4241_v51  ;;  %v1057_v3 = vmul.f32 %v1053_v33, %v1029_v50  ;;  %v2009_v30 = vsel %vm705_vm7, %v2006_v13, %v5218_v45 }
 0x280   : > { %v2051_v29 = vmul.f32 %v2047_v5, %v2009_v30  ;;  %2072 = vrot.lane.b32.xlu1 %v2009_v30, %s3238_s17  ;;  %v1315_v51 = vrot.slane %v4368_v26, %v3671_v14 }
 0x281   : > { %v1061_v47 = vrot.slane %v1057_v3, 2  ;;  %v2004_v63 = vpop.permute.xlu0 %2003 }
 0x282   : > { %v2055_v62 = vrot.slane %v2051_v29, 6  ;;  %v2010_v48 = vsel %vm705_vm7, %v2004_v63, %v2006_v13  ;;  %v2257_v46 = vpop.permute.xlu1 %2256 }
 0x283   : > { %v1065_v33 = vadd.f32 %v1061_v47, %v4131_v52  ;;  %v1067_v45 = vadd.f32 %v1061_v47, %v4134_v36  ;;  %v2050_v5 = vmul.f32 %v2043_v25, %v2010_v48  ;;  %v2260_v24 = vsel %vm692_vm6, %v4365_v7, %v2257_v46 }
 0x284   : > { %v4503_v21 = vadd.f32 %v2055_v62, %v2034_v40  ;;  %v4505_v3 = vadd.f32 %v2055_v62, %v2036_v57  ;;  %v2288_v13 = vmul.f32 %v2284_v11, %v2260_v24  ;;  %2070 = vrot.lane.b32.xlu1 %v2010_v48, %s3238_s17  ;;  %2328 = vrot.lane.b32.xlu0 %v2260_v24, %s3237_s15 }
 0x285   : > { %v2054_v26 = vrot.slane %v2050_v5, 6  ;;  %v1028_v52 = vpop.permute.xlu0 %1027  ;;  %v1078_v7 = vrot.slane %v4501_v34, %v3671_v14  ;;  %v1760_v11 = vrot.slane %v4392_v1, %v3671_v14  ;;  %v792_v1 = vrot.slane %v4444_v55, %v3671_v14 }
 0x286   : > { %v2292_v30 = vrot.slane %v2288_v13, 5  ;;  %v1031_v36 = vsel %vm692_vm6, %v1028_v52, %v5215_v41  ;;  %v1288_v25 = vpop.permute.xlu1 %1287  ;;  %v5228_v41 = vld [vmem:[#allocation61_spill] sm:$0xff] }
 0x287   : > { %v4515_v40 = vadd.f32 %v2054_v26, %v4360_v54  ;;  %v4518_v57 = vadd.f32 %v2054_v26, %v4363_v58  ;;  %v1291_v29 = vsel %vm692_vm6, %v4395_v9, %v1288_v25 }
 0x288   : > { %v2296_v47 = vadd.f32 %v2292_v30, %v4109_v38  ;;  %v2298_v63 = vadd.f32 %v2292_v30, %v5228_v41  ;;  %v1319_v62 = vmul.f32 %v1315_v51, %v1291_v29  ;;  %1093 = vrot.lane.b32.xlu1 %v1031_v36, %s3237_s15  ;;  %1097 = vrot.lane.b32.xlu0 %v1029_v50, %s3237_s15 }
 0x289   : > { %v4529_v54 = vpop.permute.xlu0 %1036 }
 0x28a   : > { %v1323_v58 = vrot.slane %v1319_v62, 1  ;;  %v1040_v9 = vsel %vm705_vm7, %v4529_v54, %v5224_v61  ;;  %v1733_v48 = vpop.permute.xlu1 %1732 }
 0x28b   : > { %v1082_v46 = vmul.f32 %v1078_v7, %v1040_v9  ;;  %v1736_v38 = vsel %vm692_vm6, %v4412_v8, %v1733_v48 }
 0x28c   : > { %v1327_v51 = vadd.f32 %v1323_v58, %v4171_v18  ;;  %v1329_v50 = vadd.f32 %v1323_v58, %v4178_v4  ;;  %v1764_v5 = vmul.f32 %v1760_v11, %v1736_v38  ;;  %1359 = vrot.lane.b32.xlu0 %v1291_v29, %s3237_s15  ;;  %v1331_v29 = vld [vmem:[#allocation8 + $0x23] ss:$8 sm:$0x3] }
 0x28d   : > { %v1086_v24 = vrot.slane %v1082_v46, 2  ;;  %v765_v13 = vpop.permute.xlu0 %764  ;;  %v1340_v58 = vrot.slane %v1331_v29, %v3671_v14 }
 0x28e   : > { %v1768_v26 = vrot.slane %v1764_v5, 7  ;;  %v4546_v61 = vsel %vm692_vm6, %v4452_v53, %v765_v13  ;;  %v2259_v52 = vpop.permute.xlu1 %2258 }
 0x28f   : > { %v4548_v8 = vadd.f32 %v1086_v24, %v1065_v33  ;;  %v4550_v30 = vadd.f32 %v1086_v24, %v1067_v45  ;;  %v796_v18 = vmul.f32 %v792_v1, %v4546_v61  ;;  %v2262_v33 = vsel %vm692_vm6, %v2259_v52, %v5212_v37  ;;  %v2300_v45 = vld [vmem:[#allocation8 + $0x57] ss:$8 sm:$0x3] }
 0x290   : > { %v1772_v4 = vadd.f32 %v1768_v26, %v4195_v19  ;;  %v1774_v55 = vadd.f32 %v1768_v26, %v4209_v59  ;;  %1804 = vrot.lane.b32.xlu0 %v1736_v38, %s3237_s15  ;;  %v1776_v38 = vld [vmem:[#allocation8 + $0x41] ss:$8 sm:$0x3] }
 0x291   : > { %v800_v36 = vrot.slane %v796_v18, 3  ;;  %v1297_v41 = vpop.permute.xlu0 %1296  ;;  %v1781_v26 = vrot.slane %v1776_v38, %v3666_v12  ;;  %v1785_v52 = vrot.slane %v1776_v38, %v3671_v14  ;;  %v4631_v38 = vld [vmem:[#allocation2 + $0x58] sm:$0xff] }
 0x292   : > { %v1290_v25 = vpop.permute.xlu1 %1289  ;;  %2910 = vmatprep.mubr.msk.f32.mxu0 %vm3239_vm8, %v4631_v38 }
 0x293   : > { %v4557_v7 = vadd.f32 %v800_v36, %v4230_v0  ;;  %v4560_v53 = vadd.f32 %v800_v36, %v4234_v28  ;;  %v1293_v59 = vsel %vm692_vm6, %v1290_v25, %v5221_v20  ;;  %v2309_v0 = vrot.slane %v2300_v45, %v3671_v14 }
 0x294   : > { %2324 = vrot.lane.b32.xlu0 %v2262_v33, %s3237_s15  ;;  %v1336_v20 = vrot.slane %v1331_v29, %v3666_v12  ;;  %v2305_v33 = vrot.slane %v2300_v45, %v3666_v12 }
 0x295   : > { %v1742_v18 = vpop.permute.xlu0 %1741 }
 0x296   : > { %v1735_v19 = vpop.permute.xlu1 %1734 }
 0x297   : > { %v1738_v28 = vsel %vm692_vm6, %v1735_v19, %v5222_v27 }
 0x298   : > { %1355 = vrot.lane.b32.xlu0 %v1293_v59, %s3237_s15 }
 0x29a   : > { %v2268_v11 = vpop.permute.xlu1 %2267 }
 0x29b   : > { %v2271_v37 = vsel %vm705_vm7, %v2268_v11, %v5223_v44 }
 0x29c   : > { %v2313_v62 = vmul.f32 %v2309_v0, %v2271_v37  ;;  %1800 = vrot.lane.b32.xlu0 %v1738_v28, %s3237_s15  ;;  %2334 = vrot.lane.b32.xlu1 %v2271_v37, %s3238_s17 }
 0x29e   : > { %v2317_v48 = vrot.slane %v2313_v62, 5  ;;  %v1299_v46 = vpop.permute.xlu1 %1298 }
 0x29f   : > { %v1302_v27 = vsel %vm705_vm7, %v1299_v46, %v5225_v10  ;;  %v4586_v44 = vsel %vm705_vm7, %v1297_v41, %v1299_v46 }
 0x2a0   : > { %v4588_v1 = vadd.f32 %v2317_v48, %v2296_v47  ;;  %v4590_v5 = vadd.f32 %v2317_v48, %v2298_v63  ;;  %v1343_v24 = vmul.f32 %v1336_v20, %v4586_v44  ;;  %v1344_v13 = vmul.f32 %v1340_v58, %v1302_v27  ;;  %1103 = vrot.lane.b32.xlu1 %v1040_v9, %s3238_s17 }
 0x2a2   : > { %v1347_v36 = vrot.slane %v1343_v24, 1  ;;  %v1348_v10 = vrot.slane %v1344_v13, 1  ;;  %v1744_v25 = vpop.permute.xlu1 %1743  ;;  %v424_v13 = vld [vmem:[#allocation11 + $0x68] sm:$0xff] }
 0x2a3   : > { %v1747_v47 = vsel %vm705_vm7, %v1744_v25, %v5226_v42  ;;  %v4601_v63 = vsel %vm705_vm7, %v1742_v18, %v1744_v25  ;;  %v421_v25 = vld [vmem:[#allocation11 + $0x50] sm:$0xff] }
 0x2a4   : > { %v4605_v9 = vadd.f32 %v1347_v36, %v4420_v49  ;;  %v4607_v19 = vadd.f32 %v1348_v10, %v1327_v51  ;;  %v4610_v59 = vadd.f32 %v1347_v36, %v4423_v15  ;;  %v4612_v0 = vadd.f32 %v1348_v10, %v1329_v50  ;;  %1365 = vrot.lane.b32.xlu1 %v1302_v27, %s3238_s17  ;;  %v426_v51 = vld [vmem:[#allocation11 + $0x78] sm:$0xff]  ;;  %v425_v50 = vld [vmem:[#allocation11 + $0x70] sm:$0xff] }
 0x2a5   : > { %v1788_v42 = vmul.f32 %v1781_v26, %v4601_v63  ;;  %v1789_v29 = vmul.f32 %v1785_v52, %v1747_v47  ;;  %v1074_v15 = vrot.slane %v4501_v34, %v3666_v12  ;;  %2879 = vmatpush3.msra.mxu0 %v426_v51  ;;  %v423_v52 = vld [vmem:[#allocation11 + $0x60] sm:$0xff] }
 0x2a6   : > { %v2266_v28 = vpop.permute.xlu1 %2265  ;;  %2880 = vmatprep.subr.mxu0 %v4631_v38 }
 0x2a7   : > { %v1792_v37 = vrot.slane %v1788_v42, 7  ;;  %v1793_v41 = vrot.slane %v1789_v29, 7  ;;  %v2272_v45 = vsel %vm705_vm7, %v2266_v28, %v2268_v11  ;;  %2881 = vmatpush3.msra.mxu0 %v425_v50  ;;  %v420_v42 = vld [vmem:[#allocation11 + $0x48] sm:$0xff] }
 0x2a8   : > { %v2312_v49 = vmul.f32 %v2305_v33, %v2272_v45  ;;  %1810 = vrot.lane.b32.xlu1 %v1747_v47, %s3238_s17  ;;  %2882 = vmatprep.subr.mxu0 %v4631_v38 }
 0x2a9   : > { %v4622_v62 = vadd.f32 %v1792_v37, %v4430_v31  ;;  %v4624_v20 = vadd.f32 %v1793_v41, %v1772_v4  ;;  %v4627_v58 = vadd.f32 %v1792_v37, %v4433_v6  ;;  %v4629_v48 = vadd.f32 %v1793_v41, %v1774_v55  ;;  %v808_v55 = vld [vmem:[#allocation8 + $0x5] ss:$8 sm:$0x3]  ;;  %2883 = vmatpush3.msra.mxu0 %v424_v13  ;;  %v419_v41 = vld [vmem:[#allocation11 + $0x40] sm:$0xff] }
 0x2aa   : > { %v2316_v11 = vrot.slane %v2312_v49, 5  ;;  %v1035_v46 = vpop.permute.xlu1 %1034  ;;  %v817_v26 = vrot.slane %v808_v55, %v3671_v14  ;;  %2884 = vmatprep.subr.mxu0 %v4631_v38  ;;  %v813_v10 = vrot.slane %v808_v55, %v3666_v12  ;;  %v1571_v37 = vld [vmem:[#allocation8 + $0x25] ss:$8 sm:$0x3] }
 0x2ab   : > { %v1041_v34 = vsel %vm705_vm7, %v1035_v46, %v4529_v54  ;;  %2885 = vmatpush3.msra.mxu0 %v423_v52  ;;  %v1576_v51 = vrot.slane %v1571_v37, %v3666_v12  ;;  %v417_v46 = vld [vmem:[#allocation11 + $0x30] sm:$0xff] }
 0x2ac   : > { %v4638_v31 = vadd.f32 %v2316_v11, %v4397_v32  ;;  %v4641_v6 = vadd.f32 %v2316_v11, %v4399_v60  ;;  %v1081_v4 = vmul.f32 %v1074_v15, %v1041_v34  ;;  %2332 = vrot.lane.b32.xlu1 %v2272_v45, %s3238_s17  ;;  %1101 = vrot.lane.b32.xlu0 %v1041_v34, %s3238_s17  ;;  %v1588_v11 = vld [vmem:[#allocation8 + $0x33] ss:$8 sm:$0x3] }
 0x2ad   : > { %2886 = vmatprep.subr.mxu0 %v4631_v38  ;;  %v1593_v13 = vrot.slane %v1588_v11, %v3666_v12 }
 0x2ae   : > { %v1085_v27 = vrot.slane %v1081_v4, 2  ;;  %v767_v24 = vpop.permute.xlu1 %766 }
 0x2af   : > { %v770_v54 = vsel %vm692_vm6, %v767_v24, %v5227_v2  ;;  %v5229_v2 = vld [vmem:[#allocation41_spill] sm:$0xff] }
 0x2b0   : > { %v4650_v32 = vadd.f32 %v1085_v27, %v4406_v22  ;;  %v4653_v60 = vadd.f32 %v1085_v27, %v4408_v43  ;;  %836 = vrot.lane.b32.xlu1 %v4546_v61, %s3237_s15  ;;  %832 = vrot.lane.b32.xlu0 %v770_v54, %s3237_s15  ;;  %v781_v22 = vsel %vm705_vm7, %v5229_v2, %v4459_v17  ;;  %v422_v61 = vld [vmem:[#allocation11 + $0x58] sm:$0xff]  ;;  %v416_v27 = vld [vmem:[#allocation11 + $0x28] sm:$0xff] }
 0x2b1   : > { %2887 = vmatpush3.msra.mxu0 %v422_v61 }
 0x2b2   : > { %v776_v18 = vpop.permute.xlu1 %775  ;;  %2888 = vmatprep.subr.mxu0 %v4631_v38 }
 0x2b3   : > { %v779_v43 = vsel %vm705_vm7, %v776_v18, %v5229_v2  ;;  %2889 = vmatpush3.msra.mxu0 %v421_v25 }
 0x2b4   : > { %v821_v36 = vmul.f32 %v817_v26, %v779_v43  ;;  %1363 = vrot.lane.b32.xlu1 %v4586_v44, %s3238_s17  ;;  %844 = vrot.lane.b32.xlu0 %v781_v22, %s3238_s17  ;;  %v415_v26 = vld [vmem:[#allocation11 + $0x20] sm:$0xff] }
 0x2b5   : > { %2890 = vmatprep.subr.mxu0 %v4631_v38 }
 0x2b6   : > { %v825_v47 = vrot.slane %v821_v36, 3  ;;  %v774_v33 = vpop.permute.xlu1 %773  ;;  %2891 = vmatpush3.msra.mxu0 %v420_v42  ;;  %v414_v36 = vld [vmem:[#allocation11 + $0x18] sm:$0xff]  ;;  %v409_v42 = vld [vmem:[%s3457_s29] sm:$0xff] }
 0x2b7   : > { %v780_v17 = vsel %vm705_vm7, %v774_v33, %v776_v18  ;;  %2892 = vmatprep.subr.mxu0 %v4631_v38  ;;  %v412_v33 = vld [vmem:[#allocation11 + $0x8] sm:$0xff] }
 0x2b8   : > { %v4676_v29 = vadd.f32 %v825_v47, %v4557_v7  ;;  %v4679_v44 = vadd.f32 %v825_v47, %v4560_v53  ;;  %v820_v28 = vmul.f32 %v813_v10, %v780_v17  ;;  %1808 = vrot.lane.b32.xlu1 %v4601_v63, %s3238_s17  ;;  %v418_v7 = vld [vmem:[#allocation11 + $0x38] sm:$0xff]  ;;  %v1580_v63 = vrot.slane %v1571_v37, %v3671_v14 }
 0x2b9   : > { %2893 = vmatpush3.msra.mxu0 %v419_v41  ;;  %v2567_v41 = vld [vmem:[#allocation9 + $0x78] sm:$0xff] }
 0x2ba   : > { %5230 = vst [vmem:[#allocation23_spill] sm:$0xff] %v4679_v44  ;;  %v824_v45 = vrot.slane %v820_v28, 3  ;;  %v1557_v49 = vpop.permute.xlu1 %1556  ;;  %v1567_v15 = vpop.permute.xlu0 %1566  ;;  %2894 = vmatprep.subr.mxu0 %v4631_v38  ;;  %v2583_v28 = vld [vmem:[#allocation9 + $0xf8] sm:$0xff] }
 0x2bb   : > { %2895 = vmatpush3.msra.mxu0 %v418_v7  ;;  %v2580_v7 = vld [vmem:[#allocation9 + $0xe0] sm:$0xff] }
 0x2bc   : > { %v4687_v53 = vadd.f32 %v824_v45, %v4464_v35  ;;  %v4690_v50 = vadd.f32 %v824_v45, %v4467_v23  ;;  %842 = vrot.lane.b32.xlu1 %v779_v43, %s3238_s17  ;;  %v1597_v23 = vrot.slane %v1588_v11, %v3671_v14  ;;  %2896 = vmatprep.subr.mxu0 %v4631_v38  ;;  %v2582_v45 = vld [vmem:[#allocation9 + $0xf0] sm:$0xff]  ;;  %v2564_v11 = vld [vmem:[#allocation9 + $0x60] sm:$0xff] }
 0x2bd   : > { %2897 = vmatpush3.msra.mxu0 %v417_v46  ;;  %v2579_v46 = vld [vmem:[#allocation9 + $0xd8] sm:$0xff] }
 0x2be   : > { %5231 = vst [vmem:[#allocation44_spill] sm:$0xff] %v4687_v53  ;;  %5232 = vst [vmem:[#allocation17_spill] sm:$0xff] %v4690_v50  ;;  %v1555_v34 = vpop.permute.xlu1 %1554  ;;  %v1559_v4 = vpop.permute.xlu0 %1558  ;;  %2898 = vmatprep.subr.mxu0 %v4631_v38 }
 0x2bf   : > { %v1561_v55 = vsel %vm692_vm6, %v1555_v34, %v1557_v49  ;;  %v1560_v35 = vsel %vm692_vm6, %v1557_v49, %v1559_v4  ;;  %2899 = vmatpush3.msra.mxu0 %v416_v27  ;;  %v2566_v49 = vld [vmem:[#allocation9 + $0x70] sm:$0xff]  ;;  %v2561_v27 = vld [vmem:[#allocation9 + $0x48] sm:$0xff] }
 0x2c0   : > { %840 = vrot.lane.b32.xlu1 %v780_v17, %s3238_s17  ;;  %v1583_v24 = vmul.f32 %v1576_v51, %v1561_v55  ;;  %v1584_v54 = vmul.f32 %v1580_v63, %v1560_v35  ;;  %2900 = vmatprep.subr.mxu0 %v4631_v38  ;;  %v411_v17 = vld [vmem:[#allocation11] sm:$0xff]  ;;  %v2565_v51 = vld [vmem:[#allocation9 + $0x68] sm:$0xff]  ;;  %v2578_v34 = vld [vmem:[#allocation9 + $0xd0] sm:$0xff] }
 0x2c1   : > { %2901 = vmatpush3.msra.mxu0 %v415_v26  ;;  %v2562_v55 = vld [vmem:[#allocation9 + $0x50] sm:$0xff]  ;;  %v2577_v35 = vld [vmem:[#allocation9 + $0xc8] sm:$0xff]  ;;  %v2575_v26 = vld [vmem:[#allocation9 + $0xb8] sm:$0xff] }
 0x2c2   : > { %v1585_v52 = vadd.f32 %v1583_v24, %v4343_v56  ;;  %v1586_v18 = vadd.f32 %v1584_v54, %v4345_v16  ;;  %v1565_v2 = vpop.permute.xlu1 %1564  ;;  %v1563_v22 = vpop.permute.xlu0 %1562  ;;  %2902 = vmatprep.subr.mxu0 %v4631_v38  ;;  %v413_v16 = vld [vmem:[#allocation11 + $0x10] sm:$0xff]  ;;  %v2576_v24 = vld [vmem:[#allocation9 + $0xc0] sm:$0xff] }
 0x2c3   : > { %v1568_v43 = vsel %vm705_vm7, %v1565_v2, %v1567_v15  ;;  %v1569_v61 = vsel %vm705_vm7, %v1563_v22, %v1565_v2  ;;  %2903 = vmatpush3.msra.mxu0 %v414_v36  ;;  %v2581_v15 = vld [vmem:[#allocation9 + $0xe8] sm:$0xff]  ;;  %v2558_v22 = vld [vmem:[#allocation9 + $0x30] sm:$0xff] }
 0x2c4   : > { %v1601_v10 = vmul.f32 %v1597_v23, %v1568_v43  ;;  %v1600_v56 = vmul.f32 %v1593_v13, %v1569_v61  ;;  %2904 = vmatprep.subr.mxu0 %v4631_v38  ;;  %v2560_v13 = vld [vmem:[#allocation9 + $0x40] sm:$0xff]  ;;  %v2573_v61 = vld [vmem:[#allocation9 + $0xa8] sm:$0xff] }
 0x2c5   : > { %2905 = vmatpush3.msra.mxu0 %v413_v16  ;;  %v2557_v36 = vld [vmem:[#allocation9 + $0x28] sm:$0xff]  ;;  %v2571_v16 = vld [vmem:[#allocation9 + $0x98] sm:$0xff] }
 0x2c6   : > { %v4713_v25 = vadd.f32 %v1601_v10, %v1586_v18  ;;  %v4715_v47 = vadd.f32 %v1600_v56, %v1585_v52  ;;  %2906 = vmatprep.subr.mxu0 %v4631_v38  ;;  %v4720_v37 = vpop.permute.xlu0 %2064  ;;  %v2559_v52 = vld [vmem:[#allocation9 + $0x38] sm:$0xff]  ;;  %v2574_v18 = vld [vmem:[#allocation9 + $0xb0] sm:$0xff]  ;;  %v2572_v10 = vld [vmem:[#allocation9 + $0xa0] sm:$0xff] }
 0x2c7   : > { %2907 = vmatpush3.msra.mxu0 %v412_v33  ;;  %v2556_v56 = vld [vmem:[#allocation9 + $0x20] sm:$0xff] }
 0x2c8   : > { %2908 = vmatprep.subr.mxu0 %v4631_v38  ;;  %v2563_v38 = vld [vmem:[#allocation9 + $0x58] sm:$0xff]  ;;  %v4727_v23 = vpop.permute.xlu1 %2326 }
 0x2c9   : > { %2909 = vmatpush3.msra.mxu0 %v411_v17  ;;  %v2555_v17 = vld [vmem:[#allocation9 + $0x18] sm:$0xff] }
 0x2ca   : > { %2911 = vmatmul.mubr.f32.vlgmr.msra.gmra.mxu0 %v409_v42  ;;  %2843 = vmatprep.subr.mxu0 %v2583_v28  ;;  %v4723_v63 = vpop.permute.xlu0 %2074  ;;  %v2570_v28 = vld [vmem:[#allocation9 + $0x90] sm:$0xff] }
 0x2cb   : > { %2844 = vmatpush3.msra.mxu0 %v2567_v41  ;;  %v2554_v41 = vld [vmem:[#allocation9 + $0x10] sm:$0xff] }
 0x2cc   : > { %2845 = vmatprep.subr.mxu0 %v2582_v45  ;;  %v4731_v2 = vpop.permute.xlu1 %1095  ;;  %v2569_v45 = vld [vmem:[#allocation9 + $0x88] sm:$0xff] }
 0x2cd   : > { %2846 = vmatpush3.msra.mxu0 %v2566_v49  ;;  %v2553_v49 = vld [vmem:[#allocation9 + $0x8] sm:$0xff] }
 0x2ce   : > { %2847 = vmatprep.subr.mxu0 %v2581_v15  ;;  %v2079_v15 = vld [vmem:[#allocation8 + $0x43] ss:$8 sm:$0x3] }
 0x2cf   : > { %2848 = vmatpush3.msra.mxu0 %v2565_v51  ;;  %v2568_v51 = vld [vmem:[#allocation9 + $0x80] sm:$0xff] }
 0x2d0   : > { %2849 = vmatprep.subr.mxu0 %v2580_v7  ;;  %v4735_v33 = vpop.permute.xlu1 %1357 }
 0x2d1   : > { %2850 = vmatpush3.msra.mxu0 %v2564_v11  ;;  %v2552_v11 = vld [vmem:[#allocation9] sm:$0xff] }
 0x2d2   : > { %2851 = vmatprep.subr.mxu0 %v2579_v46 }
 0x2d3   : > { %2852 = vmatpush3.msra.mxu0 %v2563_v38  ;;  %v2088_v38 = vrot.slane %v2079_v15, %v3671_v14 }
 0x2d4   : > { %2853 = vmatprep.subr.mxu0 %v2578_v34  ;;  %v4739_v7 = vpop.permute.xlu1 %1802  ;;  %v2084_v34 = vrot.slane %v2079_v15, %v3666_v12 }
 0x2d5   : > { %v4725_v4 = vpop.permute.xlu0 %2336  ;;  %2854 = vmatpush3.msra.mxu0 %v2562_v55 }
 0x2d6   : > { %2855 = vmatprep.subr.mxu0 %v2577_v35  ;;  %v2104_v35 = vld [vmem:[#allocation8 + $0x51] ss:$8 sm:$0x3] }
 0x2d7   : > { %2856 = vmatpush3.msra.mxu0 %v2561_v27 }
 0x2d8   : > { %2857 = vmatprep.subr.mxu0 %v2576_v24 }
 0x2d9   : > { %v4729_v54 = vpop.permute.xlu0 %1105  ;;  %2858 = vmatpush3.msra.mxu0 %v2560_v13 }
 0x2da   : > { %2859 = vmatprep.subr.mxu0 %v2575_v26 }
 0x2db   : > { %2860 = vmatpush3.msra.mxu0 %v2559_v52  ;;  %v2113_v52 = vrot.slane %v2104_v35, %v3671_v14 }
 0x2dc   : > { %2861 = vmatprep.subr.mxu0 %v2574_v18 }
 0x2dd   : > { %v4733_v43 = vpop.permute.xlu0 %1367  ;;  %2862 = vmatpush3.msra.mxu0 %v2558_v22 }
 0x2de   : > { %2863 = vmatprep.subr.mxu0 %v2573_v61 }
 0x2df   : > { %2864 = vmatpush3.msra.mxu0 %v2557_v36 }
 0x2e0   : > { %2865 = vmatprep.subr.mxu0 %v2572_v10 }
 0x2e1   : > { %v4737_v42 = vpop.permute.xlu0 %1812  ;;  %2866 = vmatpush3.msra.mxu0 %v2556_v56  ;;  %v2109_v56 = vrot.slane %v2104_v35, %v3666_v12 }
 0x2e2   : > { %2867 = vmatprep.subr.mxu0 %v2571_v16 }
 0x2e3   : > { %2868 = vmatpush3.msra.mxu0 %v2555_v17 }
 0x2e4   : > { %2869 = vmatprep.subr.mxu0 %v2570_v28 }
 0x2e5   : > { %2870 = vmatpush3.msra.mxu0 %v2554_v41  ;;  %v4741_v46 = vpop.permute.xlu0 %834 }
 0x2e6   : > { %2871 = vmatprep.subr.mxu0 %v2569_v45 }
 0x2e7   : > { %2872 = vmatpush3.msra.mxu0 %v2553_v49 }
 0x2e8   : > { %2873 = vmatprep.subr.mxu0 %v2568_v51 }
 0x2e9   : > { %2874 = vmatpush3.msra.mxu0 %v2552_v11 }
 0x2ed   : > { %v2067_v55 = vpop.permute.xlu1 %2066 }
 0x2ee   : > { %v2063_v27 = vpop.permute.xlu0 %2062  ;;  %v2068_v24 = vsel %vm692_vm6, %v4720_v37, %v2067_v55 }
 0x2ef   : > { %v2069_v13 = vsel %vm692_vm6, %v2063_v27, %v4720_v37  ;;  %v2092_v26 = vmul.f32 %v2088_v38, %v2068_v24 }
 0x2f0   : > { %v2091_v18 = vmul.f32 %v2084_v34, %v2069_v13 }
 0x2f1   : > { %v2096_v22 = vrot.slane %v2092_v26, 6 }
 0x2f2   : > { %v2073_v61 = vpop.permute.xlu1 %2072  ;;  %v2095_v16 = vrot.slane %v2091_v18, 6 }
 0x2f3   : > { %v2076_v36 = vsel %vm705_vm7, %v2073_v61, %v4723_v63  ;;  %v2100_v17 = vadd.f32 %v2096_v22, %v4503_v21  ;;  %v2102_v28 = vadd.f32 %v2096_v22, %v4505_v3 }
 0x2f4   : > { %v2117_v10 = vmul.f32 %v2113_v52, %v2076_v36  ;;  %v2099_v63 = vadd.f32 %v2095_v16, %v4515_v40  ;;  %v2101_v38 = vadd.f32 %v2095_v16, %v4518_v57  ;;  %v4778_v57 = vld [vmem:[#allocation8 + $0x52] ss:$8 sm:$0x3] }
 0x2f5   : > { %v2350_v18 = vrot.slane %v4778_v57, %v3671_v14 }
 0x2f6   : > { %v2121_v41 = vrot.slane %v2117_v10, 6  ;;  %v2329_v37 = vpop.permute.xlu0 %2328  ;;  %v2071_v45 = vpop.permute.xlu1 %2070 }
 0x2f7   : > { %v2077_v49 = vsel %vm705_vm7, %v2071_v45, %v2073_v61  ;;  %v2330_v22 = vsel %vm692_vm6, %v4727_v23, %v2329_v37  ;;  %v1110_v61 = vld [vmem:[#allocation8 + $0x7] ss:$8 sm:$0x3] }
 0x2f8   : > { %v2125_v15 = vadd.f32 %v2121_v41, %v2100_v17  ;;  %v4760_v51 = vadd.f32 %v2121_v41, %v2102_v28  ;;  %v2116_v11 = vmul.f32 %v2109_v56, %v2077_v49  ;;  %v2354_v10 = vmul.f32 %v2350_v18, %v2330_v22  ;;  %v4785_v56 = vld [vmem:[#allocation8 + $0x60] ss:$8 sm:$0x3]  ;;  %v4788_v28 = vld [vmem:[#allocation8 + $0x16] ss:$8 sm:$0x3] }
 0x2f9   : > { %v1119_v17 = vrot.slane %v1110_v61, %v3671_v14  ;;  %v2375_v45 = vrot.slane %v4785_v56, %v3671_v14  ;;  %v1381_v37 = vrot.slane %v4788_v28, %v3671_v14  ;;  %v1115_v18 = vrot.slane %v1110_v61, %v3666_v12 }
 0x2fa   : > { %v2425_v34 = vrot.slane %v2125_v15, 1  ;;  %v5109_v55 = vrot.slane %v4760_v51, 1  ;;  %v2120_v21 = vrot.slane %v2116_v11, 6  ;;  %v1098_v27 = vpop.permute.xlu0 %1097  ;;  %v1094_v16 = vpop.permute.xlu1 %1093  ;;  %v2358_v49 = vrot.slane %v2354_v10, 5 }
 0x2fb   : > { %v1099_v41 = vsel %vm692_vm6, %v4731_v2, %v1098_v27  ;;  %v4797_v15 = vld [vmem:[#allocation8 + $0x34] ss:$8 sm:$0x3] }
 0x2fc   : > { %v2124_v35 = vadd.f32 %v2120_v21, %v2099_v63  ;;  %v4765_v3 = vadd.f32 %v2120_v21, %v2101_v38  ;;  %v4770_v24 = vsel %vm1637_vm4, %v2425_v34, %v5109_v55  ;;  %v4801_v38 = vld [vmem:[#allocation8 + $0x15] ss:$8 sm:$0x3]  ;;  %v1123_v34 = vmul.f32 %v1119_v17, %v1099_v41  ;;  %v4816_v17 = vld [vmem:[#allocation8 + $0x24] ss:$8 sm:$0x3] }
 0x2fd   : > { %v1826_v22 = vrot.slane %v4797_v15, %v3671_v14  ;;  %v1144_v10 = vrot.slane %v4801_v38, %v3671_v14  ;;  %v2346_v55 = vrot.slane %v4778_v57, %v3666_v12 }
 0x2fe   : > { %v2422_v13 = vrot.slane %v2124_v35, 1  ;;  %v5108_v26 = vrot.slane %v4765_v3, 1  ;;  %v1360_v52 = vpop.permute.xlu0 %1359  ;;  %v1127_v61 = vrot.slane %v1123_v34, 2  ;;  %v1406_v34 = vrot.slane %v4816_v17, %v3671_v14 }
 0x2ff   : > { %v1361_v21 = vsel %vm692_vm6, %v4735_v33, %v1360_v52  ;;  %v2364_v52 = vadd.f32 %v2358_v49, %v4590_v5 }
 0x300   : > { %v4776_v40 = vsel %vm1637_vm4, %v2422_v13, %v5108_v26  ;;  %v2362_v13 = vadd.f32 %v2358_v49, %v4588_v1  ;;  %v1385_v41 = vmul.f32 %v1381_v37, %v1361_v21  ;;  %v4822_v1 = vld [vmem:[#allocation8 + $0x42] ss:$8 sm:$0x3]  ;;  %v1100_v26 = vsel %vm692_vm6, %v1094_v16, %v4731_v2 }
 0x301   : > { %v1822_v2 = vrot.slane %v4797_v15, %v3666_v12  ;;  %v1851_v57 = vrot.slane %v4822_v1, %v3671_v14  ;;  %v1122_v50 = vmul.f32 %v1115_v18, %v1100_v26 }
 0x302   : > { %v1805_v36 = vpop.permute.xlu0 %1804 }
 0x306   : > { %v2325_v11 = vpop.permute.xlu0 %2324 }
 0x307   : > { %v2331_v26 = vsel %vm692_vm6, %v2325_v11, %v4727_v23 }
 0x30e   : > { %v4799_v63 = vpop.permute.xlu1 %2334 }
 0x30f   : > { %v2338_v35 = vsel %vm705_vm7, %v4799_v63, %v4725_v4  ;;  %v1806_v4 = vsel %vm692_vm6, %v4739_v7, %v1805_v36  ;;  %v1356_v36 = vpop.permute.xlu0 %1355 }
 0x310   : > { %v2379_v27 = vmul.f32 %v2375_v45, %v2338_v35 }
 0x312   : > { %v2383_v45 = vrot.slane %v2379_v27, 5  ;;  %v1104_v35 = vpop.permute.xlu1 %1103  ;;  %v1830_v27 = vmul.f32 %v1826_v22, %v1806_v4 }
 0x313   : > { %v1107_v5 = vsel %vm705_vm7, %v1104_v35, %v4729_v54  ;;  %v1389_v54 = vrot.slane %v1385_v41, 1  ;;  %v1801_v11 = vpop.permute.xlu0 %1800 }
 0x314   : > { %v2387_v37 = vadd.f32 %v2383_v45, %v2362_v13  ;;  %v4834_v21 = vadd.f32 %v2383_v45, %v2364_v52  ;;  %v1148_v16 = vmul.f32 %v1144_v10, %v1107_v5  ;;  %v1131_v13 = vadd.f32 %v1127_v61, %v4548_v8 }
 0x315   : > { %v1133_v52 = vadd.f32 %v1127_v61, %v4550_v30  ;;  %v1140_v8 = vrot.slane %v4801_v38, %v3666_v12  ;;  %v1834_v41 = vrot.slane %v1830_v27, 7  ;;  %v2371_v61 = vrot.slane %v4785_v56, %v3666_v12 }
 0x316   : > { %v2461_v53 = vrot.slane %v2387_v37, 2  ;;  %v2462_v49 = vrot.slane %v4834_v21, 2  ;;  %v4843_v44 = vpop.permute.xlu1 %1365  ;;  %v1152_v45 = vrot.slane %v1148_v16, 2  ;;  %v1393_v5 = vadd.f32 %v1389_v54, %v4607_v19 }
 0x317   : > { %v1369_v22 = vsel %vm705_vm7, %v4843_v44, %v4733_v43  ;;  %v1126_v43 = vrot.slane %v1122_v50, 2  ;;  %v1395_v23 = vadd.f32 %v1389_v54, %v4612_v0  ;;  %v2353_v16 = vmul.f32 %v2346_v55, %v2331_v26 }
 0x318   : > { %v1410_v18 = vmul.f32 %v1406_v34, %v1369_v22  ;;  %v2463_v10 = vsel %vm1899_vm0, %v2461_v53, %v2462_v49  ;;  %v1156_v30 = vadd.f32 %v1152_v45, %v1131_v13  ;;  %v4859_v4 = vadd.f32 %v1152_v45, %v1133_v52  ;;  %v4867_v53 = vld [vmem:[#allocation8] ss:$8 sm:$0x3] }
 0x319   : > { %v2411_v50 = vrot.slane %v4713_v25, 1  ;;  %v1838_v54 = vadd.f32 %v1834_v41, %v4624_v20  ;;  %v853_v52 = vrot.slane %v4867_v53, %v3666_v12  ;;  %v857_v55 = vrot.slane %v4867_v53, %v3671_v14 }
 0x31a   : > { %v1414_v37 = vrot.slane %v1410_v18, 1  ;;  %v4865_v34 = vpop.permute.xlu1 %1810  ;;  %v2397_v38 = vrot.slane %v1156_v30, 1  ;;  %v2398_v27 = vrot.slane %v4859_v4, 1  ;;  %v1130_v20 = vadd.f32 %v1126_v43, %v4650_v32 }
 0x31b   : > { %v1814_v56 = vsel %vm705_vm7, %v4865_v34, %v4737_v42  ;;  %v1840_v42 = vadd.f32 %v1834_v41, %v4629_v48  ;;  %v2357_v30 = vrot.slane %v2353_v16, 5  ;;  %v1807_v32 = vsel %vm692_vm6, %v1801_v11, %v4739_v7 }
 0x31c   : > { %v1418_v19 = vadd.f32 %v1414_v37, %v1393_v5  ;;  %v1420_v13 = vadd.f32 %v1414_v37, %v1395_v23  ;;  %v1855_v0 = vmul.f32 %v1851_v57, %v1814_v56  ;;  %v4883_v45 = vsel %vm1637_vm4, %v2397_v38, %v2398_v27 }
 0x31d   : > { %v1362_v56 = vsel %vm692_vm6, %v1356_v36, %v4735_v33  ;;  %v2361_v33 = vadd.f32 %v2357_v30, %v4638_v31  ;;  %v2363_v36 = vadd.f32 %v2357_v30, %v4641_v6 }
 0x31e   : > { %v2415_v22 = vadd.f32 %v2411_v50, %v1418_v19  ;;  %v4886_v25 = vadd.f32 %v2411_v50, %v1420_v13  ;;  %v1859_v26 = vrot.slane %v1855_v0, 7  ;;  %v1102_v57 = vpop.permute.xlu0 %1101  ;;  %v2333_v18 = vpop.permute.xlu1 %2332 }
 0x31f   : > { %v1108_v5 = vsel %vm705_vm7, %v1102_v57, %v1104_v35  ;;  %v2339_v23 = vsel %vm705_vm7, %v2333_v18, %v4799_v63  ;;  %v1132_v35 = vadd.f32 %v1126_v43, %v4653_v60  ;;  %v5233_v63 = vrot.slane %v4760_v51, 1 }
 0x320   : > { %v2443_v37 = vrot.slane %v2415_v22, 2  ;;  %v2444_v38 = vrot.slane %v4886_v25, 2  ;;  %v1863_v48 = vadd.f32 %v1859_v26, %v1838_v54  ;;  %v1865_v41 = vadd.f32 %v1859_v26, %v1840_v42 }
 0x321   : > { %v1147_v16 = vmul.f32 %v1140_v8, %v1108_v5  ;;  %v2378_v50 = vmul.f32 %v2371_v61, %v2339_v23  ;;  %v5234_v60 = vrot.slane %v4788_v28, %v3666_v12  ;;  %v1829_v51 = vmul.f32 %v1822_v2, %v1807_v32  ;;  %v873_v32 = vld [vmem:[#allocation8 + $0x6] ss:$8 sm:$0x3] }
 0x322   : > { %v2433_v19 = vadd.f32 %v4770_v24, %v1863_v48  ;;  %v2435_v13 = vadd.f32 %v5233_v63, %v1865_v41  ;;  %v837_v0 = vpop.permute.xlu1 %836  ;;  %v4908_v54 = vsel %vm1899_vm0, %v2443_v37, %v2444_v38  ;;  %v1402_v28 = vrot.slane %v4816_v17, %v3666_v12  ;;  %v833_v21 = vpop.permute.xlu0 %832 }
 0x323   : > { %v1151_v7 = vrot.slane %v1147_v16, 2  ;;  %v2382_v8 = vrot.slane %v2378_v50, 5  ;;  %v1384_v61 = vmul.f32 %v5234_v60, %v1362_v56  ;;  %v838_v30 = vsel %vm692_vm6, %v4741_v46, %v837_v0 }
 0x324   : > { %v4918_v24 = vadd.f32 %v2463_v10, %v2433_v19  ;;  %v2471_v43 = vadd.f32 %v2462_v49, %v2435_v13  ;;  %v1847_v5 = vrot.slane %v4822_v1, %v3666_v12  ;;  %v839_v41 = vsel %vm692_vm6, %v833_v21, %v4741_v46 }
 0x325   : > { %v1155_v11 = vadd.f32 %v1151_v7, %v1130_v20  ;;  %v4922_v42 = vadd.f32 %v1151_v7, %v1132_v35  ;;  %v2386_v31 = vadd.f32 %v2382_v8, %v2361_v33  ;;  %v2388_v6 = vadd.f32 %v2382_v8, %v2363_v36 }
 0x326   : > { %v2478_v22 = vrot.slane %v4918_v24, 4  ;;  %v2481_v26 = vrot.slane %v2471_v43, 4  ;;  %v1364_v57 = vpop.permute.xlu1 %1363  ;;  %v1388_v49 = vrot.slane %v1384_v61, 1  ;;  %v1833_v20 = vrot.slane %v1829_v51, 7  ;;  %v845_v36 = vpop.permute.xlu0 %844 }
 0x327   : > { %v2394_v15 = vrot.slane %v1155_v11, 1  ;;  %v2395_v2 = vrot.slane %v4922_v42, 1  ;;  %v2458_v10 = vrot.slane %v2386_v31, 2  ;;  %v2459_v18 = vrot.slane %v2388_v6, 2 }
 0x328   : > { %v1370_v17 = vsel %vm705_vm7, %v1364_v57, %v4843_v44  ;;  %v4940_v37 = vsel %vm2476_vm9, %v2478_v22, %v2481_v26  ;;  %v861_v16 = vmul.f32 %v857_v55, %v838_v30  ;;  %v1392_v50 = vadd.f32 %v1388_v49, %v4605_v9 }
 0x329   : > { %v2460_v23 = vsel %vm1899_vm0, %v2458_v10, %v2459_v18  ;;  %v2396_v48 = vsel %vm1637_vm4, %v2394_v15, %v2395_v2  ;;  %v1409_v1 = vmul.f32 %v1402_v28, %v1370_v17  ;;  %v1394_v35 = vadd.f32 %v1388_v49, %v4610_v59  ;;  %v5236_v15 = vld [vmem:[#allocation23_spill] sm:$0xff] }
 0x32a   : > { %v1809_v56 = vpop.permute.xlu1 %1808  ;;  %v2410_v13 = vrot.slane %v4715_v47, 1  ;;  %v1837_v0 = vadd.f32 %v1833_v20, %v4622_v62  ;;  %v860_v46 = vmul.f32 %v853_v52, %v839_v41  ;;  %v882_v55 = vrot.slane %v873_v32, %v3671_v14  ;;  %v5237_v41 = vld [vmem:[#allocation44_spill] sm:$0xff] }
 0x32b   : > { %v1815_v44 = vsel %vm705_vm7, %v1809_v56, %v4865_v34  ;;  %v1413_v19 = vrot.slane %v1409_v1, 1  ;;  %v1839_v33 = vadd.f32 %v1833_v20, %v4627_v58  ;;  %v865_v59 = vrot.slane %v861_v16, 3 }
 0x32c   : > { %v1854_v63 = vmul.f32 %v1847_v5, %v1815_v44  ;;  %v878_v47 = vrot.slane %v873_v32, %v3666_v12  ;;  %v864_v52 = vrot.slane %v860_v46, 3  ;;  %v5235_v6 = vrot.slane %v4765_v3, 1  ;;  %v5238_v3 = vld [vmem:[#allocation17_spill] sm:$0xff] }
 0x32d   : > { %v1417_v34 = vadd.f32 %v1413_v19, %v1392_v50  ;;  %v1419_v7 = vadd.f32 %v1413_v19, %v1394_v35  ;;  %v869_v57 = vadd.f32 %v865_v59, %v4676_v29  ;;  %v871_v10 = vadd.f32 %v865_v59, %v5236_v15  ;;  %v629_v29 = vld [vmem:[%s5053_s4] sm:$0x3] }
 0x32e   : > { %v1858_v9 = vrot.slane %v1854_v63, 7  ;;  %v843_v8 = vpop.permute.xlu1 %842  ;;  %v868_v1 = vadd.f32 %v864_v52, %v5237_v41  ;;  %v870_v32 = vadd.f32 %v864_v52, %v5238_v3  ;;  %v2499_v63 = vrot.slane %v629_v29, %v3671_v14 }
 0x32f   : > { %v846_v60 = vsel %vm705_vm7, %v843_v8, %v845_v36  ;;  %v2414_v62 = vadd.f32 %v2410_v13, %v1417_v34  ;;  %v2416_v61 = vadd.f32 %v2410_v13, %v1419_v7  ;;  %v3019_v34 = vld [vmem:[#allocation2 + $0x20] sm:$0xff] }
 0x330   : > { %v1862_v51 = vadd.f32 %v1858_v9, %v1837_v0  ;;  %v1864_v53 = vadd.f32 %v1858_v9, %v1839_v33  ;;  %v886_v43 = vmul.f32 %v882_v55, %v846_v60  ;;  %v2509_v14 = vrot.slane %v3019_v34, 3 }
 0x331   : > { %v2440_v11 = vrot.slane %v2414_v62, 2  ;;  %v2441_v31 = vrot.slane %v2416_v61, 2 }
 0x332   : > { %v2432_v58 = vadd.f32 %v4776_v40, %v1862_v51  ;;  %v2434_v26 = vadd.f32 %v5235_v6, %v1864_v53  ;;  %v841_v28 = vpop.permute.xlu1 %840  ;;  %v890_v21 = vrot.slane %v886_v43, 3 }
 0x333   : > { %v847_v49 = vsel %vm705_vm7, %v841_v28, %v843_v8  ;;  %v2442_v5 = vsel %vm1899_vm0, %v2440_v11, %v2441_v31  ;;  %v3020_v8 = vld [vmem:[#allocation2 + $0x10] sm:$0xff] }
 0x334   : > { %v2468_v20 = vadd.f32 %v2460_v23, %v2432_v58  ;;  %v2470_v30 = vadd.f32 %v2459_v18, %v2434_v26  ;;  %v885_v17 = vmul.f32 %v878_v47, %v847_v49  ;;  %v894_v40 = vadd.f32 %v890_v21, %v869_v57 }
 0x335   : > { %v896_v56 = vadd.f32 %v890_v21, %v871_v10  ;;  %v2508_v42 = vrot.slane %v3020_v8, 3 }
 0x336   : > { %v2477_v16 = vrot.slane %v2468_v20, 4  ;;  %v2479_v44 = vrot.slane %v2470_v30, 4  ;;  %v889_v50 = vrot.slane %v885_v17, 3  ;;  %v2405_v39 = vadd.f32 %v4883_v45, %v894_v40 }
 0x337   : > { %v2407_v18 = vadd.f32 %v2398_v27, %v896_v56  ;;  %v2495_v27 = vrot.slane %v629_v29, %v3666_v12 }
 0x338   : > { %v2480_v23 = vsel %vm2476_vm9, %v2477_v16, %v2479_v44  ;;  %v893_v35 = vadd.f32 %v889_v50, %v868_v1  ;;  %v895_v19 = vadd.f32 %v889_v50, %v870_v32  ;;  %v2451_v13 = vadd.f32 %v4908_v54, %v2405_v39 }
 0x339   : > { %v2453_v0 = vadd.f32 %v2444_v38, %v2407_v18 }
 0x33a   : > { %v2404_v46 = vadd.f32 %v2396_v48, %v893_v35  ;;  %v2406_v55 = vadd.f32 %v2395_v2, %v895_v19  ;;  %v2488_v45 = vadd.f32 %v2478_v22, %v2451_v13 }
 0x33b   : > { %v2490_v4 = vadd.f32 %v4940_v37, %v2453_v0  ;;  %v2817_v0 = vld [vmem:[%s5057_s8] ss:$0 sm:$0xff] }
 0x33c   : > { %v2450_v33 = vadd.f32 %v2442_v5, %v2404_v46  ;;  %v2452_v36 = vadd.f32 %v2441_v31, %v2406_v55  ;;  %v2503_v7 = vadd.f32 %v2499_v63, %v2488_v45 }
 0x33d   : > { %v2505_v54 = vadd.f32 %v2499_v63, %v2490_v4 }
 0x33e   : > { %v2487_v9 = vadd.f32 %v2477_v16, %v2450_v33  ;;  %v2489_v25 = vadd.f32 %v2480_v23, %v2452_v36  ;;  %v2513_v38 = vadd.f32 %v2509_v14, %v2503_v7 }
 0x33f   : > { %v2515_v48 = vadd.f32 %v2509_v14, %v2505_v54 }
 0x340   : > { %v2502_v2 = vadd.f32 %v2495_v27, %v2487_v9  ;;  %v2504_v59 = vadd.f32 %v2495_v27, %v2489_v25  ;;  %v2521_v24 = vmul.f32 %v2513_v38, %v2513_v38  ;;  %v2517_v30 = vmul.f32 0.5, %v2513_v38  ;;  %v2818_v27 = vld [vmem:[%s5055_s6] ss:$0 sm:$0xff] }
 0x341   : > { %v2523_v22 = vmul.f32 %v2515_v48, %v2515_v48  ;;  %v2519_v17 = vmul.f32 0.5, %v2515_v48 }
 0x342   : > { %v2512_v60 = vadd.f32 %v2508_v42, %v2502_v2  ;;  %v2514_v37 = vadd.f32 %v2508_v42, %v2504_v59  ;;  %v2525_v47 = vmul.f32 %v2521_v24, %v2513_v38 }
 0x343   : > { %v2527_v12 = vmul.f32 %v2523_v22, %v2515_v48 }
 0x344   : > { %v2520_v62 = vmul.f32 %v2512_v60, %v2512_v60  ;;  %v2522_v61 = vmul.f32 %v2514_v37, %v2514_v37  ;;  %v2529_v51 = vmul.f32 0.044715, %v2525_v47  ;;  %v2516_v32 = vmul.f32 0.5, %v2512_v60 }
 0x345   : > { %v2531_v53 = vmul.f32 0.044715, %v2527_v12  ;;  %v2518_v29 = vmul.f32 0.5, %v2514_v37 }
 0x346   : > { %v2524_v52 = vmul.f32 %v2520_v62, %v2512_v60  ;;  %v2526_v43 = vmul.f32 %v2522_v61, %v2514_v37  ;;  %v2533_v11 = vadd.f32 %v2529_v51, %v2513_v38 }
 0x347   : > { %v2535_v31 = vadd.f32 %v2531_v53, %v2515_v48 }
 0x348   : > { %v2528_v58 = vmul.f32 0.044715, %v2524_v52  ;;  %v2530_v6 = vmul.f32 0.044715, %v2526_v43  ;;  %v2537_v26 = vmul.f32 0.7978846, %v2533_v11 }
 0x349   : > { %v2539_v28 = vmul.f32 0.7978846, %v2535_v31 }
 0x34a   : > { %v2532_v57 = vadd.f32 %v2528_v58, %v2512_v60  ;;  %v2534_v15 = vadd.f32 %v2530_v6, %v2514_v37  ;;  %3010 = vtanh.f32 %v2537_v26 }
 0x34b   : > { %3012 = vtanh.f32 %v2539_v28 }
 0x34c   : > { %v2536_v10 = vmul.f32 0.7978846, %v2532_v57  ;;  %v2538_v21 = vmul.f32 0.7978846, %v2534_v15 }
 0x34e   : > { %3014 = vtanh.f32 %v2536_v10 }
 0x34f   : > { %3016 = vtanh.f32 %v2538_v21 }
 0x357   : > { %v3011_v49 = vpop.eup %3010 }
 0x358   : > { %v3013_v20 = vpop.eup %3012  ;;  %v2545_v5 = vadd.f32 1.0, %v3011_v49 }
 0x359   : > { %v2547_v41 = vadd.f32 1.0, %v3013_v20 }
 0x35a   : > { %v2549_v40 = vmul.f32 %v2545_v5, %v2517_v30 }
 0x35b   : > { %v3015_v1 = vpop.eup %3014  ;;  %v2551_v3 = vmul.f32 %v2547_v41, %v2519_v17 }
 0x35c   : > { %v3017_v56 = vpop.eup %3016  ;;  %v2544_v16 = vadd.f32 1.0, %v3015_v1  ;;  %v2598_v44 = vrot.slane %v2549_v40, 5 }
 0x35d   : > { %v2546_v50 = vadd.f32 1.0, %v3017_v56  ;;  %v2599_v39 = vrot.slane %v2551_v3, 5 }
 0x35e   : > { %v2548_v18 = vmul.f32 %v2544_v16, %v2516_v32 }
 0x35f   : > { %v2550_v23 = vmul.f32 %v2546_v50, %v2518_v29  ;;  %v2600_v35 = vsel %vm665_vm5, %v2598_v44, %v2599_v39 }
 0x360   : > { %v2595_v19 = vrot.slane %v2548_v18, 5  ;;  %2667 = vmatprep.mubr.f32.mxu0 %v2600_v35 }
 0x361   : > { %v2596_v63 = vrot.slane %v2550_v23, 5 }
 0x363   : > { %v2597_v13 = vsel %vm665_vm5, %v2595_v19, %v2596_v63 }
 0x364   : > { %2668 = vmatmul.mubr.f32.vlgmr.msra.gmra.mxu0 %v2597_v13 }
 0x38a   : > { %v500_v46 = vpop.f32.mrf.mxu0 }
 0x38b   : > { %v501_v55 = vadd.f32 %v2817_v0, %v500_v46 }
 0x38c   : > { %v2912_v45 = vpop.f32.mrf.mxu0 }
 0x38d   : > { %2673 = vst [vmem:[%s408_s27] sm:$0xff] %v501_v55 }
 0x424   : > { %v2875_v4 = vpop.f32.mrf.mxu0 }
 0x426   : > { %v2876_v33 = vpop.f32.mrf.mxu0 }
 0x427   : > { %v2877_v36 = vadd.f32 %v2876_v33, %v2875_v4 }
 0x429   : > { %v2670_v34 = vadd.f32 %v2877_v36, %v2818_v27 }
 0x42b   : > { %2674 = vst [vmem:[%s408_s27 + $0x8] sm:$0xff] %v2670_v34 }
 0x42c   : > { %3166 = shalt.err (!%p3163_p3)
}
 0x42d   : > { %s3167_s20 = scalar_lea.hbm %s5006_s14, 256  ;;  %s3171_s19 = scalar_lea.hbm %s5058_s9, 512 }
 0x42e   : > { %p3168_p6 = scmp.ne.s32.totalorder %s5006_s14, %s3167_s20  ;;  %p3172_p13 = scmp.lt.s32.totalorder %s5006_s14, %s5058_s9 }
 0x42f   : > { %p3173_p11 = scmp.lt.s32.totalorder %s3171_s19, %s3167_s20 }
 0x430   : > { %p3169_p4 = pnand %p3168_p6, %p5239_p2 }
 0x431   : > { %p3174_p5 = por %p3173_p11, %p3172_p13 }
 0x432   : > { %p3170_p8 = pneg %p3169_p4 }
 0x434   : > { %p3175_p1 = pnand %p3174_p5, %p3170_p8 }
 0x436   : > { %3178 = shalt.err (!%p3175_p1)
}
 0x437   : > { %s3241_s15 = smov 128   ;;  %s3242_s17 = smov 8  }
 0x438   : > { %2931 = dma.vmem_to_hbm [thread:$0]  (%p5239_p2), %s5001_s1, 256, %s5006_s14, %s2676_s5, %s3241_s15, %s3241_s15, %s3242_s17  }
 0x439 PF: > { %s2704_s13 = sand.u32 1, %s3213_s30   ;;  %p5240_p12 = scmp.ne.s32.totalorder %s5114_s16, 0 }
 0x43a   : > { %p5241_p7 = scmp.ge.s32.totalorder %s3225_s12, 2  ;;  %s2705_s26 = scalar_lea.sflag [#allocation5], %s2704_s13 }
 0x43c   : > { %p2951_p9 = pnand %p5241_p7, %p5240_p12 }
 0x43e   : > { %p2952_p0 = pneg %p2951_p9 }
 0x440   : > { %3208 = dma.done.wait (%p2952_p0), %s2705_s26, 256  }
 0x441   : > { %3210 = vsyncadd (%p2952_p0), %s2705_s26, 4294967040  ;;  %p24_p10 = scmp.ge.s32.totalorder %s3393_s24, 4   ;;  %s5242_s30 = smov %s3217_s10 }
 0x442   : > { %s5243_s10 = smov %s3221_s11  ;;  %s5244_s11 = smov %s3402_s23 }
 0x443   : > { %s5245_s12 = smov %s3393_s24  ;;  %26 = sbr.rel (!%p24_p10) target bundleno = 11 (0xb), region = 165 }
 0x448   :  { %2710 = vsyncpa [#allocation4], 1 }
 0x449   :  { %2712 = vsyncpa [#allocation4 + $0x1], 1 }
 0x44a   :  { %2713 = vsyncpa [#allocation7], 1 }
 0x44b   :  { %2714 = vsyncpa [#allocation10], 1 }
 0x44c   :  { %2715 = vsyncpa [#allocation5], 1 }
 0x44d   :  { %2717 = vsyncpa [#allocation5 + $0x1], 1 }

</bundles_post_ra>
